<compile_context>
chip_gen: v5e
topology: v5e:2x2
jax: 0.10.0
libtpu: 0.0.40
codegen_flags: <defaults>
</compile_context>

<pallas_src>
import functools

import jax
import jax.numpy as jnp
from jax.experimental import pallas as pl
from jax.experimental.pallas import tpu as pltpu

STEM_KP = 256      # stem im2col K (7*7*3 = 147) zero-padded to an aligned 256
STEM_COUT = 128    # stem output channels zero-padded 64 -> 128 (lane-dense stores)
TM_STEM = 256      # row tile for the stem matmul grid
PAD_BASE = 16      # zero-pad rows on each side of the 3x3-conv row scratch


# ---------------------------------------------------------------------------
# Pallas kernels
# ---------------------------------------------------------------------------
def _stem_kernel(x_ref, w_ref, s_ref, b_ref, o_ref):
    """(TM, K) @ (K, C) matmul fused with folded-BN scale/bias and ReLU."""
    acc = jnp.dot(x_ref[...], w_ref[...], preferred_element_type=jnp.float32)
    acc = acc * s_ref[...] + b_ref[...]
    o_ref[...] = jnp.maximum(acc, 0.0).astype(o_ref.dtype)


def _layer1_kernel(*refs, nblocks, H, W):
    """All of layer1 (3 bottlenecks) + mean-over-H for ONE batch element.

    refs = (x, 9*nblocks weight/scale/bias refs, out, pad_scratch)
      x_ref     : (H*W, 128) bf16  post-maxpool activation, row = h*W + w
      per block : w1, s1, b1, w2(9,64,64), s2, b2, w3, s3, b3
                  (block 0's w1 is the merged [downsample | conv1] (128, 320))
      out_ref   : (1, W, 256) f32  mean over H of the last block's output
      pad_ref   : (H*W + 2*PAD_BASE, 64) f32 zero-padded scratch for 3x3 taps
    """
    HW = H * W
    nw = 9 * nblocks
    x_ref = refs[0]
    wrefs = refs[1:1 + nw]
    out_ref = refs[1 + nw]
    pad_ref = refs[2 + nw]

    # Zero once: only rows [PAD_BASE, PAD_BASE+HW) are overwritten below, so the
    # border rows provide the 3x3 conv's zero padding in the H direction.
    pad_ref[...] = jnp.zeros_like(pad_ref)

    # W-direction validity masks for the +/-1 column taps (per output row).
    wcol = jax.lax.broadcasted_iota(jnp.int32, (HW, 1), 0) % W
    wmask = {0: wcol >= 1, 2: wcol < (W - 1)}

    x = x_ref[...]                                   # (HW, 128) bf16
    act = None                                       # (HW, 256) f32 after each block
    for blk in range(nblocks):
        (w1_ref, s1_ref, b1_ref, w2_ref, s2_ref, b2_ref,
         w3_ref, s3_ref, b3_ref) = wrefs[9 * blk:9 * blk + 9]

        if blk == 0:
            # merged [downsample(256) | conv1(64)] matmul sharing the same input
            t = jnp.dot(x, w1_ref[...], preferred_element_type=jnp.float32)
            t = t * s1_ref[...] + b1_ref[...]        # (HW, 320)
            identity = t[:, :256]                    # downsample: BN, no ReLU
            out1 = jnp.maximum(t[:, 256:], 0.0)      # conv1: BN + ReLU -> (HW, 64)
        else:
            t = jnp.dot(act.astype(jnp.bfloat16), w1_ref[...],
                        preferred_element_type=jnp.float32)
            out1 = jnp.maximum(t * s1_ref[...] + b1_ref[...], 0.0)
            identity = act

        # 3x3 conv (stride 1, pad 1) as 9 accumulating tap matmuls on the
        # VMEM-resident, zero-padded activation (no im2col materialization).
        pad_ref[PAD_BASE:PAD_BASE + HW, :] = out1
        acc = jnp.zeros((HW, out1.shape[1]), jnp.float32)
        for dy in range(3):
            for dx in range(3):
                off = PAD_BASE + (dy - 1) * W + (dx - 1)
                tap = pad_ref[off:off + HW, :]
                if dx != 1:                          # mask rows that wrapped in W
                    tap = jnp.where(wmask[dx], tap, 0.0)
                acc = acc + jnp.dot(tap.astype(jnp.bfloat16),
                                    w2_ref[dy * 3 + dx],
                                    preferred_element_type=jnp.float32)
        out2 = jnp.maximum(acc * s2_ref[...] + b2_ref[...], 0.0)   # (HW, 64)

        # 1x1 expand conv + BN + residual add + ReLU
        y = jnp.dot(out2.astype(jnp.bfloat16), w3_ref[...],
                    preferred_element_type=jnp.float32)
        act = jnp.maximum(y * s3_ref[...] + b3_ref[...] + identity, 0.0)

    # fused AdaptiveAvgPool2d((None, 1)) on the permuted tensor == mean over H
    m = act[0:W, :]
    for h in range(1, H):
        m = m + act[h * W:(h + 1) * W, :]
    out_ref[0] = m * (1.0 / H)


# ---------------------------------------------------------------------------
# Pallas wrappers
# ---------------------------------------------------------------------------
def _full_spec(a):
    nd = a.ndim
    return pl.BlockSpec(a.shape, lambda *_: (0,) * nd)


def stem_conv_bn_relu(x_nhwc, w_mat, scale, bias, kh=7, kw=7, stride=2, pad=3):
    """7x7/s2 stem conv via XLA im2col feeding a fused matmul+BN+ReLU kernel.

    Returns bf16 NHWC activation with channels zero-padded to STEM_COUT."""
    n, h, w, cin = x_nhwc.shape
    ho = (h + 2 * pad - kh) // stride + 1
    wo = (w + 2 * pad - kw) // stride + 1
    xp = jnp.pad(x_nhwc, ((0, 0), (pad, pad), (pad, pad), (0, 0)))
    cols = [xp[:, dy:dy + stride * ho:stride, dx:dx + stride * wo:stride, :]
            for dy in range(kh) for dx in range(kw)]
    k = kh * kw * cin
    patches = jnp.concatenate(cols, axis=-1).reshape(n * ho * wo, k)
    kp = w_mat.shape[0]
    patches = jnp.pad(patches, ((0, 0), (0, kp - k))).astype(jnp.bfloat16)

    m = n * ho * wo
    tm = min(TM_STEM, m)
    mp = ((m + tm - 1) // tm) * tm
    if mp != m:
        patches = jnp.pad(patches, ((0, mp - m), (0, 0)))
    cout = w_mat.shape[1]

    out = pl.pallas_call(
        _stem_kernel,
        grid=(mp // tm,),
        in_specs=[pl.BlockSpec((tm, kp), lambda i: (i, 0)),
                  pl.BlockSpec((kp, cout), lambda i: (0, 0)),
                  pl.BlockSpec((1, cout), lambda i: (0, 0)),
                  pl.BlockSpec((1, cout), lambda i: (0, 0))],
        out_specs=pl.BlockSpec((tm, cout), lambda i: (i, 0)),
        out_shape=jax.ShapeDtypeStruct((mp, cout), jnp.bfloat16),
        compiler_params=pltpu.CompilerParams(
            dimension_semantics=("parallel",)),
    )(patches, w_mat, scale, bias)
    return out[:m].reshape(n, ho, wo, cout)


def maxpool_3x3_s2_p1(x):
    """MaxPool2d(kernel=3, stride=2, padding=1), NHWC, plain XLA.

    Per the perf review the old interleaved-taps pallas_call was pure
    relayout/launch overhead, so this trivial elementwise op stays in XLA."""
    n, h, w, c = x.shape
    ho = (h + 2 - 3) // 2 + 1
    wo = (w + 2 - 3) // 2 + 1
    xp = jnp.pad(x, ((0, 0), (1, 1), (1, 1), (0, 0)),
                 constant_values=-jnp.inf)
    out = None
    for dy in range(3):
        for dx in range(3):
            tap = xp[:, dy:dy + 2 * ho:2, dx:dx + 2 * wo:2, :]
            out = tap if out is None else jnp.maximum(out, tap)
    return out


def layer1_fused(x_pooled, flat_weights, nblocks=3):
    """Fused layer1 (3 bottlenecks) + mean-over-H; one grid step per batch elem."""
    n, h, w, c = x_pooled.shape
    hw = h * w
    x2d = x_pooled.reshape(n * hw, c)
    kernel = functools.partial(_layer1_kernel, nblocks=nblocks, H=h, W=w)
    in_specs = [pl.BlockSpec((hw, c), lambda i: (i, 0))]
    in_specs += [_full_spec(a) for a in flat_weights]
    return pl.pallas_call(
        kernel,
        grid=(n,),
        in_specs=in_specs,
        out_specs=pl.BlockSpec((1, w, 256), lambda i: (i, 0, 0)),
        out_shape=jax.ShapeDtypeStruct((n, w, 256), jnp.float32),
        scratch_shapes=[pltpu.VMEM((hw + 2 * PAD_BASE, 64), jnp.float32)],
        compiler_params=pltpu.CompilerParams(
            dimension_semantics=("parallel",)),
    )(x2d, *flat_weights)


# ---------------------------------------------------------------------------
# Parameter init (deterministic, synthetic) + kernel-layout preparation
# ---------------------------------------------------------------------------
def _conv_init(key, kh, kw, cin, cout):
    key, k = jax.random.split(key)
    fan_in = float(kh * kw * cin)
    w = jax.random.normal(k, (kh, kw, cin, cout), jnp.float32) / jnp.sqrt(fan_in)
    return key, w


def _bn_init(key, c):
    key, k1, k2, k3, k4 = jax.random.split(key, 5)
    gamma = 1.0 + 0.1 * jax.random.normal(k1, (c,), jnp.float32)
    beta = 0.1 * jax.random.normal(k2, (c,), jnp.float32)
    mean = 0.1 * jax.random.normal(k3, (c,), jnp.float32)
    var = 1.0 + 0.1 * jnp.abs(jax.random.normal(k4, (c,), jnp.float32))
    scale = gamma / jnp.sqrt(var + 1e-5)
    bias = beta - mean * scale
    return key, scale, bias


def _bottleneck_init(key, cin, planes, expansion=4, downsample=False):
    cout = planes * expansion
    p = {}
    key, p['w1'] = _conv_init(key, 1, 1, cin, planes)
    key, p['s1'], p['b1'] = _bn_init(key, planes)
    key, p['w2'] = _conv_init(key, 3, 3, planes, planes)
    key, p['s2'], p['b2'] = _bn_init(key, planes)
    key, p['w3'] = _conv_init(key, 1, 1, planes, cout)
    key, p['s3'], p['b3'] = _bn_init(key, cout)
    if downsample:
        key, p['wd'] = _conv_init(key, 1, 1, cin, cout)
        key, p['sd'], p['bd'] = _bn_init(key, cout)
    return key, p


def init_params(key):
    params = {}
    key, params['conv1_w'] = _conv_init(key, 7, 7, 3, 64)
    key, params['conv1_s'], params['conv1_b'] = _bn_init(key, 64)
    layer1 = []
    key, b0 = _bottleneck_init(key, 64, 64, downsample=True)
    layer1.append(b0)
    for _ in range(2):
        key, b = _bottleneck_init(key, 256, 64, downsample=False)
        layer1.append(b)
    params['layer1'] = layer1
    return key, params


def prepare_params(params):
    """Repack weights into the bf16 / padded / merged layouts the kernels expect."""
    f32, bf16 = jnp.float32, jnp.bfloat16
    prep = {}
    # stem: im2col matmul weight, K 147->256, Cout 64->128 (zero pads)
    w = params['conv1_w'].reshape(7 * 7 * 3, 64)
    w = jnp.pad(w, ((0, STEM_KP - 7 * 7 * 3), (0, STEM_COUT - 64)))
    prep['stem_w'] = w.astype(bf16)
    prep['stem_s'] = jnp.pad(params['conv1_s'], (0, STEM_COUT - 64),
                             constant_values=1.0).reshape(1, -1).astype(f32)
    prep['stem_b'] = jnp.pad(params['conv1_b'],
                             (0, STEM_COUT - 64)).reshape(1, -1).astype(f32)
    # layer1: flat list of 9 arrays per bottleneck block
    flat = []
    for i, p in enumerate(params['layer1']):
        if i == 0:
            # pad Cin 64->128 (zero rows for the padded stem channels), then merge
            # [downsample | conv1] along N so both share one matmul of the input.
            w1 = jnp.pad(p['w1'].reshape(64, 64), ((0, 64), (0, 0)))
            wd = jnp.pad(p['wd'].reshape(64, 256), ((0, 64), (0, 0)))
            w1m = jnp.concatenate([wd, w1], axis=1)                 # (128, 320)
            s1m = jnp.concatenate([p['sd'], p['s1']]).reshape(1, -1)
            b1m = jnp.concatenate([p['bd'], p['b1']]).reshape(1, -1)
            flat += [w1m.astype(bf16), s1m.astype(f32), b1m.astype(f32)]
        else:
            flat += [p['w1'].reshape(256, 64).astype(bf16),
                     p['s1'].reshape(1, -1).astype(f32),
                     p['b1'].reshape(1, -1).astype(f32)]
        flat += [p['w2'].reshape(9, 64, 64).astype(bf16),            # tap-major
                 p['s2'].reshape(1, -1).astype(f32),
                 p['b2'].reshape(1, -1).astype(f32),
                 p['w3'].reshape(64, 256).astype(bf16),
                 p['s3'].reshape(1, -1).astype(f32),
                 p['b3'].reshape(1, -1).astype(f32)]
    prep['layer1_flat'] = flat
    return prep


# ---------------------------------------------------------------------------
# Forward pass
# ---------------------------------------------------------------------------
def resnet_forward(x_nchw, prep):
    x = jnp.transpose(x_nchw, (0, 2, 3, 1)).astype(jnp.float32)   # NCHW -> NHWC
    # stem: conv7x7/s2 + BN + ReLU (fused Pallas matmul), channels padded to 128
    x = stem_conv_bn_relu(x, prep['stem_w'], prep['stem_s'], prep['stem_b'])
    # maxpool 3x3/s2/p1 (XLA, per perf review)
    x = maxpool_3x3_s2_p1(x)
    # fused layer1 (3 bottlenecks) + mean-over-H epilogue -> (N, W, 256)
    return layer1_fused(x, prep['layer1_flat'])


if __name__ == "__main__":
    key = jax.random.PRNGKey(0)
    key, params = init_params(key)
    prep = prepare_params(params)
    key, xk = jax.random.split(key)
    x = jax.random.normal(xk, (2, 3, 32, 32), dtype=jnp.float32)  # NCHW like PyTorch

    fwd = jax.jit(resnet_forward)
    out = fwd(x, prep)
    out = jax.block_until_ready(out)

    # 32x32 input -> conv1/s2 -> 16x16 -> maxpool/s2 -> 8x8 -> layer1 keeps 8x8
    # output = mean over H -> (N, W, C) = (2, 8, 256)
    assert out.shape == (2, 8, 256), out.shape
    assert bool(jnp.all(jnp.isfinite(out)))
    print("KERNEL_OK")
</pallas_src>

<mosaic_0001>
module attributes {stable_mosaic.version = 11 : i64} {
  func.func @_stem_kernel(%arg0: i32, %arg1: memref<256x256xbf16, #tpu.memory_space<vmem>>, %arg2: memref<256x128xbf16, #tpu.memory_space<vmem>>, %arg3: memref<1x128xf32, #tpu.memory_space<vmem>>, %arg4: memref<1x128xf32, #tpu.memory_space<vmem>>, %arg5: memref<256x128xbf16, #tpu.memory_space<vmem>>) attributes {dimension_semantics = [#tpu.dimension_semantics<parallel>], iteration_bounds = array<i64: 2>, scalar_prefetch = 0 : i64, scratch_operands = 0 : i64, tpu.core_type = #tpu.core_type<tc>, window_params = [{transform_indices = @transform_0, window_bounds = array<i64: 256, 256>}, {pipeline_mode = #tpu.pipeline_mode<synchronous>, transform_indices = @transform_1, window_bounds = array<i64: 256, 128>}, {pipeline_mode = #tpu.pipeline_mode<synchronous>, transform_indices = @transform_2, window_bounds = array<i64: 1, 128>}, {pipeline_mode = #tpu.pipeline_mode<synchronous>, transform_indices = @transform_3, window_bounds = array<i64: 1, 128>}, {transform_indices = @transform_4, window_bounds = array<i64: 256, 128>}]} {
    %c0 = arith.constant 0 : index
    %c0_0 = arith.constant 0 : index
    %0 = vector.load %arg1[%c0, %c0_0] : memref<256x256xbf16, #tpu.memory_space<vmem>>, vector<256x256xbf16>
    %c0_1 = arith.constant 0 : index
    %c0_2 = arith.constant 0 : index
    %1 = vector.load %arg2[%c0_1, %c0_2] : memref<256x128xbf16, #tpu.memory_space<vmem>>, vector<256x128xbf16>
    %cst = arith.constant dense<0.000000e+00> : vector<256x128xf32>
    %2 = tpu.matmul %0, %1, %cst {dimension_numbers = #tpu.dot_dimension_numbers<[1], [0], [0], [1], [0, 0, 1, 1], [], []>} : vector<256x256xbf16>, vector<256x128xbf16>, vector<256x128xf32> -> vector<256x128xf32>
    %c0_3 = arith.constant 0 : index
    %c0_4 = arith.constant 0 : index
    %3 = vector.load %arg3[%c0_3, %c0_4] : memref<1x128xf32, #tpu.memory_space<vmem>>, vector<1x128xf32>
    %4 = vector.broadcast %3 : vector<1x128xf32> to vector<256x128xf32>
    %5 = arith.mulf %2, %4 : vector<256x128xf32>
    %c0_5 = arith.constant 0 : index
    %c0_6 = arith.constant 0 : index
    %6 = vector.load %arg4[%c0_5, %c0_6] : memref<1x128xf32, #tpu.memory_space<vmem>>, vector<1x128xf32>
    %7 = vector.broadcast %6 : vector<1x128xf32> to vector<256x128xf32>
    %8 = arith.addf %5, %7 : vector<256x128xf32>
    %cst_7 = arith.constant 0.000000e+00 : f32
    %9 = vector.broadcast %cst_7 : f32 to vector<256x128xf32>
    %10 = arith.maximumf %8, %9 : vector<256x128xf32>
    %11 = arith.truncf %10 : vector<256x128xf32> to vector<256x128xbf16>
    %c0_8 = arith.constant 0 : index
    %c0_9 = arith.constant 0 : index
    %12 = vector.load %arg5[%c0_8, %c0_9] : memref<256x128xbf16, #tpu.memory_space<vmem>>, vector<256x128xbf16>
    tpu.vector_store %arg5[%c0_8, %c0_9], %11 {strides = array<i32>} : memref<256x128xbf16, #tpu.memory_space<vmem>>, vector<256x128xbf16>,
    return
  }
  func.func @transform_0(%arg0: i32) -> (i32, i32) {
    %c0_i32 = arith.constant 0 : i32
    %c0_i32_0 = arith.constant 0 : i32
    return %arg0, %c0_i32 : i32, i32
  }
  func.func @transform_1(%arg0: i32) -> (i32, i32) {
    %c0_i32 = arith.constant 0 : i32
    %c0_i32_0 = arith.constant 0 : i32
    %c0_i32_1 = arith.constant 0 : i32
    return %c0_i32, %c0_i32_0 : i32, i32
  }
  func.func @transform_2(%arg0: i32) -> (i32, i32) {
    %c0_i32 = arith.constant 0 : i32
    %c0_i32_0 = arith.constant 0 : i32
    %c0_i32_1 = arith.constant 0 : i32
    return %c0_i32, %c0_i32_0 : i32, i32
  }
  func.func @transform_3(%arg0: i32) -> (i32, i32) {
    %c0_i32 = arith.constant 0 : i32
    %c0_i32_0 = arith.constant 0 : i32
    %c0_i32_1 = arith.constant 0 : i32
    return %c0_i32, %c0_i32_0 : i32, i32
  }
  func.func @transform_4(%arg0: i32) -> (i32, i32) {
    %c0_i32 = arith.constant 0 : i32
    %c0_i32_0 = arith.constant 0 : i32
    return %arg0, %c0_i32 : i32, i32
  }
}

module attributes {stable_mosaic.version = 11 : i64} {
  func.func @_layer1_kernel(%arg0: i32, %arg1: memref<64x128xbf16, #tpu.memory_space<vmem>>, %arg2: memref<128x320xbf16, #tpu.memory_space<vmem>>, %arg3: memref<1x320xf32, #tpu.memory_space<vmem>>, %arg4: memref<1x320xf32, #tpu.memory_space<vmem>>, %arg5: memref<9x64x64xbf16, #tpu.memory_space<vmem>>, %arg6: memref<1x64xf32, #tpu.memory_space<vmem>>, %arg7: memref<1x64xf32, #tpu.memory_space<vmem>>, %arg8: memref<64x256xbf16, #tpu.memory_space<vmem>>, %arg9: memref<1x256xf32, #tpu.memory_space<vmem>>, %arg10: memref<1x256xf32, #tpu.memory_space<vmem>>, %arg11: memref<256x64xbf16, #tpu.memory_space<vmem>>, %arg12: memref<1x64xf32, #tpu.memory_space<vmem>>, %arg13: memref<1x64xf32, #tpu.memory_space<vmem>>, %arg14: memref<9x64x64xbf16, #tpu.memory_space<vmem>>, %arg15: memref<1x64xf32, #tpu.memory_space<vmem>>, %arg16: memref<1x64xf32, #tpu.memory_space<vmem>>, %arg17: memref<64x256xbf16, #tpu.memory_space<vmem>>, %arg18: memref<1x256xf32, #tpu.memory_space<vmem>>, %arg19: memref<1x256xf32, #tpu.memory_space<vmem>>, %arg20: memref<256x64xbf16, #tpu.memory_space<vmem>>, %arg21: memref<1x64xf32, #tpu.memory_space<vmem>>, %arg22: memref<1x64xf32, #tpu.memory_space<vmem>>, %arg23: memref<9x64x64xbf16, #tpu.memory_space<vmem>>, %arg24: memref<1x64xf32, #tpu.memory_space<vmem>>, %arg25: memref<1x64xf32, #tpu.memory_space<vmem>>, %arg26: memref<64x256xbf16, #tpu.memory_space<vmem>>, %arg27: memref<1x256xf32, #tpu.memory_space<vmem>>, %arg28: memref<1x256xf32, #tpu.memory_space<vmem>>, %arg29: memref<1x8x256xf32, #tpu.memory_space<vmem>>, %arg30: memref<96x64xf32, #tpu.memory_space<vmem>>) attributes {dimension_semantics = [#tpu.dimension_semantics<parallel>], iteration_bounds = array<i64: 2>, scalar_prefetch = 0 : i64, scratch_operands = 1 : i64, tpu.core_type = #tpu.core_type<tc>, window_params = [{transform_indices = @transform_0, window_bounds = array<i64: 64, 128>}, {pipeline_mode = #tpu.pipeline_mode<synchronous>, transform_indices = @transform_1, window_bounds = array<i64: 128, 320>}, {pipeline_mode = #tpu.pipeline_mode<synchronous>, transform_indices = @transform_2, window_bounds = array<i64: 1, 320>}, {pipeline_mode = #tpu.pipeline_mode<synchronous>, transform_indices = @transform_3, window_bounds = array<i64: 1, 320>}, {pipeline_mode = #tpu.pipeline_mode<synchronous>, transform_indices = @transform_4, window_bounds = array<i64: 9, 64, 64>}, {pipeline_mode = #tpu.pipeline_mode<synchronous>, transform_indices = @transform_5, window_bounds = array<i64: 1, 64>}, {pipeline_mode = #tpu.pipeline_mode<synchronous>, transform_indices = @transform_6, window_bounds = array<i64: 1, 64>}, {pipeline_mode = #tpu.pipeline_mode<synchronous>, transform_indices = @transform_7, window_bounds = array<i64: 64, 256>}, {pipeline_mode = #tpu.pipeline_mode<synchronous>, transform_indices = @transform_8, window_bounds = array<i64: 1, 256>}, {pipeline_mode = #tpu.pipeline_mode<synchronous>, transform_indices = @transform_9, window_bounds = array<i64: 1, 256>}, {pipeline_mode = #tpu.pipeline_mode<synchronous>, transform_indices = @transform_10, window_bounds = array<i64: 256, 64>}, {pipeline_mode = #tpu.pipeline_mode<synchronous>, transform_indices = @transform_11, window_bounds = array<i64: 1, 64>}, {pipeline_mode = #tpu.pipeline_mode<synchronous>, transform_indices = @transform_12, window_bounds = array<i64: 1, 64>}, {pipeline_mode = #tpu.pipeline_mode<synchronous>, transform_indices = @transform_13, window_bounds = array<i64: 9, 64, 64>}, {pipeline_mode = #tpu.pipeline_mode<synchronous>, transform_indices = @transform_14, window_bounds = array<i64: 1, 64>}, {pipeline_mode = #tpu.pipeline_mode<synchronous>, transform_indices = @transform_15, window_bounds = array<i64: 1, 64>}, {pipeline_mode = #tpu.pipeline_mode<synchronous>, transform_indices = @transform_16, window_bounds = array<i64: 64, 256>}, {pipeline_mode = #tpu.pipeline_mode<synchronous>, transform_indices = @transform_17, window_bounds = array<i64: 1, 256>}, {pipeline_mode = #tpu.pipeline_mode<synchronous>, transform_indices = @transform_18, window_bounds = array<i64: 1, 256>}, {pipeline_mode = #tpu.pipeline_mode<synchronous>, transform_indices = @transform_19, window_bounds = array<i64: 256, 64>}, {pipeline_mode = #tpu.pipeline_mode<synchronous>, transform_indices = @transform_20, window_bounds = array<i64: 1, 64>}, {pipeline_mode = #tpu.pipeline_mode<synchronous>, transform_indices = @transform_21, window_bounds = array<i64: 1, 64>}, {pipeline_mode = #tpu.pipeline_mode<synchronous>, transform_indices = @transform_22, window_bounds = array<i64: 9, 64, 64>}, {pipeline_mode = #tpu.pipeline_mode<synchronous>, transform_indices = @transform_23, window_bounds = array<i64: 1, 64>}, {pipeline_mode = #tpu.pipeline_mode<synchronous>, transform_indices = @transform_24, window_bounds = array<i64: 1, 64>}, {pipeline_mode = #tpu.pipeline_mode<synchronous>, transform_indices = @transform_25, window_bounds = array<i64: 64, 256>}, {pipeline_mode = #tpu.pipeline_mode<synchronous>, transform_indices = @transform_26, window_bounds = array<i64: 1, 256>}, {pipeline_mode = #tpu.pipeline_mode<synchronous>, transform_indices = @transform_27, window_bounds = array<i64: 1, 256>}, {transform_indices = @transform_28, window_bounds = array<i64: 1, 8, 256>}]} {
    %cst = arith.constant 0.000000e+00 : f32
    %0 = vector.broadcast %cst : f32 to vector<96x64xf32>
    %c0 = arith.constant 0 : index
    %c0_0 = arith.constant 0 : index
    %1 = vector.load %arg30[%c0, %c0_0] : memref<96x64xf32, #tpu.memory_space<vmem>>, vector<96x64xf32>
    tpu.vector_store %arg30[%c0, %c0_0], %0 {strides = array<i32>} : memref<96x64xf32, #tpu.memory_space<vmem>>, vector<96x64xf32>,
    %2 = tpu.iota {dimensions = array<i32: 0>} : vector<64x1xi32>
    %c8_i32 = arith.constant 8 : i32
    %c0_i32 = arith.constant 0 : i32
    %3 = arith.cmpi eq, %c8_i32, %c0_i32 : i32
    %c1_i32 = arith.constant 1 : i32
    %4 = arith.select %3, %c1_i32, %c8_i32 : i32
    %5 = vector.broadcast %4 : i32 to vector<64x1xi32>
    %6 = arith.remsi %2, %5 : vector<64x1xi32>
    %c0_i32_1 = arith.constant 0 : i32
    %7 = vector.broadcast %c0_i32_1 : i32 to vector<64x1xi32>
    %8 = arith.cmpi ne, %6, %7 : vector<64x1xi32>
    %c0_i32_2 = arith.constant 0 : i32
    %9 = vector.broadcast %c0_i32_2 : i32 to vector<64x1xi32>
    %10 = arith.cmpi slt, %6, %9 : vector<64x1xi32>
    %c0_i32_3 = arith.constant 0 : i32
    %11 = arith.cmpi slt, %4, %c0_i32_3 : i32
    %12 = vector.broadcast %11 : i1 to vector<64x1xi1>
    %13 = vector.broadcast %12 : vector<64x1xi1> to vector<64x1xi1>
    %14 = arith.xori %10, %13 : vector<64x1xi1>
    %15 = arith.andi %14, %8 : vector<64x1xi1>
    %16 = vector.broadcast %4 : i32 to vector<64x1xi32>
    %17 = arith.addi %6, %16 : vector<64x1xi32>
    %18 = arith.select %15, %17, %6 : vector<64x1xi1>, vector<64x1xi32>
    %c1_i32_4 = arith.constant 1 : i32
    %19 = vector.broadcast %c1_i32_4 : i32 to vector<64x1xi32>
    %20 = arith.cmpi sge, %18, %19 : vector<64x1xi32>
    %c7_i32 = arith.constant 7 : i32
    %21 = vector.broadcast %c7_i32 : i32 to vector<64x1xi32>
    %22 = arith.cmpi slt, %18, %21 : vector<64x1xi32>
    %c0_5 = arith.constant 0 : index
    %c0_6 = arith.constant 0 : index
    %23 = vector.load %arg1[%c0_5, %c0_6] : memref<64x128xbf16, #tpu.memory_space<vmem>>, vector<64x128xbf16>
    %c0_7 = arith.constant 0 : index
    %c0_8 = arith.constant 0 : index
    %24 = vector.load %arg2[%c0_7, %c0_8] : memref<128x320xbf16, #tpu.memory_space<vmem>>, vector<128x320xbf16>
    %cst_9 = arith.constant dense<0.000000e+00> : vector<64x320xf32>
    %25 = tpu.matmul %23, %24, %cst_9 {dimension_numbers = #tpu.dot_dimension_numbers<[1], [0], [0], [1], [0, 0, 1, 1], [], []>} : vector<64x128xbf16>, vector<128x320xbf16>, vector<64x320xf32> -> vector<64x320xf32>
    %c0_10 = arith.constant 0 : index
    %c0_11 = arith.constant 0 : index
    %26 = vector.load %arg3[%c0_10, %c0_11] : memref<1x320xf32, #tpu.memory_space<vmem>>, vector<1x320xf32>
    %27 = vector.broadcast %26 : vector<1x320xf32> to vector<64x320xf32>
    %28 = arith.mulf %25, %27 : vector<64x320xf32>
    %c0_12 = arith.constant 0 : index
    %c0_13 = arith.constant 0 : index
    %29 = vector.load %arg4[%c0_12, %c0_13] : memref<1x320xf32, #tpu.memory_space<vmem>>, vector<1x320xf32>
    %30 = vector.broadcast %29 : vector<1x320xf32> to vector<64x320xf32>
    %31 = arith.addf %28, %30 : vector<64x320xf32>
    %32 = vector.extract_strided_slice %31 {offsets = [0, 0], sizes = [64, 256], strides = [1, 1]} : vector<64x320xf32> to vector<64x256xf32>
    %33 = vector.extract_strided_slice %31 {offsets = [0, 256], sizes = [64, 64], strides = [1, 1]} : vector<64x320xf32> to vector<64x64xf32>
    %cst_14 = arith.constant 0.000000e+00 : f32
    %34 = vector.broadcast %cst_14 : f32 to vector<64x64xf32>
    %35 = arith.maximumf %33, %34 : vector<64x64xf32>
    %c16 = arith.constant 16 : index
    %c0_15 = arith.constant 0 : index
    %36 = vector.load %arg30[%c16, %c0_15] : memref<96x64xf32, #tpu.memory_space<vmem>>, vector<64x64xf32>
    tpu.vector_store %arg30[%c16, %c0_15], %35 {strides = array<i32>} : memref<96x64xf32, #tpu.memory_space<vmem>>, vector<64x64xf32>,
    %cst_16 = arith.constant 0.000000e+00 : f32
    %37 = vector.broadcast %cst_16 : f32 to vector<64x64xf32>
    %c7 = arith.constant 7 : index
    %c0_17 = arith.constant 0 : index
    %38 = vector.load %arg30[%c7, %c0_17] : memref<96x64xf32, #tpu.memory_space<vmem>>, vector<64x64xf32>
    %cst_18 = arith.constant 0.000000e+00 : f32
    %39 = vector.shape_cast %20 : vector<64x1xi1> to vector<64x1xi1>
    %40 = vector.broadcast %39 : vector<64x1xi1> to vector<64x64xi1>
    %41 = vector.broadcast %cst_18 : f32 to vector<64x64xf32>
    %42 = arith.select %40, %38, %41 : vector<64x64xi1>, vector<64x64xf32>
    %43 = arith.truncf %42 : vector<64x64xf32> to vector<64x64xbf16>
    %c0_19 = arith.constant 0 : index
    %c0_20 = arith.constant 0 : index
    %c0_21 = arith.constant 0 : index
    %44 = vector.load %arg5[%c0_19, %c0_20, %c0_21] : memref<9x64x64xbf16, #tpu.memory_space<vmem>>, vector<1x64x64xbf16>
    %45 = vector.shape_cast %44 : vector<1x64x64xbf16> to vector<64x64xbf16>
    %cst_22 = arith.constant dense<0.000000e+00> : vector<64x64xf32>
    %46 = tpu.matmul %43, %45, %cst_22 {dimension_numbers = #tpu.dot_dimension_numbers<[1], [0], [0], [1], [0, 0, 1, 1], [], []>} : vector<64x64xbf16>, vector<64x64xbf16>, vector<64x64xf32> -> vector<64x64xf32>
    %47 = arith.addf %37, %46 : vector<64x64xf32>
    %c8 = arith.constant 8 : index
    %c0_23 = arith.constant 0 : index
    %48 = vector.load %arg30[%c8, %c0_23] : memref<96x64xf32, #tpu.memory_space<vmem>>, vector<64x64xf32>
    %49 = arith.truncf %48 : vector<64x64xf32> to vector<64x64xbf16>
    %c1 = arith.constant 1 : index
    %c0_24 = arith.constant 0 : index
    %c0_25 = arith.constant 0 : index
    %50 = vector.load %arg5[%c1, %c0_24, %c0_25] : memref<9x64x64xbf16, #tpu.memory_space<vmem>>, vector<1x64x64xbf16>
    %51 = vector.shape_cast %50 : vector<1x64x64xbf16> to vector<64x64xbf16>
    %cst_26 = arith.constant dense<0.000000e+00> : vector<64x64xf32>
    %52 = tpu.matmul %49, %51, %cst_26 {dimension_numbers = #tpu.dot_dimension_numbers<[1], [0], [0], [1], [0, 0, 1, 1], [], []>} : vector<64x64xbf16>, vector<64x64xbf16>, vector<64x64xf32> -> vector<64x64xf32>
    %53 = arith.addf %47, %52 : vector<64x64xf32>
    %c9 = arith.constant 9 : index
    %c0_27 = arith.constant 0 : index
    %54 = vector.load %arg30[%c9, %c0_27] : memref<96x64xf32, #tpu.memory_space<vmem>>, vector<64x64xf32>
    %cst_28 = arith.constant 0.000000e+00 : f32
    %55 = vector.shape_cast %22 : vector<64x1xi1> to vector<64x1xi1>
    %56 = vector.broadcast %55 : vector<64x1xi1> to vector<64x64xi1>
    %57 = vector.broadcast %cst_28 : f32 to vector<64x64xf32>
    %58 = arith.select %56, %54, %57 : vector<64x64xi1>, vector<64x64xf32>
    %59 = arith.truncf %58 : vector<64x64xf32> to vector<64x64xbf16>
    %c2 = arith.constant 2 : index
    %c0_29 = arith.constant 0 : index
    %c0_30 = arith.constant 0 : index
    %60 = vector.load %arg5[%c2, %c0_29, %c0_30] : memref<9x64x64xbf16, #tpu.memory_space<vmem>>, vector<1x64x64xbf16>
    %61 = vector.shape_cast %60 : vector<1x64x64xbf16> to vector<64x64xbf16>
    %cst_31 = arith.constant dense<0.000000e+00> : vector<64x64xf32>
    %62 = tpu.matmul %59, %61, %cst_31 {dimension_numbers = #tpu.dot_dimension_numbers<[1], [0], [0], [1], [0, 0, 1, 1], [], []>} : vector<64x64xbf16>, vector<64x64xbf16>, vector<64x64xf32> -> vector<64x64xf32>
    %63 = arith.addf %53, %62 : vector<64x64xf32>
    %c15 = arith.constant 15 : index
    %c0_32 = arith.constant 0 : index
    %64 = vector.load %arg30[%c15, %c0_32] : memref<96x64xf32, #tpu.memory_space<vmem>>, vector<64x64xf32>
    %cst_33 = arith.constant 0.000000e+00 : f32
    %65 = vector.shape_cast %20 : vector<64x1xi1> to vector<64x1xi1>
    %66 = vector.broadcast %65 : vector<64x1xi1> to vector<64x64xi1>
    %67 = vector.broadcast %cst_33 : f32 to vector<64x64xf32>
    %68 = arith.select %66, %64, %67 : vector<64x64xi1>, vector<64x64xf32>
    %69 = arith.truncf %68 : vector<64x64xf32> to vector<64x64xbf16>
    %c3 = arith.constant 3 : index
    %c0_34 = arith.constant 0 : index
    %c0_35 = arith.constant 0 : index
    %70 = vector.load %arg5[%c3, %c0_34, %c0_35] : memref<9x64x64xbf16, #tpu.memory_space<vmem>>, vector<1x64x64xbf16>
    %71 = vector.shape_cast %70 : vector<1x64x64xbf16> to vector<64x64xbf16>
    %cst_36 = arith.constant dense<0.000000e+00> : vector<64x64xf32>
    %72 = tpu.matmul %69, %71, %cst_36 {dimension_numbers = #tpu.dot_dimension_numbers<[1], [0], [0], [1], [0, 0, 1, 1], [], []>} : vector<64x64xbf16>, vector<64x64xbf16>, vector<64x64xf32> -> vector<64x64xf32>
    %73 = arith.addf %63, %72 : vector<64x64xf32>
    %c16_37 = arith.constant 16 : index
    %c0_38 = arith.constant 0 : index
    %74 = vector.load %arg30[%c16_37, %c0_38] : memref<96x64xf32, #tpu.memory_space<vmem>>, vector<64x64xf32>
    %75 = arith.truncf %74 : vector<64x64xf32> to vector<64x64xbf16>
    %c4 = arith.constant 4 : index
    %c0_39 = arith.constant 0 : index
    %c0_40 = arith.constant 0 : index
    %76 = vector.load %arg5[%c4, %c0_39, %c0_40] : memref<9x64x64xbf16, #tpu.memory_space<vmem>>, vector<1x64x64xbf16>
    %77 = vector.shape_cast %76 : vector<1x64x64xbf16> to vector<64x64xbf16>
    %cst_41 = arith.constant dense<0.000000e+00> : vector<64x64xf32>
    %78 = tpu.matmul %75, %77, %cst_41 {dimension_numbers = #tpu.dot_dimension_numbers<[1], [0], [0], [1], [0, 0, 1, 1], [], []>} : vector<64x64xbf16>, vector<64x64xbf16>, vector<64x64xf32> -> vector<64x64xf32>
    %79 = arith.addf %73, %78 : vector<64x64xf32>
    %c17 = arith.constant 17 : index
    %c0_42 = arith.constant 0 : index
    %80 = vector.load %arg30[%c17, %c0_42] : memref<96x64xf32, #tpu.memory_space<vmem>>, vector<64x64xf32>
    %cst_43 = arith.constant 0.000000e+00 : f32
    %81 = vector.shape_cast %22 : vector<64x1xi1> to vector<64x1xi1>
    %82 = vector.broadcast %81 : vector<64x1xi1> to vector<64x64xi1>
    %83 = vector.broadcast %cst_43 : f32 to vector<64x64xf32>
    %84 = arith.select %82, %80, %83 : vector<64x64xi1>, vector<64x64xf32>
    %85 = arith.truncf %84 : vector<64x64xf32> to vector<64x64xbf16>
    %c5 = arith.constant 5 : index
    %c0_44 = arith.constant 0 : index
    %c0_45 = arith.constant 0 : index
    %86 = vector.load %arg5[%c5, %c0_44, %c0_45] : memref<9x64x64xbf16, #tpu.memory_space<vmem>>, vector<1x64x64xbf16>
    %87 = vector.shape_cast %86 : vector<1x64x64xbf16> to vector<64x64xbf16>
    %cst_46 = arith.constant dense<0.000000e+00> : vector<64x64xf32>
    %88 = tpu.matmul %85, %87, %cst_46 {dimension_numbers = #tpu.dot_dimension_numbers<[1], [0], [0], [1], [0, 0, 1, 1], [], []>} : vector<64x64xbf16>, vector<64x64xbf16>, vector<64x64xf32> -> vector<64x64xf32>
    %89 = arith.addf %79, %88 : vector<64x64xf32>
    %c23 = arith.constant 23 : index
    %c0_47 = arith.constant 0 : index
    %90 = vector.load %arg30[%c23, %c0_47] : memref<96x64xf32, #tpu.memory_space<vmem>>, vector<64x64xf32>
    %cst_48 = arith.constant 0.000000e+00 : f32
    %91 = vector.shape_cast %20 : vector<64x1xi1> to vector<64x1xi1>
    %92 = vector.broadcast %91 : vector<64x1xi1> to vector<64x64xi1>
    %93 = vector.broadcast %cst_48 : f32 to vector<64x64xf32>
    %94 = arith.select %92, %90, %93 : vector<64x64xi1>, vector<64x64xf32>
    %95 = arith.truncf %94 : vector<64x64xf32> to vector<64x64xbf16>
    %c6 = arith.constant 6 : index
    %c0_49 = arith.constant 0 : index
    %c0_50 = arith.constant 0 : index
    %96 = vector.load %arg5[%c6, %c0_49, %c0_50] : memref<9x64x64xbf16, #tpu.memory_space<vmem>>, vector<1x64x64xbf16>
    %97 = vector.shape_cast %96 : vector<1x64x64xbf16> to vector<64x64xbf16>
    %cst_51 = arith.constant dense<0.000000e+00> : vector<64x64xf32>
    %98 = tpu.matmul %95, %97, %cst_51 {dimension_numbers = #tpu.dot_dimension_numbers<[1], [0], [0], [1], [0, 0, 1, 1], [], []>} : vector<64x64xbf16>, vector<64x64xbf16>, vector<64x64xf32> -> vector<64x64xf32>
    %99 = arith.addf %89, %98 : vector<64x64xf32>
    %c24 = arith.constant 24 : index
    %c0_52 = arith.constant 0 : index
    %100 = vector.load %arg30[%c24, %c0_52] : memref<96x64xf32, #tpu.memory_space<vmem>>, vector<64x64xf32>
    %101 = arith.truncf %100 : vector<64x64xf32> to vector<64x64xbf16>
    %c7_53 = arith.constant 7 : index
    %c0_54 = arith.constant 0 : index
    %c0_55 = arith.constant 0 : index
    %102 = vector.load %arg5[%c7_53, %c0_54, %c0_55] : memref<9x64x64xbf16, #tpu.memory_space<vmem>>, vector<1x64x64xbf16>
    %103 = vector.shape_cast %102 : vector<1x64x64xbf16> to vector<64x64xbf16>
    %cst_56 = arith.constant dense<0.000000e+00> : vector<64x64xf32>
    %104 = tpu.matmul %101, %103, %cst_56 {dimension_numbers = #tpu.dot_dimension_numbers<[1], [0], [0], [1], [0, 0, 1, 1], [], []>} : vector<64x64xbf16>, vector<64x64xbf16>, vector<64x64xf32> -> vector<64x64xf32>
    %105 = arith.addf %99, %104 : vector<64x64xf32>
    %c25 = arith.constant 25 : index
    %c0_57 = arith.constant 0 : index
    %106 = vector.load %arg30[%c25, %c0_57] : memref<96x64xf32, #tpu.memory_space<vmem>>, vector<64x64xf32>
    %cst_58 = arith.constant 0.000000e+00 : f32
    %107 = vector.shape_cast %22 : vector<64x1xi1> to vector<64x1xi1>
    %108 = vector.broadcast %107 : vector<64x1xi1> to vector<64x64xi1>
    %109 = vector.broadcast %cst_58 : f32 to vector<64x64xf32>
    %110 = arith.select %108, %106, %109 : vector<64x64xi1>, vector<64x64xf32>
    %111 = arith.truncf %110 : vector<64x64xf32> to vector<64x64xbf16>
    %c8_59 = arith.constant 8 : index
    %c0_60 = arith.constant 0 : index
    %c0_61 = arith.constant 0 : index
    %112 = vector.load %arg5[%c8_59, %c0_60, %c0_61] : memref<9x64x64xbf16, #tpu.memory_space<vmem>>, vector<1x64x64xbf16>
    %113 = vector.shape_cast %112 : vector<1x64x64xbf16> to vector<64x64xbf16>
    %cst_62 = arith.constant dense<0.000000e+00> : vector<64x64xf32>
    %114 = tpu.matmul %111, %113, %cst_62 {dimension_numbers = #tpu.dot_dimension_numbers<[1], [0], [0], [1], [0, 0, 1, 1], [], []>} : vector<64x64xbf16>, vector<64x64xbf16>, vector<64x64xf32> -> vector<64x64xf32>
    %115 = arith.addf %105, %114 : vector<64x64xf32>
    %c0_63 = arith.constant 0 : index
    %c0_64 = arith.constant 0 : index
    %116 = vector.load %arg6[%c0_63, %c0_64] : memref<1x64xf32, #tpu.memory_space<vmem>>, vector<1x64xf32>
    %117 = vector.broadcast %116 : vector<1x64xf32> to vector<64x64xf32>
    %118 = arith.mulf %115, %117 : vector<64x64xf32>
    %c0_65 = arith.constant 0 : index
    %c0_66 = arith.constant 0 : index
    %119 = vector.load %arg7[%c0_65, %c0_66] : memref<1x64xf32, #tpu.memory_space<vmem>>, vector<1x64xf32>
    %120 = vector.broadcast %119 : vector<1x64xf32> to vector<64x64xf32>
    %121 = arith.addf %118, %120 : vector<64x64xf32>
    %cst_67 = arith.constant 0.000000e+00 : f32
    %122 = vector.broadcast %cst_67 : f32 to vector<64x64xf32>
    %123 = arith.maximumf %121, %122 : vector<64x64xf32>
    %124 = arith.truncf %123 : vector<64x64xf32> to vector<64x64xbf16>
    %c0_68 = arith.constant 0 : index
    %c0_69 = arith.constant 0 : index
    %125 = vector.load %arg8[%c0_68, %c0_69] : memref<64x256xbf16, #tpu.memory_space<vmem>>, vector<64x256xbf16>
    %cst_70 = arith.constant dense<0.000000e+00> : vector<64x256xf32>
    %126 = tpu.matmul %124, %125, %cst_70 {dimension_numbers = #tpu.dot_dimension_numbers<[1], [0], [0], [1], [0, 0, 1, 1], [], []>} : vector<64x64xbf16>, vector<64x256xbf16>, vector<64x256xf32> -> vector<64x256xf32>
    %c0_71 = arith.constant 0 : index
    %c0_72 = arith.constant 0 : index
    %127 = vector.load %arg9[%c0_71, %c0_72] : memref<1x256xf32, #tpu.memory_space<vmem>>, vector<1x256xf32>
    %128 = vector.broadcast %127 : vector<1x256xf32> to vector<64x256xf32>
    %129 = arith.mulf %126, %128 : vector<64x256xf32>
    %c0_73 = arith.constant 0 : index
    %c0_74 = arith.constant 0 : index
    %130 = vector.load %arg10[%c0_73, %c0_74] : memref<1x256xf32, #tpu.memory_space<vmem>>, vector<1x256xf32>
    %131 = vector.broadcast %130 : vector<1x256xf32> to vector<64x256xf32>
    %132 = arith.addf %129, %131 : vector<64x256xf32>
    %133 = arith.addf %132, %32 : vector<64x256xf32>
    %cst_75 = arith.constant 0.000000e+00 : f32
    %134 = vector.broadcast %cst_75 : f32 to vector<64x256xf32>
    %135 = arith.maximumf %133, %134 : vector<64x256xf32>
    %136 = arith.truncf %135 : vector<64x256xf32> to vector<64x256xbf16>
    %c0_76 = arith.constant 0 : index
    %c0_77 = arith.constant 0 : index
    %137 = vector.load %arg11[%c0_76, %c0_77] : memref<256x64xbf16, #tpu.memory_space<vmem>>, vector<256x64xbf16>
    %cst_78 = arith.constant dense<0.000000e+00> : vector<64x64xf32>
    %138 = tpu.matmul %136, %137, %cst_78 {dimension_numbers = #tpu.dot_dimension_numbers<[1], [0], [0], [1], [0, 0, 1, 1], [], []>} : vector<64x256xbf16>, vector<256x64xbf16>, vector<64x64xf32> -> vector<64x64xf32>
    %c0_79 = arith.constant 0 : index
    %c0_80 = arith.constant 0 : index
    %139 = vector.load %arg12[%c0_79, %c0_80] : memref<1x64xf32, #tpu.memory_space<vmem>>, vector<1x64xf32>
    %140 = vector.broadcast %139 : vector<1x64xf32> to vector<64x64xf32>
    %141 = arith.mulf %138, %140 : vector<64x64xf32>
    %c0_81 = arith.constant 0 : index
    %c0_82 = arith.constant 0 : index
    %142 = vector.load %arg13[%c0_81, %c0_82] : memref<1x64xf32, #tpu.memory_space<vmem>>, vector<1x64xf32>
    %143 = vector.broadcast %142 : vector<1x64xf32> to vector<64x64xf32>
    %144 = arith.addf %141, %143 : vector<64x64xf32>
    %cst_83 = arith.constant 0.000000e+00 : f32
    %145 = vector.broadcast %cst_83 : f32 to vector<64x64xf32>
    %146 = arith.maximumf %144, %145 : vector<64x64xf32>
    %c16_84 = arith.constant 16 : index
    %c0_85 = arith.constant 0 : index
    %147 = vector.load %arg30[%c16_84, %c0_85] : memref<96x64xf32, #tpu.memory_space<vmem>>, vector<64x64xf32>
    tpu.vector_store %arg30[%c16_84, %c0_85], %146 {strides = array<i32>} : memref<96x64xf32, #tpu.memory_space<vmem>>, vector<64x64xf32>,
    %cst_86 = arith.constant 0.000000e+00 : f32
    %148 = vector.broadcast %cst_86 : f32 to vector<64x64xf32>
    %c7_87 = arith.constant 7 : index
    %c0_88 = arith.constant 0 : index
    %149 = vector.load %arg30[%c7_87, %c0_88] : memref<96x64xf32, #tpu.memory_space<vmem>>, vector<64x64xf32>
    %cst_89 = arith.constant 0.000000e+00 : f32
    %150 = vector.shape_cast %20 : vector<64x1xi1> to vector<64x1xi1>
    %151 = vector.broadcast %150 : vector<64x1xi1> to vector<64x64xi1>
    %152 = vector.broadcast %cst_89 : f32 to vector<64x64xf32>
    %153 = arith.select %151, %149, %152 : vector<64x64xi1>, vector<64x64xf32>
    %154 = arith.truncf %153 : vector<64x64xf32> to vector<64x64xbf16>
    %c0_90 = arith.constant 0 : index
    %c0_91 = arith.constant 0 : index
    %c0_92 = arith.constant 0 : index
    %155 = vector.load %arg14[%c0_90, %c0_91, %c0_92] : memref<9x64x64xbf16, #tpu.memory_space<vmem>>, vector<1x64x64xbf16>
    %156 = vector.shape_cast %155 : vector<1x64x64xbf16> to vector<64x64xbf16>
    %cst_93 = arith.constant dense<0.000000e+00> : vector<64x64xf32>
    %157 = tpu.matmul %154, %156, %cst_93 {dimension_numbers = #tpu.dot_dimension_numbers<[1], [0], [0], [1], [0, 0, 1, 1], [], []>} : vector<64x64xbf16>, vector<64x64xbf16>, vector<64x64xf32> -> vector<64x64xf32>
    %158 = arith.addf %148, %157 : vector<64x64xf32>
    %c8_94 = arith.constant 8 : index
    %c0_95 = arith.constant 0 : index
    %159 = vector.load %arg30[%c8_94, %c0_95] : memref<96x64xf32, #tpu.memory_space<vmem>>, vector<64x64xf32>
    %160 = arith.truncf %159 : vector<64x64xf32> to vector<64x64xbf16>
    %c1_96 = arith.constant 1 : index
    %c0_97 = arith.constant 0 : index
    %c0_98 = arith.constant 0 : index
    %161 = vector.load %arg14[%c1_96, %c0_97, %c0_98] : memref<9x64x64xbf16, #tpu.memory_space<vmem>>, vector<1x64x64xbf16>
    %162 = vector.shape_cast %161 : vector<1x64x64xbf16> to vector<64x64xbf16>
    %cst_99 = arith.constant dense<0.000000e+00> : vector<64x64xf32>
    %163 = tpu.matmul %160, %162, %cst_99 {dimension_numbers = #tpu.dot_dimension_numbers<[1], [0], [0], [1], [0, 0, 1, 1], [], []>} : vector<64x64xbf16>, vector<64x64xbf16>, vector<64x64xf32> -> vector<64x64xf32>
    %164 = arith.addf %158, %163 : vector<64x64xf32>
    %c9_100 = arith.constant 9 : index
    %c0_101 = arith.constant 0 : index
    %165 = vector.load %arg30[%c9_100, %c0_101] : memref<96x64xf32, #tpu.memory_space<vmem>>, vector<64x64xf32>
    %cst_102 = arith.constant 0.000000e+00 : f32
    %166 = vector.shape_cast %22 : vector<64x1xi1> to vector<64x1xi1>
    %167 = vector.broadcast %166 : vector<64x1xi1> to vector<64x64xi1>
    %168 = vector.broadcast %cst_102 : f32 to vector<64x64xf32>
    %169 = arith.select %167, %165, %168 : vector<64x64xi1>, vector<64x64xf32>
    %170 = arith.truncf %169 : vector<64x64xf32> to vector<64x64xbf16>
    %c2_103 = arith.constant 2 : index
    %c0_104 = arith.constant 0 : index
    %c0_105 = arith.constant 0 : index
    %171 = vector.load %arg14[%c2_103, %c0_104, %c0_105] : memref<9x64x64xbf16, #tpu.memory_space<vmem>>, vector<1x64x64xbf16>
    %172 = vector.shape_cast %171 : vector<1x64x64xbf16> to vector<64x64xbf16>
    %cst_106 = arith.constant dense<0.000000e+00> : vector<64x64xf32>
    %173 = tpu.matmul %170, %172, %cst_106 {dimension_numbers = #tpu.dot_dimension_numbers<[1], [0], [0], [1], [0, 0, 1, 1], [], []>} : vector<64x64xbf16>, vector<64x64xbf16>, vector<64x64xf32> -> vector<64x64xf32>
    %174 = arith.addf %164, %173 : vector<64x64xf32>
    %c15_107 = arith.constant 15 : index
    %c0_108 = arith.constant 0 : index
    %175 = vector.load %arg30[%c15_107, %c0_108] : memref<96x64xf32, #tpu.memory_space<vmem>>, vector<64x64xf32>
    %cst_109 = arith.constant 0.000000e+00 : f32
    %176 = vector.shape_cast %20 : vector<64x1xi1> to vector<64x1xi1>
    %177 = vector.broadcast %176 : vector<64x1xi1> to vector<64x64xi1>
    %178 = vector.broadcast %cst_109 : f32 to vector<64x64xf32>
    %179 = arith.select %177, %175, %178 : vector<64x64xi1>, vector<64x64xf32>
    %180 = arith.truncf %179 : vector<64x64xf32> to vector<64x64xbf16>
    %c3_110 = arith.constant 3 : index
    %c0_111 = arith.constant 0 : index
    %c0_112 = arith.constant 0 : index
    %181 = vector.load %arg14[%c3_110, %c0_111, %c0_112] : memref<9x64x64xbf16, #tpu.memory_space<vmem>>, vector<1x64x64xbf16>
    %182 = vector.shape_cast %181 : vector<1x64x64xbf16> to vector<64x64xbf16>
    %cst_113 = arith.constant dense<0.000000e+00> : vector<64x64xf32>
    %183 = tpu.matmul %180, %182, %cst_113 {dimension_numbers = #tpu.dot_dimension_numbers<[1], [0], [0], [1], [0, 0, 1, 1], [], []>} : vector<64x64xbf16>, vector<64x64xbf16>, vector<64x64xf32> -> vector<64x64xf32>
    %184 = arith.addf %174, %183 : vector<64x64xf32>
    %c16_114 = arith.constant 16 : index
    %c0_115 = arith.constant 0 : index
    %185 = vector.load %arg30[%c16_114, %c0_115] : memref<96x64xf32, #tpu.memory_space<vmem>>, vector<64x64xf32>
    %186 = arith.truncf %185 : vector<64x64xf32> to vector<64x64xbf16>
    %c4_116 = arith.constant 4 : index
    %c0_117 = arith.constant 0 : index
    %c0_118 = arith.constant 0 : index
    %187 = vector.load %arg14[%c4_116, %c0_117, %c0_118] : memref<9x64x64xbf16, #tpu.memory_space<vmem>>, vector<1x64x64xbf16>
    %188 = vector.shape_cast %187 : vector<1x64x64xbf16> to vector<64x64xbf16>
    %cst_119 = arith.constant dense<0.000000e+00> : vector<64x64xf32>
    %189 = tpu.matmul %186, %188, %cst_119 {dimension_numbers = #tpu.dot_dimension_numbers<[1], [0], [0], [1], [0, 0, 1, 1], [], []>} : vector<64x64xbf16>, vector<64x64xbf16>, vector<64x64xf32> -> vector<64x64xf32>
    %190 = arith.addf %184, %189 : vector<64x64xf32>
    %c17_120 = arith.constant 17 : index
    %c0_121 = arith.constant 0 : index
    %191 = vector.load %arg30[%c17_120, %c0_121] : memref<96x64xf32, #tpu.memory_space<vmem>>, vector<64x64xf32>
    %cst_122 = arith.constant 0.000000e+00 : f32
    %192 = vector.shape_cast %22 : vector<64x1xi1> to vector<64x1xi1>
    %193 = vector.broadcast %192 : vector<64x1xi1> to vector<64x64xi1>
    %194 = vector.broadcast %cst_122 : f32 to vector<64x64xf32>
    %195 = arith.select %193, %191, %194 : vector<64x64xi1>, vector<64x64xf32>
    %196 = arith.truncf %195 : vector<64x64xf32> to vector<64x64xbf16>
    %c5_123 = arith.constant 5 : index
    %c0_124 = arith.constant 0 : index
    %c0_125 = arith.constant 0 : index
    %197 = vector.load %arg14[%c5_123, %c0_124, %c0_125] : memref<9x64x64xbf16, #tpu.memory_space<vmem>>, vector<1x64x64xbf16>
    %198 = vector.shape_cast %197 : vector<1x64x64xbf16> to vector<64x64xbf16>
    %cst_126 = arith.constant dense<0.000000e+00> : vector<64x64xf32>
    %199 = tpu.matmul %196, %198, %cst_126 {dimension_numbers = #tpu.dot_dimension_numbers<[1], [0], [0], [1], [0, 0, 1, 1], [], []>} : vector<64x64xbf16>, vector<64x64xbf16>, vector<64x64xf32> -> vector<64x64xf32>
    %200 = arith.addf %190, %199 : vector<64x64xf32>
    %c23_127 = arith.constant 23 : index
    %c0_128 = arith.constant 0 : index
    %201 = vector.load %arg30[%c23_127, %c0_128] : memref<96x64xf32, #tpu.memory_space<vmem>>, vector<64x64xf32>
    %cst_129 = arith.constant 0.000000e+00 : f32
    %202 = vector.shape_cast %20 : vector<64x1xi1> to vector<64x1xi1>
    %203 = vector.broadcast %202 : vector<64x1xi1> to vector<64x64xi1>
    %204 = vector.broadcast %cst_129 : f32 to vector<64x64xf32>
    %205 = arith.select %203, %201, %204 : vector<64x64xi1>, vector<64x64xf32>
    %206 = arith.truncf %205 : vector<64x64xf32> to vector<64x64xbf16>
    %c6_130 = arith.constant 6 : index
    %c0_131 = arith.constant 0 : index
    %c0_132 = arith.constant 0 : index
    %207 = vector.load %arg14[%c6_130, %c0_131, %c0_132] : memref<9x64x64xbf16, #tpu.memory_space<vmem>>, vector<1x64x64xbf16>
    %208 = vector.shape_cast %207 : vector<1x64x64xbf16> to vector<64x64xbf16>
    %cst_133 = arith.constant dense<0.000000e+00> : vector<64x64xf32>
    %209 = tpu.matmul %206, %208, %cst_133 {dimension_numbers = #tpu.dot_dimension_numbers<[1], [0], [0], [1], [0, 0, 1, 1], [], []>} : vector<64x64xbf16>, vector<64x64xbf16>, vector<64x64xf32> -> vector<64x64xf32>
    %210 = arith.addf %200, %209 : vector<64x64xf32>
    %c24_134 = arith.constant 24 : index
    %c0_135 = arith.constant 0 : index
    %211 = vector.load %arg30[%c24_134, %c0_135] : memref<96x64xf32, #tpu.memory_space<vmem>>, vector<64x64xf32>
    %212 = arith.truncf %211 : vector<64x64xf32> to vector<64x64xbf16>
    %c7_136 = arith.constant 7 : index
    %c0_137 = arith.constant 0 : index
    %c0_138 = arith.constant 0 : index
    %213 = vector.load %arg14[%c7_136, %c0_137, %c0_138] : memref<9x64x64xbf16, #tpu.memory_space<vmem>>, vector<1x64x64xbf16>
    %214 = vector.shape_cast %213 : vector<1x64x64xbf16> to vector<64x64xbf16>
    %cst_139 = arith.constant dense<0.000000e+00> : vector<64x64xf32>
    %215 = tpu.matmul %212, %214, %cst_139 {dimension_numbers = #tpu.dot_dimension_numbers<[1], [0], [0], [1], [0, 0, 1, 1], [], []>} : vector<64x64xbf16>, vector<64x64xbf16>, vector<64x64xf32> -> vector<64x64xf32>
    %216 = arith.addf %210, %215 : vector<64x64xf32>
    %c25_140 = arith.constant 25 : index
    %c0_141 = arith.constant 0 : index
    %217 = vector.load %arg30[%c25_140, %c0_141] : memref<96x64xf32, #tpu.memory_space<vmem>>, vector<64x64xf32>
    %cst_142 = arith.constant 0.000000e+00 : f32
    %218 = vector.shape_cast %22 : vector<64x1xi1> to vector<64x1xi1>
    %219 = vector.broadcast %218 : vector<64x1xi1> to vector<64x64xi1>
    %220 = vector.broadcast %cst_142 : f32 to vector<64x64xf32>
    %221 = arith.select %219, %217, %220 : vector<64x64xi1>, vector<64x64xf32>
    %222 = arith.truncf %221 : vector<64x64xf32> to vector<64x64xbf16>
    %c8_143 = arith.constant 8 : index
    %c0_144 = arith.constant 0 : index
    %c0_145 = arith.constant 0 : index
    %223 = vector.load %arg14[%c8_143, %c0_144, %c0_145] : memref<9x64x64xbf16, #tpu.memory_space<vmem>>, vector<1x64x64xbf16>
    %224 = vector.shape_cast %223 : vector<1x64x64xbf16> to vector<64x64xbf16>
    %cst_146 = arith.constant dense<0.000000e+00> : vector<64x64xf32>
    %225 = tpu.matmul %222, %224, %cst_146 {dimension_numbers = #tpu.dot_dimension_numbers<[1], [0], [0], [1], [0, 0, 1, 1], [], []>} : vector<64x64xbf16>, vector<64x64xbf16>, vector<64x64xf32> -> vector<64x64xf32>
    %226 = arith.addf %216, %225 : vector<64x64xf32>
    %c0_147 = arith.constant 0 : index
    %c0_148 = arith.constant 0 : index
    %227 = vector.load %arg15[%c0_147, %c0_148] : memref<1x64xf32, #tpu.memory_space<vmem>>, vector<1x64xf32>
    %228 = vector.broadcast %227 : vector<1x64xf32> to vector<64x64xf32>
    %229 = arith.mulf %226, %228 : vector<64x64xf32>
    %c0_149 = arith.constant 0 : index
    %c0_150 = arith.constant 0 : index
    %230 = vector.load %arg16[%c0_149, %c0_150] : memref<1x64xf32, #tpu.memory_space<vmem>>, vector<1x64xf32>
    %231 = vector.broadcast %230 : vector<1x64xf32> to vector<64x64xf32>
    %232 = arith.addf %229, %231 : vector<64x64xf32>
    %cst_151 = arith.constant 0.000000e+00 : f32
    %233 = vector.broadcast %cst_151 : f32 to vector<64x64xf32>
    %234 = arith.maximumf %232, %233 : vector<64x64xf32>
    %235 = arith.truncf %234 : vector<64x64xf32> to vector<64x64xbf16>
    %c0_152 = arith.constant 0 : index
    %c0_153 = arith.constant 0 : index
    %236 = vector.load %arg17[%c0_152, %c0_153] : memref<64x256xbf16, #tpu.memory_space<vmem>>, vector<64x256xbf16>
    %cst_154 = arith.constant dense<0.000000e+00> : vector<64x256xf32>
    %237 = tpu.matmul %235, %236, %cst_154 {dimension_numbers = #tpu.dot_dimension_numbers<[1], [0], [0], [1], [0, 0, 1, 1], [], []>} : vector<64x64xbf16>, vector<64x256xbf16>, vector<64x256xf32> -> vector<64x256xf32>
    %c0_155 = arith.constant 0 : index
    %c0_156 = arith.constant 0 : index
    %238 = vector.load %arg18[%c0_155, %c0_156] : memref<1x256xf32, #tpu.memory_space<vmem>>, vector<1x256xf32>
    %239 = vector.broadcast %238 : vector<1x256xf32> to vector<64x256xf32>
    %240 = arith.mulf %237, %239 : vector<64x256xf32>
    %c0_157 = arith.constant 0 : index
    %c0_158 = arith.constant 0 : index
    %241 = vector.load %arg19[%c0_157, %c0_158] : memref<1x256xf32, #tpu.memory_space<vmem>>, vector<1x256xf32>
    %242 = vector.broadcast %241 : vector<1x256xf32> to vector<64x256xf32>
    %243 = arith.addf %240, %242 : vector<64x256xf32>
    %244 = arith.addf %243, %135 : vector<64x256xf32>
    %cst_159 = arith.constant 0.000000e+00 : f32
    %245 = vector.broadcast %cst_159 : f32 to vector<64x256xf32>
    %246 = arith.maximumf %244, %245 : vector<64x256xf32>
    %247 = arith.truncf %246 : vector<64x256xf32> to vector<64x256xbf16>
    %c0_160 = arith.constant 0 : index
    %c0_161 = arith.constant 0 : index
    %248 = vector.load %arg20[%c0_160, %c0_161] : memref<256x64xbf16, #tpu.memory_space<vmem>>, vector<256x64xbf16>
    %cst_162 = arith.constant dense<0.000000e+00> : vector<64x64xf32>
    %249 = tpu.matmul %247, %248, %cst_162 {dimension_numbers = #tpu.dot_dimension_numbers<[1], [0], [0], [1], [0, 0, 1, 1], [], []>} : vector<64x256xbf16>, vector<256x64xbf16>, vector<64x64xf32> -> vector<64x64xf32>
    %c0_163 = arith.constant 0 : index
    %c0_164 = arith.constant 0 : index
    %250 = vector.load %arg21[%c0_163, %c0_164] : memref<1x64xf32, #tpu.memory_space<vmem>>, vector<1x64xf32>
    %251 = vector.broadcast %250 : vector<1x64xf32> to vector<64x64xf32>
    %252 = arith.mulf %249, %251 : vector<64x64xf32>
    %c0_165 = arith.constant 0 : index
    %c0_166 = arith.constant 0 : index
    %253 = vector.load %arg22[%c0_165, %c0_166] : memref<1x64xf32, #tpu.memory_space<vmem>>, vector<1x64xf32>
    %254 = vector.broadcast %253 : vector<1x64xf32> to vector<64x64xf32>
    %255 = arith.addf %252, %254 : vector<64x64xf32>
    %cst_167 = arith.constant 0.000000e+00 : f32
    %256 = vector.broadcast %cst_167 : f32 to vector<64x64xf32>
    %257 = arith.maximumf %255, %256 : vector<64x64xf32>
    %c16_168 = arith.constant 16 : index
    %c0_169 = arith.constant 0 : index
    %258 = vector.load %arg30[%c16_168, %c0_169] : memref<96x64xf32, #tpu.memory_space<vmem>>, vector<64x64xf32>
    tpu.vector_store %arg30[%c16_168, %c0_169], %257 {strides = array<i32>} : memref<96x64xf32, #tpu.memory_space<vmem>>, vector<64x64xf32>,
    %cst_170 = arith.constant 0.000000e+00 : f32
    %259 = vector.broadcast %cst_170 : f32 to vector<64x64xf32>
    %c7_171 = arith.constant 7 : index
    %c0_172 = arith.constant 0 : index
    %260 = vector.load %arg30[%c7_171, %c0_172] : memref<96x64xf32, #tpu.memory_space<vmem>>, vector<64x64xf32>
    %cst_173 = arith.constant 0.000000e+00 : f32
    %261 = vector.shape_cast %20 : vector<64x1xi1> to vector<64x1xi1>
    %262 = vector.broadcast %261 : vector<64x1xi1> to vector<64x64xi1>
    %263 = vector.broadcast %cst_173 : f32 to vector<64x64xf32>
    %264 = arith.select %262, %260, %263 : vector<64x64xi1>, vector<64x64xf32>
    %265 = arith.truncf %264 : vector<64x64xf32> to vector<64x64xbf16>
    %c0_174 = arith.constant 0 : index
    %c0_175 = arith.constant 0 : index
    %c0_176 = arith.constant 0 : index
    %266 = vector.load %arg23[%c0_174, %c0_175, %c0_176] : memref<9x64x64xbf16, #tpu.memory_space<vmem>>, vector<1x64x64xbf16>
    %267 = vector.shape_cast %266 : vector<1x64x64xbf16> to vector<64x64xbf16>
    %cst_177 = arith.constant dense<0.000000e+00> : vector<64x64xf32>
    %268 = tpu.matmul %265, %267, %cst_177 {dimension_numbers = #tpu.dot_dimension_numbers<[1], [0], [0], [1], [0, 0, 1, 1], [], []>} : vector<64x64xbf16>, vector<64x64xbf16>, vector<64x64xf32> -> vector<64x64xf32>
    %269 = arith.addf %259, %268 : vector<64x64xf32>
    %c8_178 = arith.constant 8 : index
    %c0_179 = arith.constant 0 : index
    %270 = vector.load %arg30[%c8_178, %c0_179] : memref<96x64xf32, #tpu.memory_space<vmem>>, vector<64x64xf32>
    %271 = arith.truncf %270 : vector<64x64xf32> to vector<64x64xbf16>
    %c1_180 = arith.constant 1 : index
    %c0_181 = arith.constant 0 : index
    %c0_182 = arith.constant 0 : index
    %272 = vector.load %arg23[%c1_180, %c0_181, %c0_182] : memref<9x64x64xbf16, #tpu.memory_space<vmem>>, vector<1x64x64xbf16>
    %273 = vector.shape_cast %272 : vector<1x64x64xbf16> to vector<64x64xbf16>
    %cst_183 = arith.constant dense<0.000000e+00> : vector<64x64xf32>
    %274 = tpu.matmul %271, %273, %cst_183 {dimension_numbers = #tpu.dot_dimension_numbers<[1], [0], [0], [1], [0, 0, 1, 1], [], []>} : vector<64x64xbf16>, vector<64x64xbf16>, vector<64x64xf32> -> vector<64x64xf32>
    %275 = arith.addf %269, %274 : vector<64x64xf32>
    %c9_184 = arith.constant 9 : index
    %c0_185 = arith.constant 0 : index
    %276 = vector.load %arg30[%c9_184, %c0_185] : memref<96x64xf32, #tpu.memory_space<vmem>>, vector<64x64xf32>
    %cst_186 = arith.constant 0.000000e+00 : f32
    %277 = vector.shape_cast %22 : vector<64x1xi1> to vector<64x1xi1>
    %278 = vector.broadcast %277 : vector<64x1xi1> to vector<64x64xi1>
    %279 = vector.broadcast %cst_186 : f32 to vector<64x64xf32>
    %280 = arith.select %278, %276, %279 : vector<64x64xi1>, vector<64x64xf32>
    %281 = arith.truncf %280 : vector<64x64xf32> to vector<64x64xbf16>
    %c2_187 = arith.constant 2 : index
    %c0_188 = arith.constant 0 : index
    %c0_189 = arith.constant 0 : index
    %282 = vector.load %arg23[%c2_187, %c0_188, %c0_189] : memref<9x64x64xbf16, #tpu.memory_space<vmem>>, vector<1x64x64xbf16>
    %283 = vector.shape_cast %282 : vector<1x64x64xbf16> to vector<64x64xbf16>
    %cst_190 = arith.constant dense<0.000000e+00> : vector<64x64xf32>
    %284 = tpu.matmul %281, %283, %cst_190 {dimension_numbers = #tpu.dot_dimension_numbers<[1], [0], [0], [1], [0, 0, 1, 1], [], []>} : vector<64x64xbf16>, vector<64x64xbf16>, vector<64x64xf32> -> vector<64x64xf32>
    %285 = arith.addf %275, %284 : vector<64x64xf32>
    %c15_191 = arith.constant 15 : index
    %c0_192 = arith.constant 0 : index
    %286 = vector.load %arg30[%c15_191, %c0_192] : memref<96x64xf32, #tpu.memory_space<vmem>>, vector<64x64xf32>
    %cst_193 = arith.constant 0.000000e+00 : f32
    %287 = vector.shape_cast %20 : vector<64x1xi1> to vector<64x1xi1>
    %288 = vector.broadcast %287 : vector<64x1xi1> to vector<64x64xi1>
    %289 = vector.broadcast %cst_193 : f32 to vector<64x64xf32>
    %290 = arith.select %288, %286, %289 : vector<64x64xi1>, vector<64x64xf32>
    %291 = arith.truncf %290 : vector<64x64xf32> to vector<64x64xbf16>
    %c3_194 = arith.constant 3 : index
    %c0_195 = arith.constant 0 : index
    %c0_196 = arith.constant 0 : index
    %292 = vector.load %arg23[%c3_194, %c0_195, %c0_196] : memref<9x64x64xbf16, #tpu.memory_space<vmem>>, vector<1x64x64xbf16>
    %293 = vector.shape_cast %292 : vector<1x64x64xbf16> to vector<64x64xbf16>
    %cst_197 = arith.constant dense<0.000000e+00> : vector<64x64xf32>
    %294 = tpu.matmul %291, %293, %cst_197 {dimension_numbers = #tpu.dot_dimension_numbers<[1], [0], [0], [1], [0, 0, 1, 1], [], []>} : vector<64x64xbf16>, vector<64x64xbf16>, vector<64x64xf32> -> vector<64x64xf32>
    %295 = arith.addf %285, %294 : vector<64x64xf32>
    %c16_198 = arith.constant 16 : index
    %c0_199 = arith.constant 0 : index
    %296 = vector.load %arg30[%c16_198, %c0_199] : memref<96x64xf32, #tpu.memory_space<vmem>>, vector<64x64xf32>
    %297 = arith.truncf %296 : vector<64x64xf32> to vector<64x64xbf16>
    %c4_200 = arith.constant 4 : index
    %c0_201 = arith.constant 0 : index
    %c0_202 = arith.constant 0 : index
    %298 = vector.load %arg23[%c4_200, %c0_201, %c0_202] : memref<9x64x64xbf16, #tpu.memory_space<vmem>>, vector<1x64x64xbf16>
    %299 = vector.shape_cast %298 : vector<1x64x64xbf16> to vector<64x64xbf16>
    %cst_203 = arith.constant dense<0.000000e+00> : vector<64x64xf32>
    %300 = tpu.matmul %297, %299, %cst_203 {dimension_numbers = #tpu.dot_dimension_numbers<[1], [0], [0], [1], [0, 0, 1, 1], [], []>} : vector<64x64xbf16>, vector<64x64xbf16>, vector<64x64xf32> -> vector<64x64xf32>
    %301 = arith.addf %295, %300 : vector<64x64xf32>
    %c17_204 = arith.constant 17 : index
    %c0_205 = arith.constant 0 : index
    %302 = vector.load %arg30[%c17_204, %c0_205] : memref<96x64xf32, #tpu.memory_space<vmem>>, vector<64x64xf32>
    %cst_206 = arith.constant 0.000000e+00 : f32
    %303 = vector.shape_cast %22 : vector<64x1xi1> to vector<64x1xi1>
    %304 = vector.broadcast %303 : vector<64x1xi1> to vector<64x64xi1>
    %305 = vector.broadcast %cst_206 : f32 to vector<64x64xf32>
    %306 = arith.select %304, %302, %305 : vector<64x64xi1>, vector<64x64xf32>
    %307 = arith.truncf %306 : vector<64x64xf32> to vector<64x64xbf16>
    %c5_207 = arith.constant 5 : index
    %c0_208 = arith.constant 0 : index
    %c0_209 = arith.constant 0 : index
    %308 = vector.load %arg23[%c5_207, %c0_208, %c0_209] : memref<9x64x64xbf16, #tpu.memory_space<vmem>>, vector<1x64x64xbf16>
    %309 = vector.shape_cast %308 : vector<1x64x64xbf16> to vector<64x64xbf16>
    %cst_210 = arith.constant dense<0.000000e+00> : vector<64x64xf32>
    %310 = tpu.matmul %307, %309, %cst_210 {dimension_numbers = #tpu.dot_dimension_numbers<[1], [0], [0], [1], [0, 0, 1, 1], [], []>} : vector<64x64xbf16>, vector<64x64xbf16>, vector<64x64xf32> -> vector<64x64xf32>
    %311 = arith.addf %301, %310 : vector<64x64xf32>
    %c23_211 = arith.constant 23 : index
    %c0_212 = arith.constant 0 : index
    %312 = vector.load %arg30[%c23_211, %c0_212] : memref<96x64xf32, #tpu.memory_space<vmem>>, vector<64x64xf32>
    %cst_213 = arith.constant 0.000000e+00 : f32
    %313 = vector.shape_cast %20 : vector<64x1xi1> to vector<64x1xi1>
    %314 = vector.broadcast %313 : vector<64x1xi1> to vector<64x64xi1>
    %315 = vector.broadcast %cst_213 : f32 to vector<64x64xf32>
    %316 = arith.select %314, %312, %315 : vector<64x64xi1>, vector<64x64xf32>
    %317 = arith.truncf %316 : vector<64x64xf32> to vector<64x64xbf16>
    %c6_214 = arith.constant 6 : index
    %c0_215 = arith.constant 0 : index
    %c0_216 = arith.constant 0 : index
    %318 = vector.load %arg23[%c6_214, %c0_215, %c0_216] : memref<9x64x64xbf16, #tpu.memory_space<vmem>>, vector<1x64x64xbf16>
    %319 = vector.shape_cast %318 : vector<1x64x64xbf16> to vector<64x64xbf16>
    %cst_217 = arith.constant dense<0.000000e+00> : vector<64x64xf32>
    %320 = tpu.matmul %317, %319, %cst_217 {dimension_numbers = #tpu.dot_dimension_numbers<[1], [0], [0], [1], [0, 0, 1, 1], [], []>} : vector<64x64xbf16>, vector<64x64xbf16>, vector<64x64xf32> -> vector<64x64xf32>
    %321 = arith.addf %311, %320 : vector<64x64xf32>
    %c24_218 = arith.constant 24 : index
    %c0_219 = arith.constant 0 : index
    %322 = vector.load %arg30[%c24_218, %c0_219] : memref<96x64xf32, #tpu.memory_space<vmem>>, vector<64x64xf32>
    %323 = arith.truncf %322 : vector<64x64xf32> to vector<64x64xbf16>
    %c7_220 = arith.constant 7 : index
    %c0_221 = arith.constant 0 : index
    %c0_222 = arith.constant 0 : index
    %324 = vector.load %arg23[%c7_220, %c0_221, %c0_222] : memref<9x64x64xbf16, #tpu.memory_space<vmem>>, vector<1x64x64xbf16>
    %325 = vector.shape_cast %324 : vector<1x64x64xbf16> to vector<64x64xbf16>
    %cst_223 = arith.constant dense<0.000000e+00> : vector<64x64xf32>
    %326 = tpu.matmul %323, %325, %cst_223 {dimension_numbers = #tpu.dot_dimension_numbers<[1], [0], [0], [1], [0, 0, 1, 1], [], []>} : vector<64x64xbf16>, vector<64x64xbf16>, vector<64x64xf32> -> vector<64x64xf32>
    %327 = arith.addf %321, %326 : vector<64x64xf32>
    %c25_224 = arith.constant 25 : index
    %c0_225 = arith.constant 0 : index
    %328 = vector.load %arg30[%c25_224, %c0_225] : memref<96x64xf32, #tpu.memory_space<vmem>>, vector<64x64xf32>
    %cst_226 = arith.constant 0.000000e+00 : f32
    %329 = vector.shape_cast %22 : vector<64x1xi1> to vector<64x1xi1>
    %330 = vector.broadcast %329 : vector<64x1xi1> to vector<64x64xi1>
    %331 = vector.broadcast %cst_226 : f32 to vector<64x64xf32>
    %332 = arith.select %330, %328, %331 : vector<64x64xi1>, vector<64x64xf32>
    %333 = arith.truncf %332 : vector<64x64xf32> to vector<64x64xbf16>
    %c8_227 = arith.constant 8 : index
    %c0_228 = arith.constant 0 : index
    %c0_229 = arith.constant 0 : index
    %334 = vector.load %arg23[%c8_227, %c0_228, %c0_229] : memref<9x64x64xbf16, #tpu.memory_space<vmem>>, vector<1x64x64xbf16>
    %335 = vector.shape_cast %334 : vector<1x64x64xbf16> to vector<64x64xbf16>
    %cst_230 = arith.constant dense<0.000000e+00> : vector<64x64xf32>
    %336 = tpu.matmul %333, %335, %cst_230 {dimension_numbers = #tpu.dot_dimension_numbers<[1], [0], [0], [1], [0, 0, 1, 1], [], []>} : vector<64x64xbf16>, vector<64x64xbf16>, vector<64x64xf32> -> vector<64x64xf32>
    %337 = arith.addf %327, %336 : vector<64x64xf32>
    %c0_231 = arith.constant 0 : index
    %c0_232 = arith.constant 0 : index
    %338 = vector.load %arg24[%c0_231, %c0_232] : memref<1x64xf32, #tpu.memory_space<vmem>>, vector<1x64xf32>
    %339 = vector.broadcast %338 : vector<1x64xf32> to vector<64x64xf32>
    %340 = arith.mulf %337, %339 : vector<64x64xf32>
    %c0_233 = arith.constant 0 : index
    %c0_234 = arith.constant 0 : index
    %341 = vector.load %arg25[%c0_233, %c0_234] : memref<1x64xf32, #tpu.memory_space<vmem>>, vector<1x64xf32>
    %342 = vector.broadcast %341 : vector<1x64xf32> to vector<64x64xf32>
    %343 = arith.addf %340, %342 : vector<64x64xf32>
    %cst_235 = arith.constant 0.000000e+00 : f32
    %344 = vector.broadcast %cst_235 : f32 to vector<64x64xf32>
    %345 = arith.maximumf %343, %344 : vector<64x64xf32>
    %346 = arith.truncf %345 : vector<64x64xf32> to vector<64x64xbf16>
    %c0_236 = arith.constant 0 : index
    %c0_237 = arith.constant 0 : index
    %347 = vector.load %arg26[%c0_236, %c0_237] : memref<64x256xbf16, #tpu.memory_space<vmem>>, vector<64x256xbf16>
    %cst_238 = arith.constant dense<0.000000e+00> : vector<64x256xf32>
    %348 = tpu.matmul %346, %347, %cst_238 {dimension_numbers = #tpu.dot_dimension_numbers<[1], [0], [0], [1], [0, 0, 1, 1], [], []>} : vector<64x64xbf16>, vector<64x256xbf16>, vector<64x256xf32> -> vector<64x256xf32>
    %c0_239 = arith.constant 0 : index
    %c0_240 = arith.constant 0 : index
    %349 = vector.load %arg27[%c0_239, %c0_240] : memref<1x256xf32, #tpu.memory_space<vmem>>, vector<1x256xf32>
    %350 = vector.broadcast %349 : vector<1x256xf32> to vector<64x256xf32>
    %351 = arith.mulf %348, %350 : vector<64x256xf32>
    %c0_241 = arith.constant 0 : index
    %c0_242 = arith.constant 0 : index
    %352 = vector.load %arg28[%c0_241, %c0_242] : memref<1x256xf32, #tpu.memory_space<vmem>>, vector<1x256xf32>
    %353 = vector.broadcast %352 : vector<1x256xf32> to vector<64x256xf32>
    %354 = arith.addf %351, %353 : vector<64x256xf32>
    %355 = arith.addf %354, %246 : vector<64x256xf32>
    %cst_243 = arith.constant 0.000000e+00 : f32
    %356 = vector.broadcast %cst_243 : f32 to vector<64x256xf32>
    %357 = arith.maximumf %355, %356 : vector<64x256xf32>
    %358 = vector.extract_strided_slice %357 {offsets = [0, 0], sizes = [8, 256], strides = [1, 1]} : vector<64x256xf32> to vector<8x256xf32>
    %359 = vector.extract_strided_slice %357 {offsets = [8, 0], sizes = [8, 256], strides = [1, 1]} : vector<64x256xf32> to vector<8x256xf32>
    %360 = arith.addf %358, %359 : vector<8x256xf32>
    %361 = vector.extract_strided_slice %357 {offsets = [16, 0], sizes = [8, 256], strides = [1, 1]} : vector<64x256xf32> to vector<8x256xf32>
    %362 = arith.addf %360, %361 : vector<8x256xf32>
    %363 = vector.extract_strided_slice %357 {offsets = [24, 0], sizes = [8, 256], strides = [1, 1]} : vector<64x256xf32> to vector<8x256xf32>
    %364 = arith.addf %362, %363 : vector<8x256xf32>
    %365 = vector.extract_strided_slice %357 {offsets = [32, 0], sizes = [8, 256], strides = [1, 1]} : vector<64x256xf32> to vector<8x256xf32>
    %366 = arith.addf %364, %365 : vector<8x256xf32>
    %367 = vector.extract_strided_slice %357 {offsets = [40, 0], sizes = [8, 256], strides = [1, 1]} : vector<64x256xf32> to vector<8x256xf32>
    %368 = arith.addf %366, %367 : vector<8x256xf32>
    %369 = vector.extract_strided_slice %357 {offsets = [48, 0], sizes = [8, 256], strides = [1, 1]} : vector<64x256xf32> to vector<8x256xf32>
    %370 = arith.addf %368, %369 : vector<8x256xf32>
    %371 = vector.extract_strided_slice %357 {offsets = [56, 0], sizes = [8, 256], strides = [1, 1]} : vector<64x256xf32> to vector<8x256xf32>
    %372 = arith.addf %370, %371 : vector<8x256xf32>
    %cst_244 = arith.constant 1.250000e-01 : f32
    %373 = vector.broadcast %cst_244 : f32 to vector<8x256xf32>
    %374 = arith.mulf %372, %373 : vector<8x256xf32>
    %c0_245 = arith.constant 0 : index
    %c0_246 = arith.constant 0 : index
    %c0_247 = arith.constant 0 : index
    %375 = vector.load %arg29[%c0_245, %c0_246, %c0_247] : memref<1x8x256xf32, #tpu.memory_space<vmem>>, vector<1x8x256xf32>
    %376 = vector.shape_cast %375 : vector<1x8x256xf32> to vector<8x256xf32>
    %377 = vector.shape_cast %374 : vector<8x256xf32> to vector<1x8x256xf32>
    tpu.vector_store %arg29[%c0_245, %c0_246, %c0_247], %377 {strides = array<i32>} : memref<1x8x256xf32, #tpu.memory_space<vmem>>, vector<1x8x256xf32>,
    return
  }
  func.func @transform_0(%arg0: i32) -> (i32, i32) {
    %c0_i32 = arith.constant 0 : i32
    %c0_i32_0 = arith.constant 0 : i32
    return %arg0, %c0_i32 : i32, i32
  }
  func.func @transform_1(%arg0: i32) -> (i32, i32) {
    %c0_i32 = arith.constant 0 : i32
    %c0_i32_0 = arith.constant 0 : i32
    %c0_i32_1 = arith.constant 0 : i32
    return %c0_i32, %c0_i32_0 : i32, i32
  }
  func.func @transform_2(%arg0: i32) -> (i32, i32) {
    %c0_i32 = arith.constant 0 : i32
    %c0_i32_0 = arith.constant 0 : i32
    %c0_i32_1 = arith.constant 0 : i32
    return %c0_i32, %c0_i32_0 : i32, i32
  }
  func.func @transform_3(%arg0: i32) -> (i32, i32) {
    %c0_i32 = arith.constant 0 : i32
    %c0_i32_0 = arith.constant 0 : i32
    %c0_i32_1 = arith.constant 0 : i32
    return %c0_i32, %c0_i32_0 : i32, i32
  }
  func.func @transform_4(%arg0: i32) -> (i32, i32, i32) {
    %c0_i32 = arith.constant 0 : i32
    %c0_i32_0 = arith.constant 0 : i32
    %c0_i32_1 = arith.constant 0 : i32
    %c0_i32_2 = arith.constant 0 : i32
    return %c0_i32, %c0_i32_0, %c0_i32_1 : i32, i32, i32
  }
  func.func @transform_5(%arg0: i32) -> (i32, i32) {
    %c0_i32 = arith.constant 0 : i32
    %c0_i32_0 = arith.constant 0 : i32
    %c0_i32_1 = arith.constant 0 : i32
    return %c0_i32, %c0_i32_0 : i32, i32
  }
  func.func @transform_6(%arg0: i32) -> (i32, i32) {
    %c0_i32 = arith.constant 0 : i32
    %c0_i32_0 = arith.constant 0 : i32
    %c0_i32_1 = arith.constant 0 : i32
    return %c0_i32, %c0_i32_0 : i32, i32
  }
  func.func @transform_7(%arg0: i32) -> (i32, i32) {
    %c0_i32 = arith.constant 0 : i32
    %c0_i32_0 = arith.constant 0 : i32
    %c0_i32_1 = arith.constant 0 : i32
    return %c0_i32, %c0_i32_0 : i32, i32
  }
  func.func @transform_8(%arg0: i32) -> (i32, i32) {
    %c0_i32 = arith.constant 0 : i32
    %c0_i32_0 = arith.constant 0 : i32
    %c0_i32_1 = arith.constant 0 : i32
    return %c0_i32, %c0_i32_0 : i32, i32
  }
  func.func @transform_9(%arg0: i32) -> (i32, i32) {
    %c0_i32 = arith.constant 0 : i32
    %c0_i32_0 = arith.constant 0 : i32
    %c0_i32_1 = arith.constant 0 : i32
    return %c0_i32, %c0_i32_0 : i32, i32
  }
  func.func @transform_10(%arg0: i32) -> (i32, i32) {
    %c0_i32 = arith.constant 0 : i32
    %c0_i32_0 = arith.constant 0 : i32
    %c0_i32_1 = arith.constant 0 : i32
    return %c0_i32, %c0_i32_0 : i32, i32
  }
  func.func @transform_11(%arg0: i32) -> (i32, i32) {
    %c0_i32 = arith.constant 0 : i32
    %c0_i32_0 = arith.constant 0 : i32
    %c0_i32_1 = arith.constant 0 : i32
    return %c0_i32, %c0_i32_0 : i32, i32
  }
  func.func @transform_12(%arg0: i32) -> (i32, i32) {
    %c0_i32 = arith.constant 0 : i32
    %c0_i32_0 = arith.constant 0 : i32
    %c0_i32_1 = arith.constant 0 : i32
    return %c0_i32, %c0_i32_0 : i32, i32
  }
  func.func @transform_13(%arg0: i32) -> (i32, i32, i32) {
    %c0_i32 = arith.constant 0 : i32
    %c0_i32_0 = arith.constant 0 : i32
    %c0_i32_1 = arith.constant 0 : i32
    %c0_i32_2 = arith.constant 0 : i32
    return %c0_i32, %c0_i32_0, %c0_i32_1 : i32, i32, i32
  }
  func.func @transform_14(%arg0: i32) -> (i32, i32) {
    %c0_i32 = arith.constant 0 : i32
    %c0_i32_0 = arith.constant 0 : i32
    %c0_i32_1 = arith.constant 0 : i32
    return %c0_i32, %c0_i32_0 : i32, i32
  }
  func.func @transform_15(%arg0: i32) -> (i32, i32) {
    %c0_i32 = arith.constant 0 : i32
    %c0_i32_0 = arith.constant 0 : i32
    %c0_i32_1 = arith.constant 0 : i32
    return %c0_i32, %c0_i32_0 : i32, i32
  }
  func.func @transform_16(%arg0: i32) -> (i32, i32) {
    %c0_i32 = arith.constant 0 : i32
    %c0_i32_0 = arith.constant 0 : i32
    %c0_i32_1 = arith.constant 0 : i32
    return %c0_i32, %c0_i32_0 : i32, i32
  }
  func.func @transform_17(%arg0: i32) -> (i32, i32) {
    %c0_i32 = arith.constant 0 : i32
    %c0_i32_0 = arith.constant 0 : i32
    %c0_i32_1 = arith.constant 0 : i32
    return %c0_i32, %c0_i32_0 : i32, i32
  }
  func.func @transform_18(%arg0: i32) -> (i32, i32) {
    %c0_i32 = arith.constant 0 : i32
    %c0_i32_0 = arith.constant 0 : i32
    %c0_i32_1 = arith.constant 0 : i32
    return %c0_i32, %c0_i32_0 : i32, i32
  }
  func.func @transform_19(%arg0: i32) -> (i32, i32) {
    %c0_i32 = arith.constant 0 : i32
    %c0_i32_0 = arith.constant 0 : i32
    %c0_i32_1 = arith.constant 0 : i32
    return %c0_i32, %c0_i32_0 : i32, i32
  }
  func.func @transform_20(%arg0: i32) -> (i32, i32) {
    %c0_i32 = arith.constant 0 : i32
    %c0_i32_0 = arith.constant 0 : i32
    %c0_i32_1 = arith.constant 0 : i32
    return %c0_i32, %c0_i32_0 : i32, i32
  }
  func.func @transform_21(%arg0: i32) -> (i32, i32) {
    %c0_i32 = arith.constant 0 : i32
    %c0_i32_0 = arith.constant 0 : i32
    %c0_i32_1 = arith.constant 0 : i32
    return %c0_i32, %c0_i32_0 : i32, i32
  }
  func.func @transform_22(%arg0: i32) -> (i32, i32, i32) {
    %c0_i32 = arith.constant 0 : i32
    %c0_i32_0 = arith.constant 0 : i32
    %c0_i32_1 = arith.constant 0 : i32
    %c0_i32_2 = arith.constant 0 : i32
    return %c0_i32, %c0_i32_0, %c0_i32_1 : i32, i32, i32
  }
  func.func @transform_23(%arg0: i32) -> (i32, i32) {
    %c0_i32 = arith.constant 0 : i32
    %c0_i32_0 = arith.constant 0 : i32
    %c0_i32_1 = arith.constant 0 : i32
    return %c0_i32, %c0_i32_0 : i32, i32
  }
  func.func @transform_24(%arg0: i32) -> (i32, i32) {
    %c0_i32 = arith.constant 0 : i32
    %c0_i32_0 = arith.constant 0 : i32
    %c0_i32_1 = arith.constant 0 : i32
    return %c0_i32, %c0_i32_0 : i32, i32
  }
  func.func @transform_25(%arg0: i32) -> (i32, i32) {
    %c0_i32 = arith.constant 0 : i32
    %c0_i32_0 = arith.constant 0 : i32
    %c0_i32_1 = arith.constant 0 : i32
    return %c0_i32, %c0_i32_0 : i32, i32
  }
  func.func @transform_26(%arg0: i32) -> (i32, i32) {
    %c0_i32 = arith.constant 0 : i32
    %c0_i32_0 = arith.constant 0 : i32
    %c0_i32_1 = arith.constant 0 : i32
    return %c0_i32, %c0_i32_0 : i32, i32
  }
  func.func @transform_27(%arg0: i32) -> (i32, i32) {
    %c0_i32 = arith.constant 0 : i32
    %c0_i32_0 = arith.constant 0 : i32
    %c0_i32_1 = arith.constant 0 : i32
    return %c0_i32, %c0_i32_0 : i32, i32
  }
  func.func @transform_28(%arg0: i32) -> (i32, i32, i32) {
    %c0_i32 = arith.constant 0 : i32
    %c0_i32_0 = arith.constant 0 : i32
    %c0_i32_1 = arith.constant 0 : i32
    return %arg0, %c0_i32, %c0_i32_0 : i32, i32, i32
  }
}

</mosaic_0001>

<bundles_post_ra>
// kernel: resnet_forward.2
= control target key start
LH: loop header
LB: loop body
LE: loop exit
PB: predicated region body
PF: predicated region fallthrough
CT: control target
= control target key end

     0   :  { %s1333_s15 = smov 0   ;;  %s1560_s0 = inlined_call_operand.vmem [shape: bf16[512,256], index: 0, kind: input, shape index: {}]   ;;  %s1561_s1 = inlined_call_operand.vmem [shape: bf16[256,128], index: 1, kind: input, shape index: {}]   ;;  %s1562_s2 = inlined_call_operand.vmem [shape: f32[1,128], index: 2, kind: input, shape index: {}]   ;;  %s1563_s3 = inlined_call_operand.vmem [shape: f32[1,128], index: 3, kind: input, shape index: {}]   ;;  %s1564_s4 = inlined_call_operand.vmem [shape: bf16[512,128], index: 4, kind: output, shape index: {}]  }
   0x1 LB: > { %s926_s16 = sadd.s32 4294967295, %s1306_s15   ;;  %p930_p0 = scmp.ge.s32.totalorder %s1306_s15, 1  ;;  %s1306_s15 = sphi %s1333_s15, %s14_s15  }
   0x2   : > { %p164_p1 = scmp.lt.s32.totalorder %s1306_s15, 3 }
   0x4   : > { %p165_p2 = pnand %p930_p0, %p164_p1 }
   0x5   : > { %s931_s29 = sshll.u32 (!%p165_p2), %s926_s16, 5 }
   0x6   : > { %168 = sbr.rel (%p165_p2) target bundleno = 307 (0x133), region = 36  ;;  %p192_p3 = scmp.lt.s32.totalorder (!%p165_p2), %s931_s29, 63 }
   0xb   : > { %v1170_v0 = vld [vmem:[%s1561_s1 + $0x38] sm:$0xff]  ;;  %v1169_v2 = vld [vmem:[%s1561_s1 + $0x30] sm:$0xff]  ;;  %v1168_v4 = vld [vmem:[%s1561_s1 + $0x28] sm:$0xff]  ;;  %s1566_s29 = smov (!%p192_p3, %s931_s29), 63 }
   0xc   : > { %v1178_v1 = vld [vmem:[%s1561_s1 + $0x78] sm:$0xff]  ;;  %524 = vmatpush.bf16.msra.mxu0 %v1170_v0  ;;  %1274 = vmatpush.bf16.msra.mxu2 %v1170_v0  ;;  %v1177_v3 = vld [vmem:[%s1561_s1 + $0x70] sm:$0xff]  ;;  %v1176_v5 = vld [vmem:[%s1561_s1 + $0x68] sm:$0xff]  ;;  %s1130_s17 = sshll.u32 %s1566_s29, 3  ;;  %s935_s8 = sshll.u32 %s1566_s29, 2 }
   0xd   : > { %613 = vmatpush.bf16.msra.mxu1 %v1178_v1  ;;  %1282 = vmatpush.bf16.msra.mxu3 %v1178_v1  ;;  %v1167_v6 = vld [vmem:[%s1561_s1 + $0x20] sm:$0xff]  ;;  %v1166_v8 = vld [vmem:[%s1561_s1 + $0x18] sm:$0xff]  ;;  %v1165_v10 = vld [vmem:[%s1561_s1 + $0x10] sm:$0xff]  ;;  %s1386_s22 = scalar_lea.vmem %s1560_s0, %s1130_s17  ;;  %s1480_s11 = scalar_lea.vmem %s1564_s4, %s935_s8 }
   0xe   : > { %v1175_v7 = vld [vmem:[%s1561_s1 + $0x60] sm:$0xff]  ;;  %v1174_v9 = vld [vmem:[%s1561_s1 + $0x58] sm:$0xff]  ;;  %v1173_v11 = vld [vmem:[%s1561_s1 + $0x50] sm:$0xff] }
   0xf   : > { %v1164_v12 = vld [vmem:[%s1561_s1 + $0x8] sm:$0xff]  ;;  %v1163_v14 = vld [vmem:[%s1561_s1] sm:$0xff]  ;;  %v946_v28 = vld [vmem:[%s1386_s22 + $0x10] sm:$0xf] }
  0x10   : > { %525 = vmatpush.bf16.msra.mxu0 %v1169_v2  ;;  %1275 = vmatpush.bf16.msra.mxu2 %v1169_v2  ;;  %v1172_v13 = vld [vmem:[%s1561_s1 + $0x48] sm:$0xff]  ;;  %v1171_v15 = vld [vmem:[%s1561_s1 + $0x40] sm:$0xff]  ;;  %v1134_v29 = vld [vmem:[%s1386_s22 + $0x14] sm:$0xf0] }
  0x11   : > { %614 = vmatpush.bf16.msra.mxu1 %v1177_v3  ;;  %1283 = vmatpush.bf16.msra.mxu3 %v1177_v3  ;;  %v938_v16 = vld [vmem:[%s1386_s22] sm:$0xf]  ;;  %v1132_v17 = vld [vmem:[%s1386_s22 + $0x4] sm:$0xf0]  ;;  %v1131_v20 = vld [vmem:[%s1386_s22 + $0x4] sm:$0xf]  ;;  %v947_v36 = vor.u32 %v1134_v29, %v946_v28 }
  0x12   : > { %v1002_v18 = vld [vmem:[%s1386_s22 + $0x80] sm:$0xf]  ;;  %v1148_v19 = vld [vmem:[%s1386_s22 + $0x84] sm:$0xf0]  ;;  %v940_v21 = vld [vmem:[%s1386_s22 + $0x8] sm:$0xf0]  ;;  %v939_v24 = vor.u32 %v1132_v17, %v938_v16 }
  0x13   : > { %v1147_v22 = vld [vmem:[%s1386_s22 + $0x84] sm:$0xf]  ;;  %v1004_v23 = vld [vmem:[%s1386_s22 + $0x88] sm:$0xf0]  ;;  %v1003_v25 = vor.u32 %v1148_v19, %v1002_v18  ;;  %v943_v26 = vor.u32 %v1131_v20, %v940_v21  ;;  %v1010_v30 = vld [vmem:[%s1386_s22 + $0x90] sm:$0xf] }
  0x14   : > { %526 = vmatpush.bf16.msra.mxu0 %v1168_v4  ;;  %1276 = vmatpush.bf16.msra.mxu2 %v1168_v4  ;;  %v1007_v27 = vor.u32 %v1147_v22, %v1004_v23  ;;  %v1150_v31 = vld [vmem:[%s1386_s22 + $0x94] sm:$0xf0]  ;;  %v1133_v32 = vld [vmem:[%s1386_s22 + $0x14] sm:$0xf]  ;;  %v948_v33 = vld [vmem:[%s1386_s22 + $0x18] sm:$0xf0] }
  0x15   : > { %615 = vmatpush.bf16.msra.mxu1 %v1176_v5  ;;  %1284 = vmatpush.bf16.msra.mxu3 %v1176_v5  ;;  %v1149_v34 = vld [vmem:[%s1386_s22 + $0x94] sm:$0xf]  ;;  %v1012_v35 = vld [vmem:[%s1386_s22 + $0x98] sm:$0xf0]  ;;  %v1011_v37 = vor.u32 %v1150_v31, %v1010_v30  ;;  %v951_v38 = vor.u32 %v1133_v32, %v948_v33  ;;  %v954_v40 = vld [vmem:[%s1386_s22 + $0x20] sm:$0xf] }
  0x16   : > { %v1015_v39 = vor.u32 %v1149_v34, %v1012_v35  ;;  %v1136_v41 = vld [vmem:[%s1386_s22 + $0x24] sm:$0xf0]  ;;  %v1018_v42 = vld [vmem:[%s1386_s22 + $0xa0] sm:$0xf]  ;;  %v1135_v44 = vld [vmem:[%s1386_s22 + $0x24] sm:$0xf] }
  0x17   : > { %v1152_v43 = vld [vmem:[%s1386_s22 + $0xa4] sm:$0xf0]  ;;  %v956_v45 = vld [vmem:[%s1386_s22 + $0x28] sm:$0xf0]  ;;  %v1151_v46 = vld [vmem:[%s1386_s22 + $0xa4] sm:$0xf]  ;;  %v955_v48 = vor.u32 %v1136_v41, %v954_v40 }
  0x18   : > { %527 = vmatpush.bf16.msra.mxu0 %v1167_v6  ;;  %1277 = vmatpush.bf16.msra.mxu2 %v1167_v6  ;;  %v1020_v47 = vld [vmem:[%s1386_s22 + $0xa8] sm:$0xf0]  ;;  %v1019_v49 = vor.u32 %v1152_v43, %v1018_v42  ;;  %v959_v50 = vor.u32 %v1135_v44, %v956_v45  ;;  %v962_v52 = vld [vmem:[%s1386_s22 + $0x30] sm:$0xf]  ;;  %v1138_v53 = vld [vmem:[%s1386_s22 + $0x34] sm:$0xf0] }
  0x19   : > { %616 = vmatpush.bf16.msra.mxu1 %v1175_v7  ;;  %1285 = vmatpush.bf16.msra.mxu3 %v1175_v7  ;;  %v1023_v51 = vor.u32 %v1151_v46, %v1020_v47  ;;  %v1026_v54 = vld [vmem:[%s1386_s22 + $0xb0] sm:$0xf]  ;;  %v1154_v55 = vld [vmem:[%s1386_s22 + $0xb4] sm:$0xf0]  ;;  %v1137_v56 = vld [vmem:[%s1386_s22 + $0x34] sm:$0xf]  ;;  %v963_v60 = vor.u32 %v1138_v53, %v962_v52 }
  0x1a   : > { %v964_v57 = vld [vmem:[%s1386_s22 + $0x38] sm:$0xf0]  ;;  %v1153_v58 = vld [vmem:[%s1386_s22 + $0xb4] sm:$0xf]  ;;  %v1027_v61 = vor.u32 %v1154_v55, %v1026_v54  ;;  %v970_v0 = vld [vmem:[%s1386_s22 + $0x40] sm:$0xf] }
  0x1b   : > { %v1028_v59 = vld [vmem:[%s1386_s22 + $0xb8] sm:$0xf0]  ;;  %v967_v62 = vor.u32 %v1137_v56, %v964_v57  ;;  %v1140_v1 = vld [vmem:[%s1386_s22 + $0x44] sm:$0xf0]  ;;  %v1034_v2 = vld [vmem:[%s1386_s22 + $0xc0] sm:$0xf] }
  0x1c   : > { %528 = vmatpush.bf16.msra.mxu0 %v1166_v8  ;;  %1278 = vmatpush.bf16.msra.mxu2 %v1166_v8  ;;  %v1031_v63 = vor.u32 %v1153_v58, %v1028_v59  ;;  %v1156_v3 = vld [vmem:[%s1386_s22 + $0xc4] sm:$0xf0]  ;;  %v1139_v4 = vld [vmem:[%s1386_s22 + $0x44] sm:$0xf]  ;;  %v972_v5 = vld [vmem:[%s1386_s22 + $0x48] sm:$0xf0]  ;;  %v971_v8 = vor.u32 %v1140_v1, %v970_v0 }
  0x1d   : > { %617 = vmatpush.bf16.msra.mxu1 %v1174_v9  ;;  %1286 = vmatpush.bf16.msra.mxu3 %v1174_v9  ;;  %v1155_v6 = vld [vmem:[%s1386_s22 + $0xc4] sm:$0xf]  ;;  %v1036_v7 = vld [vmem:[%s1386_s22 + $0xc8] sm:$0xf0]  ;;  %v1035_v9 = vor.u32 %v1156_v3, %v1034_v2  ;;  %v1141_v16 = vld [vmem:[%s1386_s22 + $0x54] sm:$0xf] }
  0x1e   : > { %v980_v17 = vld [vmem:[%s1386_s22 + $0x58] sm:$0xf0]  ;;  %v1157_v18 = vld [vmem:[%s1386_s22 + $0xd4] sm:$0xf]  ;;  %v1143_v28 = vld [vmem:[%s1386_s22 + $0x64] sm:$0xf] }
  0x1f   : > { %v1044_v19 = vld [vmem:[%s1386_s22 + $0xd8] sm:$0xf0]  ;;  %v983_v22 = vor.u32 %v1141_v16, %v980_v17  ;;  %v988_v29 = vld [vmem:[%s1386_s22 + $0x68] sm:$0xf0]  ;;  %v1159_v30 = vld [vmem:[%s1386_s22 + $0xe4] sm:$0xf] }
  0x20   : > { %529 = vmatpush.bf16.msra.mxu0 %v1165_v10  ;;  %1279 = vmatpush.bf16.msra.mxu2 %v1165_v10  ;;  %v975_v10 = vor.u32 %v1139_v4, %v972_v5  ;;  %v1047_v23 = vor.u32 %v1157_v18, %v1044_v19  ;;  %v1052_v31 = vld [vmem:[%s1386_s22 + $0xe8] sm:$0xf0]  ;;  %v991_v34 = vor.u32 %v1143_v28, %v988_v29  ;;  %v1145_v40 = vld [vmem:[%s1386_s22 + $0x74] sm:$0xf]  ;;  %v996_v41 = vld [vmem:[%s1386_s22 + $0x78] sm:$0xf0] }
  0x21   : > { %618 = vmatpush.bf16.msra.mxu1 %v1173_v11  ;;  %1287 = vmatpush.bf16.msra.mxu3 %v1173_v11  ;;  %v1039_v11 = vor.u32 %v1155_v6, %v1036_v7  ;;  %v1055_v35 = vor.u32 %v1159_v30, %v1052_v31  ;;  %v1161_v42 = vld [vmem:[%s1386_s22 + $0xf4] sm:$0xf]  ;;  %v1060_v43 = vld [vmem:[%s1386_s22 + $0xf8] sm:$0xf0]  ;;  %v999_v46 = vor.u32 %v1145_v40, %v996_v41  ;;  %v1470_v55 = vld [vmem:[%s1563_s3] ss:$0 sm:$0xff] }
  0x22   : > { %v1063_v47 = vor.u32 %v1161_v42, %v1060_v43 }
  0x24   : > { %530 = vmatpush.bf16.msra.mxu0 %v1164_v12  ;;  %1280 = vmatpush.bf16.msra.mxu2 %v1164_v12  ;;  %v978_v12 = vld [vmem:[%s1386_s22 + $0x50] sm:$0xf] }
  0x25   : > { %619 = vmatpush.bf16.msra.mxu1 %v1172_v13  ;;  %1288 = vmatpush.bf16.msra.mxu3 %v1172_v13  ;;  %v1142_v13 = vld [vmem:[%s1386_s22 + $0x54] sm:$0xf0] }
  0x26   : > { %v979_v20 = vor.u32 %v1142_v13, %v978_v12 }
  0x28   : > { %531 = vmatpush.bf16.msra.mxu0 %v1163_v14  ;;  %1281 = vmatpush.bf16.msra.mxu2 %v1163_v14  ;;  %v1042_v14 = vld [vmem:[%s1386_s22 + $0xd0] sm:$0xf] }
  0x29   : > { %620 = vmatpush.bf16.msra.mxu1 %v1171_v15  ;;  %1289 = vmatpush.bf16.msra.mxu3 %v1171_v15  ;;  %v1158_v15 = vld [vmem:[%s1386_s22 + $0xd4] sm:$0xf0] }
  0x2a   : > { %v1043_v21 = vor.u32 %v1158_v15, %v1042_v14 }
  0x2b   : > { %532 = vmatmul.bf16.vlgmr.msra.gmra.mxu0 %v939_v24  ;;  %572 = vmatmul.bf16.vlgmr.msra.gmra.mxu2 %v1003_v25  ;;  %v986_v24 = vld [vmem:[%s1386_s22 + $0x60] sm:$0xf]  ;;  %v1144_v25 = vld [vmem:[%s1386_s22 + $0x64] sm:$0xf0] }
  0x2c   : > { %621 = vmatmul.bf16.vlgmr.msra.gmra.mxu1 %v943_v26  ;;  %661 = vmatmul.bf16.vlgmr.msra.gmra.mxu3 %v1007_v27  ;;  %v1050_v26 = vld [vmem:[%s1386_s22 + $0xe0] sm:$0xf]  ;;  %v1160_v27 = vld [vmem:[%s1386_s22 + $0xe4] sm:$0xf0]  ;;  %v987_v32 = vor.u32 %v1144_v25, %v986_v24 }
  0x2d   : > { %v1051_v33 = vor.u32 %v1160_v27, %v1050_v26 }
  0x3b   : > { %537 = vmatmul.bf16.gmra.mxu0 %v947_v36  ;;  %577 = vmatmul.bf16.gmra.mxu2 %v1011_v37  ;;  %v994_v36 = vld [vmem:[%s1386_s22 + $0x70] sm:$0xf]  ;;  %v1146_v37 = vld [vmem:[%s1386_s22 + $0x74] sm:$0xf0] }
  0x3c   : > { %626 = vmatmul.bf16.gmra.mxu1 %v951_v38  ;;  %666 = vmatmul.bf16.gmra.mxu3 %v1015_v39  ;;  %v1058_v38 = vld [vmem:[%s1386_s22 + $0xf0] sm:$0xf]  ;;  %v1162_v39 = vld [vmem:[%s1386_s22 + $0xf4] sm:$0xf0]  ;;  %v995_v44 = vor.u32 %v1146_v37, %v994_v36 }
  0x3d   : > { %v1059_v45 = vor.u32 %v1162_v39, %v1058_v38 }
  0x4b   : > { %542 = vmatmul.bf16.gmra.mxu0 %v955_v48  ;;  %582 = vmatmul.bf16.gmra.mxu2 %v1019_v49 }
  0x4c   : > { %631 = vmatmul.bf16.gmra.mxu1 %v959_v50  ;;  %671 = vmatmul.bf16.gmra.mxu3 %v1023_v51  ;;  %v1464_v51 = vld [vmem:[%s1562_s2] ss:$0 sm:$0xff] }
  0x5b   : > { %547 = vmatmul.bf16.gmra.mxu0 %v963_v60  ;;  %587 = vmatmul.bf16.gmra.mxu2 %v1027_v61 }
  0x5c   : > { %636 = vmatmul.bf16.gmra.mxu1 %v967_v62  ;;  %676 = vmatmul.bf16.gmra.mxu3 %v1031_v63 }
  0x6b   : > { %552 = vmatmul.bf16.gmra.mxu0 %v971_v8  ;;  %592 = vmatmul.bf16.gmra.mxu2 %v1035_v9 }
  0x6c   : > { %641 = vmatmul.bf16.gmra.mxu1 %v975_v10  ;;  %681 = vmatmul.bf16.gmra.mxu3 %v1039_v11 }
  0x7b   : > { %557 = vmatmul.bf16.gmra.mxu0 %v979_v20  ;;  %597 = vmatmul.bf16.gmra.mxu2 %v1043_v21 }
  0x7c   : > { %646 = vmatmul.bf16.gmra.mxu1 %v983_v22  ;;  %686 = vmatmul.bf16.gmra.mxu3 %v1047_v23 }
  0x8b   : > { %562 = vmatmul.bf16.gmra.mxu0 %v987_v32  ;;  %602 = vmatmul.bf16.gmra.mxu2 %v1051_v33 }
  0x8c   : > { %651 = vmatmul.bf16.gmra.mxu1 %v991_v34  ;;  %691 = vmatmul.bf16.gmra.mxu3 %v1055_v35 }
  0x9b   : > { %567 = vmatmul.bf16.gmra.mxu0 %v995_v44  ;;  %607 = vmatmul.bf16.gmra.mxu2 %v1059_v45 }
  0x9c   : > { %656 = vmatmul.bf16.gmra.mxu1 %v999_v46  ;;  %696 = vmatmul.bf16.gmra.mxu3 %v1063_v47 }
  0xa8   : > { %v533_v48 = vpop.f32.mrf.mxu0 }
  0xa9   : > { %v622_v49 = vpop.f32.mrf.mxu1 }
  0xaa   : > { %v623_v50 = vadd.f32 %v622_v49, %v533_v48 }
  0xac   : > { %v706_v54 = vmul.f32 %v1464_v51, %v623_v50 }
  0xae   : > { %v573_v52 = vpop.f32.mrf.mxu2  ;;  %v742_v60 = vadd.f32 %v1470_v55, %v706_v54 }
  0xaf   : > { %v662_v53 = vpop.f32.mrf.mxu3 }
  0xb0   : > { %v535_v56 = vpop.f32.mrf.mxu0  ;;  %v663_v58 = vadd.f32 %v662_v53, %v573_v52  ;;  %v774_v2 = vmax.f32 %v742_v60, 0.0 }
  0xb1   : > { %v624_v57 = vpop.f32.mrf.mxu1 }
  0xb2   : > { %v625_v59 = vadd.f32 %v624_v57, %v535_v56  ;;  %v722_v62 = vmul.f32 %v1464_v51, %v663_v58 }
  0xb4   : > { %v707_v61 = vmul.f32 %v1464_v51, %v625_v59  ;;  %v758_v7 = vadd.f32 %v1470_v55, %v722_v62 }
  0xb6   : > { %v743_v63 = vadd.f32 %v1470_v55, %v707_v61  ;;  %v575_v0 = vpop.f32.mrf.mxu2  ;;  %v790_v12 = vmax.f32 %v758_v7, 0.0 }
  0xb7   : > { %v664_v1 = vpop.f32.mrf.mxu3 }
  0xb8   : > { %v775_v3 = vmax.f32 %v743_v63, 0.0  ;;  %v665_v4 = vadd.f32 %v664_v1, %v575_v0  ;;  %v538_v5 = vpop.f32.mrf.mxu0 }
  0xb9   : > { %v627_v6 = vpop.f32.mrf.mxu1 }
  0xba   : > { %v1182_v8 = vpack.c.bf16 %v775_v3, %v774_v2  ;;  %v723_v9 = vmul.f32 %v1464_v51, %v665_v4  ;;  %v628_v11 = vadd.f32 %v627_v6, %v538_v5 }
  0xbc   : > { %1183 = vst [vmem:[%s1480_s11] sm:$0xff] %v1182_v8   ;;  %v759_v10 = vadd.f32 %v1470_v55, %v723_v9  ;;  %v708_v17 = vmul.f32 %v1464_v51, %v628_v11 }
  0xbe   : > { %v791_v13 = vmax.f32 %v759_v10, 0.0  ;;  %v578_v14 = vpop.f32.mrf.mxu2  ;;  %v744_v22 = vadd.f32 %v1470_v55, %v708_v17 }
  0xbf   : > { %v667_v15 = vpop.f32.mrf.mxu3 }
  0xc0   : > { %v1222_v16 = vpack.c.bf16 %v791_v13, %v790_v12  ;;  %v540_v18 = vpop.f32.mrf.mxu0  ;;  %v668_v20 = vadd.f32 %v667_v15, %v578_v14  ;;  %v776_v28 = vmax.f32 %v744_v22, 0.0 }
  0xc1   : > { %v629_v19 = vpop.f32.mrf.mxu1 }
  0xc2   : > { %1266 = vst [vmem:[%s1480_s11 + $0x40] sm:$0xff] %v1222_v16   ;;  %v630_v21 = vadd.f32 %v629_v19, %v540_v18  ;;  %v724_v24 = vmul.f32 %v1464_v51, %v668_v20 }
  0xc4   : > { %v709_v23 = vmul.f32 %v1464_v51, %v630_v21  ;;  %v760_v33 = vadd.f32 %v1470_v55, %v724_v24 }
  0xc6   : > { %v745_v25 = vadd.f32 %v1470_v55, %v709_v23  ;;  %v580_v26 = vpop.f32.mrf.mxu2  ;;  %v792_v38 = vmax.f32 %v760_v33, 0.0 }
  0xc7   : > { %v669_v27 = vpop.f32.mrf.mxu3 }
  0xc8   : > { %v777_v29 = vmax.f32 %v745_v25, 0.0  ;;  %v670_v30 = vadd.f32 %v669_v27, %v580_v26  ;;  %v543_v31 = vpop.f32.mrf.mxu0 }
  0xc9   : > { %v632_v32 = vpop.f32.mrf.mxu1 }
  0xca   : > { %v1187_v34 = vpack.c.bf16 %v777_v29, %v776_v28  ;;  %v725_v35 = vmul.f32 %v1464_v51, %v670_v30  ;;  %v633_v37 = vadd.f32 %v632_v32, %v543_v31 }
  0xcc   : > { %1259 = vst [vmem:[%s1480_s11 + $0x8] sm:$0xff] %v1187_v34   ;;  %v761_v36 = vadd.f32 %v1470_v55, %v725_v35  ;;  %v710_v43 = vmul.f32 %v1464_v51, %v633_v37 }
  0xce   : > { %v793_v39 = vmax.f32 %v761_v36, 0.0  ;;  %v583_v40 = vpop.f32.mrf.mxu2  ;;  %v746_v48 = vadd.f32 %v1470_v55, %v710_v43 }
  0xcf   : > { %v672_v41 = vpop.f32.mrf.mxu3 }
  0xd0   : > { %v1227_v42 = vpack.c.bf16 %v793_v39, %v792_v38  ;;  %v545_v44 = vpop.f32.mrf.mxu0  ;;  %v673_v46 = vadd.f32 %v672_v41, %v583_v40  ;;  %v778_v56 = vmax.f32 %v746_v48, 0.0 }
  0xd1   : > { %v634_v45 = vpop.f32.mrf.mxu1 }
  0xd2   : > { %1267 = vst [vmem:[%s1480_s11 + $0x48] sm:$0xff] %v1227_v42   ;;  %v635_v47 = vadd.f32 %v634_v45, %v545_v44  ;;  %v726_v50 = vmul.f32 %v1464_v51, %v673_v46 }
  0xd4   : > { %v711_v49 = vmul.f32 %v1464_v51, %v635_v47  ;;  %v762_v61 = vadd.f32 %v1470_v55, %v726_v50 }
  0xd6   : > { %v747_v52 = vadd.f32 %v1470_v55, %v711_v49  ;;  %v585_v53 = vpop.f32.mrf.mxu2  ;;  %v794_v2 = vmax.f32 %v762_v61, 0.0 }
  0xd7   : > { %v674_v54 = vpop.f32.mrf.mxu3 }
  0xd8   : > { %v779_v57 = vmax.f32 %v747_v52, 0.0  ;;  %v675_v58 = vadd.f32 %v674_v54, %v585_v53  ;;  %v548_v59 = vpop.f32.mrf.mxu0 }
  0xd9   : > { %v637_v60 = vpop.f32.mrf.mxu1 }
  0xda   : > { %v1192_v62 = vpack.c.bf16 %v779_v57, %v778_v56  ;;  %v727_v63 = vmul.f32 %v1464_v51, %v675_v58  ;;  %v638_v1 = vadd.f32 %v637_v60, %v548_v59 }
  0xdc   : > { %1260 = vst [vmem:[%s1480_s11 + $0x10] sm:$0xff] %v1192_v62   ;;  %v763_v0 = vadd.f32 %v1470_v55, %v727_v63  ;;  %v712_v7 = vmul.f32 %v1464_v51, %v638_v1 }
  0xde   : > { %v795_v3 = vmax.f32 %v763_v0, 0.0  ;;  %v588_v4 = vpop.f32.mrf.mxu2  ;;  %v748_v12 = vadd.f32 %v1470_v55, %v712_v7 }
  0xdf   : > { %v677_v5 = vpop.f32.mrf.mxu3 }
  0xe0   : > { %v1232_v6 = vpack.c.bf16 %v795_v3, %v794_v2  ;;  %v550_v8 = vpop.f32.mrf.mxu0  ;;  %v678_v10 = vadd.f32 %v677_v5, %v588_v4  ;;  %v780_v18 = vmax.f32 %v748_v12, 0.0 }
  0xe1   : > { %v639_v9 = vpop.f32.mrf.mxu1 }
  0xe2   : > { %1268 = vst [vmem:[%s1480_s11 + $0x50] sm:$0xff] %v1232_v6   ;;  %v640_v11 = vadd.f32 %v639_v9, %v550_v8  ;;  %v728_v14 = vmul.f32 %v1464_v51, %v678_v10 }
  0xe4   : > { %v713_v13 = vmul.f32 %v1464_v51, %v640_v11  ;;  %v764_v23 = vadd.f32 %v1470_v55, %v728_v14 }
  0xe6   : > { %v749_v15 = vadd.f32 %v1470_v55, %v713_v13  ;;  %v590_v16 = vpop.f32.mrf.mxu2  ;;  %v796_v28 = vmax.f32 %v764_v23, 0.0 }
  0xe7   : > { %v679_v17 = vpop.f32.mrf.mxu3 }
  0xe8   : > { %v781_v19 = vmax.f32 %v749_v15, 0.0  ;;  %v680_v20 = vadd.f32 %v679_v17, %v590_v16  ;;  %v553_v21 = vpop.f32.mrf.mxu0 }
  0xe9   : > { %v642_v22 = vpop.f32.mrf.mxu1 }
  0xea   : > { %v1197_v24 = vpack.c.bf16 %v781_v19, %v780_v18  ;;  %v729_v25 = vmul.f32 %v1464_v51, %v680_v20  ;;  %v643_v27 = vadd.f32 %v642_v22, %v553_v21 }
  0xec   : > { %1261 = vst [vmem:[%s1480_s11 + $0x18] sm:$0xff] %v1197_v24   ;;  %v765_v26 = vadd.f32 %v1470_v55, %v729_v25  ;;  %v714_v33 = vmul.f32 %v1464_v51, %v643_v27 }
  0xee   : > { %v797_v29 = vmax.f32 %v765_v26, 0.0  ;;  %v593_v30 = vpop.f32.mrf.mxu2  ;;  %v750_v38 = vadd.f32 %v1470_v55, %v714_v33 }
  0xef   : > { %v682_v31 = vpop.f32.mrf.mxu3 }
  0xf0   : > { %v1237_v32 = vpack.c.bf16 %v797_v29, %v796_v28  ;;  %v555_v34 = vpop.f32.mrf.mxu0  ;;  %v683_v36 = vadd.f32 %v682_v31, %v593_v30  ;;  %v782_v44 = vmax.f32 %v750_v38, 0.0 }
  0xf1   : > { %v644_v35 = vpop.f32.mrf.mxu1 }
  0xf2   : > { %1269 = vst [vmem:[%s1480_s11 + $0x58] sm:$0xff] %v1237_v32   ;;  %v645_v37 = vadd.f32 %v644_v35, %v555_v34  ;;  %v730_v40 = vmul.f32 %v1464_v51, %v683_v36 }
  0xf4   : > { %v715_v39 = vmul.f32 %v1464_v51, %v645_v37  ;;  %v766_v49 = vadd.f32 %v1470_v55, %v730_v40 }
  0xf6   : > { %v751_v41 = vadd.f32 %v1470_v55, %v715_v39  ;;  %v595_v42 = vpop.f32.mrf.mxu2  ;;  %v798_v56 = vmax.f32 %v766_v49, 0.0 }
  0xf7   : > { %v684_v43 = vpop.f32.mrf.mxu3 }
  0xf8   : > { %v783_v45 = vmax.f32 %v751_v41, 0.0  ;;  %v685_v46 = vadd.f32 %v684_v43, %v595_v42  ;;  %v558_v47 = vpop.f32.mrf.mxu0 }
  0xf9   : > { %v647_v48 = vpop.f32.mrf.mxu1 }
  0xfa   : > { %v1202_v50 = vpack.c.bf16 %v783_v45, %v782_v44  ;;  %v731_v52 = vmul.f32 %v1464_v51, %v685_v46  ;;  %v648_v54 = vadd.f32 %v647_v48, %v558_v47 }
  0xfc   : > { %1262 = vst [vmem:[%s1480_s11 + $0x20] sm:$0xff] %v1202_v50   ;;  %v767_v53 = vadd.f32 %v1470_v55, %v731_v52  ;;  %v716_v61 = vmul.f32 %v1464_v51, %v648_v54 }
  0xfe   : > { %v799_v57 = vmax.f32 %v767_v53, 0.0  ;;  %v598_v58 = vpop.f32.mrf.mxu2  ;;  %v752_v2 = vadd.f32 %v1470_v55, %v716_v61 }
  0xff   : > { %v687_v59 = vpop.f32.mrf.mxu3 }
 0x100   : > { %v1242_v60 = vpack.c.bf16 %v799_v57, %v798_v56  ;;  %v560_v62 = vpop.f32.mrf.mxu0  ;;  %v688_v0 = vadd.f32 %v687_v59, %v598_v58  ;;  %v784_v8 = vmax.f32 %v752_v2, 0.0 }
 0x101   : > { %v649_v63 = vpop.f32.mrf.mxu1 }
 0x102   : > { %1270 = vst [vmem:[%s1480_s11 + $0x60] sm:$0xff] %v1242_v60   ;;  %v650_v1 = vadd.f32 %v649_v63, %v560_v62  ;;  %v732_v4 = vmul.f32 %v1464_v51, %v688_v0 }
 0x104   : > { %v717_v3 = vmul.f32 %v1464_v51, %v650_v1  ;;  %v768_v13 = vadd.f32 %v1470_v55, %v732_v4 }
 0x106   : > { %v753_v5 = vadd.f32 %v1470_v55, %v717_v3  ;;  %v600_v6 = vpop.f32.mrf.mxu2  ;;  %v800_v18 = vmax.f32 %v768_v13, 0.0 }
 0x107   : > { %v689_v7 = vpop.f32.mrf.mxu3 }
 0x108   : > { %v785_v9 = vmax.f32 %v753_v5, 0.0  ;;  %v690_v10 = vadd.f32 %v689_v7, %v600_v6  ;;  %v563_v11 = vpop.f32.mrf.mxu0 }
 0x109   : > { %v652_v12 = vpop.f32.mrf.mxu1 }
 0x10a   : > { %v1207_v14 = vpack.c.bf16 %v785_v9, %v784_v8  ;;  %v733_v15 = vmul.f32 %v1464_v51, %v690_v10  ;;  %v653_v17 = vadd.f32 %v652_v12, %v563_v11 }
 0x10c   : > { %1263 = vst [vmem:[%s1480_s11 + $0x28] sm:$0xff] %v1207_v14   ;;  %v769_v16 = vadd.f32 %v1470_v55, %v733_v15  ;;  %v718_v23 = vmul.f32 %v1464_v51, %v653_v17 }
 0x10e   : > { %v801_v19 = vmax.f32 %v769_v16, 0.0  ;;  %v603_v20 = vpop.f32.mrf.mxu2  ;;  %v754_v28 = vadd.f32 %v1470_v55, %v718_v23 }
 0x10f   : > { %v692_v21 = vpop.f32.mrf.mxu3 }
 0x110   : > { %v1247_v22 = vpack.c.bf16 %v801_v19, %v800_v18  ;;  %v565_v24 = vpop.f32.mrf.mxu0  ;;  %v693_v26 = vadd.f32 %v692_v21, %v603_v20  ;;  %v786_v34 = vmax.f32 %v754_v28, 0.0 }
 0x111   : > { %v654_v25 = vpop.f32.mrf.mxu1 }
 0x112   : > { %1271 = vst [vmem:[%s1480_s11 + $0x68] sm:$0xff] %v1247_v22   ;;  %v655_v27 = vadd.f32 %v654_v25, %v565_v24  ;;  %v734_v30 = vmul.f32 %v1464_v51, %v693_v26 }
 0x114   : > { %v719_v29 = vmul.f32 %v1464_v51, %v655_v27  ;;  %v770_v39 = vadd.f32 %v1470_v55, %v734_v30 }
 0x116   : > { %v755_v31 = vadd.f32 %v1470_v55, %v719_v29  ;;  %v605_v32 = vpop.f32.mrf.mxu2  ;;  %v802_v44 = vmax.f32 %v770_v39, 0.0 }
 0x117   : > { %v694_v33 = vpop.f32.mrf.mxu3 }
 0x118   : > { %v787_v35 = vmax.f32 %v755_v31, 0.0  ;;  %v695_v36 = vadd.f32 %v694_v33, %v605_v32  ;;  %v568_v37 = vpop.f32.mrf.mxu0 }
 0x119   : > { %v657_v38 = vpop.f32.mrf.mxu1 }
 0x11a   : > { %v1212_v40 = vpack.c.bf16 %v787_v35, %v786_v34  ;;  %v735_v41 = vmul.f32 %v1464_v51, %v695_v36  ;;  %v658_v43 = vadd.f32 %v657_v38, %v568_v37 }
 0x11c   : > { %1264 = vst [vmem:[%s1480_s11 + $0x30] sm:$0xff] %v1212_v40   ;;  %v771_v42 = vadd.f32 %v1470_v55, %v735_v41  ;;  %v720_v49 = vmul.f32 %v1464_v51, %v658_v43 }
 0x11e   : > { %v803_v45 = vmax.f32 %v771_v42, 0.0  ;;  %v608_v46 = vpop.f32.mrf.mxu2  ;;  %v756_v56 = vadd.f32 %v1470_v55, %v720_v49 }
 0x11f   : > { %v697_v47 = vpop.f32.mrf.mxu3 }
 0x120   : > { %v1252_v48 = vpack.c.bf16 %v803_v45, %v802_v44  ;;  %v570_v50 = vpop.f32.mrf.mxu0  ;;  %v698_v53 = vadd.f32 %v697_v47, %v608_v46  ;;  %v788_v62 = vmax.f32 %v756_v56, 0.0 }
 0x121   : > { %v659_v52 = vpop.f32.mrf.mxu1 }
 0x122   : > { %1272 = vst [vmem:[%s1480_s11 + $0x70] sm:$0xff] %v1252_v48   ;;  %v660_v54 = vadd.f32 %v659_v52, %v570_v50  ;;  %v736_v58 = vmul.f32 %v1464_v51, %v698_v53 }
 0x124   : > { %v721_v57 = vmul.f32 %v1464_v51, %v660_v54  ;;  %v772_v1 = vadd.f32 %v1470_v55, %v736_v58 }
 0x126   : > { %v757_v59 = vadd.f32 %v1470_v55, %v721_v57  ;;  %v610_v60 = vpop.f32.mrf.mxu2  ;;  %v804_v5 = vmax.f32 %v772_v1, 0.0 }
 0x127   : > { %v699_v61 = vpop.f32.mrf.mxu3 }
 0x128   : > { %v789_v63 = vmax.f32 %v757_v59, 0.0  ;;  %v700_v0 = vadd.f32 %v699_v61, %v610_v60 }
 0x12a   : > { %v1217_v2 = vpack.c.bf16 %v789_v63, %v788_v62  ;;  %v737_v3 = vmul.f32 %v1464_v51, %v700_v0 }
 0x12c   : > { %1265 = vst [vmem:[%s1480_s11 + $0x38] sm:$0xff] %v1217_v2   ;;  %v773_v4 = vadd.f32 %v1470_v55, %v737_v3 }
 0x12e   : > { %v805_v6 = vmax.f32 %v773_v4, 0.0 }
 0x130   : > { %v1257_v7 = vpack.c.bf16 %v805_v6, %v804_v5 }
 0x132   : > { %1273 = vst [vmem:[%s1480_s11 + $0x78] sm:$0xff] %v1257_v7  }
 0x133 PF: > { %s14_s15 = sadd.s32 1, %s1306_s15  }
 0x134   : > { %p11_p4 = scmp.ge.s32.totalorder %s14_s15, 4  }
 0x136   :  { %13 = sbr.rel (!%p11_p4) target bundleno = 1 (0x1), region = 66 }

// kernel: resnet_forward.3
= control target key start
LH: loop header
LB: loop body
LE: loop exit
PB: predicated region body
PF: predicated region fallthrough
CT: control target
= control target key end

     0   :  { %s9233_s0 = inlined_call_operand.vmem [shape: bf16[128,128], index: 0, kind: input, shape index: {}]   ;;  %s9234_s1 = inlined_call_operand.vmem [shape: bf16[128,320], index: 1, kind: input, shape index: {}]   ;;  %s9235_s2 = inlined_call_operand.vmem [shape: f32[1,320], index: 2, kind: input, shape index: {}]   ;;  %s9236_s3 = inlined_call_operand.vmem [shape: f32[1,320], index: 3, kind: input, shape index: {}]   ;;  %s9237_s4 = inlined_call_operand.vmem [shape: bf16[9,64,64], index: 4, kind: input, shape index: {}]   ;;  %s9238_s5 = inlined_call_operand.vmem [shape: f32[1,64], index: 5, kind: input, shape index: {}]   ;;  %s9239_s6 = inlined_call_operand.vmem [shape: f32[1,64], index: 6, kind: input, shape index: {}]   ;;  %s9240_s7 = inlined_call_operand.vmem [shape: bf16[64,256], index: 7, kind: input, shape index: {}]   ;;  %s9241_s8 = inlined_call_operand.vmem [shape: f32[1,256], index: 8, kind: input, shape index: {}]   ;;  %s9242_s9 = inlined_call_operand.vmem [shape: f32[1,256], index: 9, kind: input, shape index: {}]   ;;  %s9243_s10 = inlined_call_operand.vmem [shape: bf16[256,64], index: 10, kind: input, shape index: {}]   ;;  %s9244_s11 = inlined_call_operand.vmem [shape: f32[1,64], index: 11, kind: input, shape index: {}]   ;;  %s9245_s12 = inlined_call_operand.vmem [shape: f32[1,64], index: 12, kind: input, shape index: {}]   ;;  %s9246_s13 = inlined_call_operand.vmem [shape: bf16[9,64,64], index: 13, kind: input, shape index: {}]   ;;  %s9247_s14 = inlined_call_operand.vmem [shape: f32[1,64], index: 14, kind: input, shape index: {}]   ;;  %s9248_s15 = inlined_call_operand.vmem [shape: f32[1,64], index: 15, kind: input, shape index: {}]   ;;  %s9249_s16 = inlined_call_operand.vmem [shape: bf16[64,256], index: 16, kind: input, shape index: {}]   ;;  %s9250_s17 = inlined_call_operand.vmem [shape: f32[1,256], index: 17, kind: input, shape index: {}]   ;;  %s9251_s18 = inlined_call_operand.vmem [shape: f32[1,256], index: 18, kind: input, shape index: {}]   ;;  %s9252_s19 = inlined_call_operand.vmem [shape: bf16[256,64], index: 19, kind: input, shape index: {}]   ;;  %s9253_s20 = inlined_call_operand.vmem [shape: f32[1,64], index: 20, kind: input, shape index: {}]   ;;  %s9254_s21 = inlined_call_operand.vmem [shape: f32[1,64], index: 21, kind: input, shape index: {}]   ;;  %s9255_s22 = inlined_call_operand.vmem [shape: bf16[9,64,64], index: 22, kind: input, shape index: {}]   ;;  %s9256_s23 = inlined_call_operand.vmem [shape: f32[1,64], index: 23, kind: input, shape index: {}]   ;;  %s9257_s24 = inlined_call_operand.vmem [shape: f32[1,64], index: 24, kind: input, shape index: {}]   ;;  %s9258_s25 = inlined_call_operand.vmem [shape: bf16[64,256], index: 25, kind: input, shape index: {}]   ;;  %s9259_s26 = inlined_call_operand.vmem [shape: f32[1,256], index: 26, kind: input, shape index: {}]   ;;  %s9260_s27 = inlined_call_operand.vmem [shape: f32[1,256], index: 27, kind: input, shape index: {}]   ;;  %s9261_s28 = inlined_call_operand.hbm [shape: f32[2,8,256], index: 28, kind: output, shape index: {}]  }
   0x1   :  { %9380 = sst [smem:[#allocation26_spill]] %s9233_s0 }
   0x2   :  { %9381 = sst [smem:[#allocation27_spill]] %s9234_s1 }
   0x3   :  { %9382 = sst [smem:[#allocation28_spill]] %s9235_s2 }
   0x4   :  { %9383 = sst [smem:[#allocation29_spill]] %s9236_s3 }
   0x5   :  { %9384 = sst [smem:[#allocation30_spill]] %s9237_s4 }
   0x6   :  { %9385 = sst [smem:[#allocation31_spill]] %s9238_s5 }
   0x7   :  { %9386 = sst [smem:[#allocation32_spill]] %s9239_s6 }
   0x8   :  { %9387 = sst [smem:[#allocation33_spill]] %s9240_s7 }
   0x9   :  { %9388 = sst [smem:[#allocation34_spill]] %s9241_s8 }
   0xa   :  { %9389 = sst [smem:[#allocation35_spill]] %s9242_s9 }
   0xb   :  { %9390 = sst [smem:[#allocation36_spill]] %s9243_s10 }
   0xc   :  { %9391 = sst [smem:[#allocation37_spill]] %s9244_s11 }
   0xd   :  { %9392 = sst [smem:[#allocation38_spill]] %s9245_s12 }
   0xe   :  { %9393 = sst [smem:[#allocation39_spill]] %s9246_s13 }
   0xf   :  { %9394 = sst [smem:[#allocation40_spill]] %s9247_s14 }
  0x10   :  { %33 = vsyncpa [#allocation4], 0 }
  0x11   :  { %35 = vsyncpa [#allocation4 + $0x1], 0  ;;  %s6814_s8 = smov 0   ;;  %s6816_s5 = smov 0  }
  0x12   :  { %s6818_s9 = smov 0   ;;  %s6820_s30 = smov 0  }
  0x13 LB: > { %9395 = sst [smem:[#allocation6_spill]] %s6654_s8  ;;  %s6835_s3 = sadd.s32 4294967295, %s6666_s30   ;;  %s6666_s30 = sphi %s6820_s30, %s9653_s30   ;;  %s6662_s9 = sphi %s6818_s9, %s9655_s9   ;;  %s6658_s5 = sphi %s6816_s5, %s9657_s5   ;;  %s6654_s8 = sphi %s6814_s8, %s9656_s8  }
  0x14   : > { %9396 = sst [smem:[#allocation7_spill]] %s6662_s9  ;;  %s5255_s6 = sadd.s32 4294967294, %s6666_s30  }
  0x15   : > { %9397 = sst [smem:[#allocation8_spill]] %s6666_s30  ;;  %s6839_s10 = sadd.s32 1, %s6666_s30  }
  0x16   : > { %9398 = sst [smem:[#allocation9_spill]] %s6839_s10  ;;  %s641_s0 = sadd.s32 1, %s6662_s9 }
  0x17   : > { %s638_s11 = ssub.s32 %s6666_s30, %s6839_s10  ;;  %p651_p0 = scmp.ne.s32.totalorder %s6662_s9, %s6658_s5 }
  0x18   : > { %p639_p1 = scmp.eq.s32.totalorder %s638_s11, 0  ;;  %p652_p2 = scmp.eq.s32.totalorder %s6835_s3, 1 }
  0x19   : > { %p657_p3 = scmp.ne.s32.totalorder %s6658_s5, %s6654_s8  ;;  %p658_p4 = scmp.eq.s32.totalorder %s5255_s6, 1 }
  0x1a   : > { %s6850_s29 = scalar_select %p639_p1, %s6662_s9, %s641_s0  }
  0x1b   : > { %p6852_p5 = por %p652_p2, %p651_p0  ;;  %p6856_p6 = por %p658_p4, %p657_p3 }
  0x1c   : > { %9399 = sst [smem:[#allocation10_spill]] %s6850_s29  ;;  %p5258_p7 = scmp.ge.s32.totalorder %s6666_s30, 1 }
  0x1d   : > { %s9400_s2 = scalar_select %p6852_p5, 1, 0 }
  0x1e   : > { %s9402_s7 = scalar_select %p6856_p6, 1, 0 }
  0x1f   : > { %9401 = sst [smem:[#allocation11_spill]] %s9400_s2  ;;  %p766_p8 = scmp.lt.s32.totalorder %s6666_s30, 3 }
  0x20   : > { %9403 = sst [smem:[#allocation12_spill]] %s9402_s7 }
  0x21   : > { %p767_p9 = pnand %p5258_p7, %p766_p8 }
  0x23   : > { %770 = sbr.rel (%p767_p9) target bundleno = 1853 (0x73d), region = 132 }
  0x28   : > { %s9404_s4 = sld [smem:[#allocation27_spill]]  ;;  %s5260_s12 = sshll.u32 %s6835_s3, 3  ;;  %vm9277_vm0 = vcmask 523264  }
  0x29   : > { %p841_p10 = scmp.lt.s32.totalorder %s5260_s12, 15  ;;  %s9405_s30 = sld [smem:[#allocation26_spill]] }
  0x2a   : > { %s9406_s9 = sld [smem:[#allocation30_spill]] }
  0x2b   : > { %s9659_s12 = smov (!%p841_p10, %s5260_s12), 15  ;;  %s9408_s8 = sld [smem:[#allocation28_spill]] }
  0x2c   : > { %s5261_s29 = sshll.u32 %s9659_s12, 2  ;;  %s9410_s1 = sld [smem:[#allocation29_spill]] }
  0x2d   : > { %s9476_s11 = sld [smem:[#allocation33_spill]] }
  0x2e   : > { %v5372_v0 = vld [vmem:[%s9404_s4 + $0xb0] sm:$0xf]  ;;  %v6386_v1 = vld [vmem:[%s9404_s4 + $0xb8] sm:$0xf0]  ;;  %v5360_v2 = vld [vmem:[%s9404_s4 + $0x98] sm:$0xf] }
  0x2f   : > { %v5373_v3 = vor.u32 %v6386_v1, %v5372_v0  ;;  %v6383_v4 = vld [vmem:[%s9404_s4 + $0xa0] sm:$0xf0]  ;;  %v5348_v6 = vld [vmem:[%s9404_s4 + $0x80] sm:$0xf]  ;;  %v6380_v7 = vld [vmem:[%s9404_s4 + $0x88] sm:$0xf0]  ;;  %s6914_s2 = scalar_lea.vmem %s9405_s30, %s5261_s29 }
  0x30   : > { %v5361_v5 = vor.u32 %v6383_v4, %v5360_v2  ;;  %v5336_v8 = vld [vmem:[%s9404_s4 + $0x68] sm:$0xf]  ;;  %v5349_v9 = vor.u32 %v6380_v7, %v5348_v6  ;;  %v6377_v10 = vld [vmem:[%s9404_s4 + $0x70] sm:$0xf0]  ;;  %v5324_v12 = vld [vmem:[%s9404_s4 + $0x50] sm:$0xf]  ;;  %s9407_s10 = smov %s9406_s9 }
  0x31   : > { %1231 = vmatpush.bf16.msra.mxu2 %v5373_v3  ;;  %v5337_v11 = vor.u32 %v6377_v10, %v5336_v8  ;;  %v6374_v13 = vld [vmem:[%s9404_s4 + $0x58] sm:$0xf0]  ;;  %v5312_v15 = vld [vmem:[%s9404_s4 + $0x38] sm:$0xf]  ;;  %v6371_v16 = vld [vmem:[%s9404_s4 + $0x40] sm:$0xf0]  ;;  %s9409_s7 = smov %s9408_s8 }
  0x32   : > { %v5325_v14 = vor.u32 %v6374_v13, %v5324_v12  ;;  %v5313_v17 = vor.u32 %v6371_v16, %v5312_v15  ;;  %v5300_v18 = vld [vmem:[%s9404_s4 + $0x20] sm:$0xf]  ;;  %v6368_v19 = vld [vmem:[%s9404_s4 + $0x28] sm:$0xf0]  ;;  %v5288_v21 = vld [vmem:[%s9404_s4 + $0x8] sm:$0xf] }
  0x33   : > { %v5301_v20 = vor.u32 %v6368_v19, %v5300_v18  ;;  %v6365_v22 = vld [vmem:[%s9404_s4 + $0x10] sm:$0xf0]  ;;  %v6917_v24 = vld [vmem:[%s6914_s2] sm:$0xff]  ;;  %v6921_v25 = vld [vmem:[%s6914_s2 + $0x8] sm:$0xff]  ;;  %v6668_v12 = vmov 0.0   ;;  %s9478_s30 = sld [smem:[#allocation32_spill]] }
  0x34   : > { %v5289_v23 = vor.u32 %v6365_v22, %v5288_v21  ;;  %v5364_v26 = vld [vmem:[%s9404_s4 + $0xa8] sm:$0xf]  ;;  %v6385_v27 = vld [vmem:[%s9404_s4 + $0xb0] sm:$0xf0]  ;;  %v6384_v28 = vld [vmem:[%s9404_s4 + $0xac] sm:$0xf] }
  0x35   : > { %1232 = vmatpush.bf16.msra.mxu2 %v5361_v5  ;;  %v5365_v29 = vor.u32 %v6385_v27, %v5364_v26  ;;  %v5366_v30 = vld [vmem:[%s9404_s4 + $0xb4] sm:$0xf0]  ;;  %v5352_v31 = vld [vmem:[%s9404_s4 + $0x90] sm:$0xf]  ;;  %v6382_v32 = vld [vmem:[%s9404_s4 + $0x98] sm:$0xf0] }
  0x36   : > { %v5369_v33 = vor.u32 %v6384_v28, %v5366_v30  ;;  %v6381_v34 = vld [vmem:[%s9404_s4 + $0x94] sm:$0xf]  ;;  %v5354_v35 = vld [vmem:[%s9404_s4 + $0x9c] sm:$0xf0]  ;;  %v5353_v36 = vor.u32 %v6382_v32, %v5352_v31  ;;  %v5340_v38 = vld [vmem:[%s9404_s4 + $0x78] sm:$0xf] }
  0x37   : > { %1173 = vmatpush.bf16.msra.mxu0 %v5365_v29  ;;  %v5357_v37 = vor.u32 %v6381_v34, %v5354_v35  ;;  %v6379_v39 = vld [vmem:[%s9404_s4 + $0x80] sm:$0xf0]  ;;  %v6378_v40 = vld [vmem:[%s9404_s4 + $0x7c] sm:$0xf]  ;;  %v5342_v41 = vld [vmem:[%s9404_s4 + $0x84] sm:$0xf0] }
  0x38   : > { %1202 = vmatpush.bf16.msra.mxu1 %v5369_v33  ;;  %v5341_v42 = vor.u32 %v6379_v39, %v5340_v38  ;;  %v5345_v43 = vor.u32 %v6378_v40, %v5342_v41  ;;  %v5328_v44 = vld [vmem:[%s9404_s4 + $0x60] sm:$0xf]  ;;  %v6376_v45 = vld [vmem:[%s9404_s4 + $0x68] sm:$0xf0]  ;;  %v6375_v46 = vld [vmem:[%s9404_s4 + $0x64] sm:$0xf]  ;;  %v860_v38 = vlaneseq }
  0x39   : > { %1233 = vmatpush.bf16.msra.mxu2 %v5349_v9  ;;  %v5330_v47 = vld [vmem:[%s9404_s4 + $0x6c] sm:$0xf0]  ;;  %v5329_v48 = vor.u32 %v6376_v45, %v5328_v44  ;;  %v5316_v51 = vld [vmem:[%s9404_s4 + $0x48] sm:$0xf]  ;;  %v6373_v52 = vld [vmem:[%s9404_s4 + $0x50] sm:$0xf0] }
  0x3a   : > { %v6361_v49 = vld [vmem:[%s6914_s2 + $0x10] sm:$0xff]  ;;  %v5333_v50 = vor.u32 %v6375_v46, %v5330_v47  ;;  %v6372_v53 = vld [vmem:[%s9404_s4 + $0x4c] sm:$0xf]  ;;  %v5318_v54 = vld [vmem:[%s9404_s4 + $0x54] sm:$0xf0]  ;;  %v5317_v55 = vor.u32 %v6373_v52, %v5316_v51  ;;  %850 = vst.msk [vmem:[#allocation2 + $0x10] sm:$0xff] %vm9277_vm0, %v6668_v12 }
  0x3b   : > { %1174 = vmatpush.bf16.msra.mxu0 %v5353_v36  ;;  %v5321_v56 = vor.u32 %v6372_v53, %v5318_v54  ;;  %v5304_v57 = vld [vmem:[%s9404_s4 + $0x30] sm:$0xf]  ;;  %v6370_v58 = vld [vmem:[%s9404_s4 + $0x38] sm:$0xf0]  ;;  %v6369_v59 = vld [vmem:[%s9404_s4 + $0x34] sm:$0xf] }
  0x3c   : > { %1203 = vmatpush.bf16.msra.mxu1 %v5357_v37  ;;  %v5306_v60 = vld [vmem:[%s9404_s4 + $0x3c] sm:$0xf0]  ;;  %v5305_v61 = vor.u32 %v6370_v58, %v5304_v57  ;;  %v5292_v63 = vld [vmem:[%s9404_s4 + $0x18] sm:$0xf]  ;;  %v6367_v0 = vld [vmem:[%s9404_s4 + $0x20] sm:$0xf0] }
  0x3d   : > { %1234 = vmatpush.bf16.msra.mxu2 %v5337_v11  ;;  %v5309_v62 = vor.u32 %v6369_v59, %v5306_v60  ;;  %v6366_v1 = vld [vmem:[%s9404_s4 + $0x1c] sm:$0xf]  ;;  %v5294_v2 = vld [vmem:[%s9404_s4 + $0x24] sm:$0xf0]  ;;  %v5293_v3 = vor.u32 %v6367_v0, %v5292_v63  ;;  %v5280_v5 = vld [vmem:[%s9404_s4] sm:$0xf] }
  0x3e   : > { %v5297_v4 = vor.u32 %v6366_v1, %v5294_v2  ;;  %v6364_v6 = vld [vmem:[%s9404_s4 + $0x8] sm:$0xf0]  ;;  %v6363_v7 = vld [vmem:[%s9404_s4 + $0x4] sm:$0xf]  ;;  %v5282_v8 = vld [vmem:[%s9404_s4 + $0xc] sm:$0xf0] }
  0x3f   : > { %1175 = vmatpush.bf16.msra.mxu0 %v5341_v42  ;;  %v5281_v9 = vor.u32 %v6364_v6, %v5280_v5  ;;  %v6362_v10 = vld [vmem:[%s6914_s2 + $0x18] sm:$0xff]  ;;  %v5285_v11 = vor.u32 %v6363_v7, %v5282_v8  ;;  %848 = vst.msk [vmem:[#allocation2] sm:$0xff] %vm9277_vm0, %v6668_v12  ;;  %v6392_v15 = vld [vmem:[%s9407_s10 + $0x28] sm:$0xff]  ;;  %v6391_v19 = vld [vmem:[%s9407_s10 + $0x20] sm:$0xff]  ;;  %v7106_v42 = vshrl.u32 %v860_v38, 7  ;;  %v9415_v57 = vmov 0 }
  0x40   : > { %1204 = vmatpush.bf16.msra.mxu1 %v5345_v43  ;;  %849 = vst.msk [vmem:[#allocation2 + $0x8] sm:$0xff] %vm9277_vm0, %v6668_v12  ;;  %v6394_v13 = vld [vmem:[%s9406_s9 + $0x38] sm:$0xff]  ;;  %v6397_v21 = vld [vmem:[%s9407_s10 + $0x50] sm:$0xff]  ;;  %v6403_v26 = vld [vmem:[%s9407_s10 + $0x80] sm:$0xff]  ;;  %v9417_v63 = vmov 0  ;;  %s9477_s9 = sld [smem:[#allocation31_spill]] }
  0x41   : > { %1235 = vmatpush.bf16.msra.mxu2 %v5325_v14  ;;  %851 = vst.msk [vmem:[#allocation2 + $0x18] sm:$0xff] %vm9277_vm0, %v6668_v12  ;;  %1445 = vmatpush.bf16.msra.mxu3 %v6394_v13  ;;  %v6393_v14 = vld [vmem:[%s9407_s10 + $0x30] sm:$0xff]  ;;  %v6406_v16 = vld [vmem:[%s9407_s10 + $0x98] sm:$0xff]  ;;  %v6395_v27 = vld [vmem:[%s9407_s10 + $0x40] sm:$0xff]  ;;  %v862_v47 = vadd.s32 8, %v7106_v42  ;;  %s9482_s29 = sld [smem:[#allocation36_spill]] }
  0x42   : > { %852 = vst.msk [vmem:[#allocation2 + $0x20] sm:$0xff] %vm9277_vm0, %v6668_v12  ;;  %v6402_v18 = vld [vmem:[%s9407_s10 + $0x78] sm:$0xff]  ;;  %v6401_v22 = vld [vmem:[%s9407_s10 + $0x70] sm:$0xff]  ;;  %v6399_v28 = vld [vmem:[%s9407_s10 + $0x60] sm:$0xff]  ;;  %s9486_s6 = sld [smem:[#allocation34_spill]] }
  0x43   : > { %1176 = vmatpush.bf16.msra.mxu0 %v5329_v48  ;;  %853 = vst.msk [vmem:[#allocation2 + $0x28] sm:$0xff] %vm9277_vm0, %v6668_v12  ;;  %v6390_v29 = vld [vmem:[%s9407_s10 + $0x18] sm:$0xff]  ;;  %v1260_v30 = vld [vmem:[%s9408_s8] sm:$0x7]  ;;  %v6389_v39 = vld [vmem:[%s9407_s10 + $0x10] sm:$0xff]  ;;  %v880_v52 = vand.u32 7, %v862_v47 }
  0x44   : > { %1205 = vmatpush.bf16.msra.mxu1 %v5333_v50  ;;  %854 = vst.msk [vmem:[#allocation2 + $0x30] sm:$0xff] %vm9277_vm0, %v6668_v12  ;;  %v1292_v31 = vld [vmem:[%s9410_s1] sm:$0x7]  ;;  %v7095_v32 = vperm.slane %v1260_v30, 2  ;;  %v6388_v5 = vld [vmem:[%s9407_s10 + $0x8] sm:$0xff]  ;;  %v9425_v30 = vmov 0 }
  0x45   : > { %1236 = vmatpush.bf16.msra.mxu2 %v5313_v17  ;;  %855 = vst.msk [vmem:[#allocation2 + $0x38] sm:$0xff] %vm9277_vm0, %v6668_v12  ;;  %1446 = vmatpush.bf16.msra.mxu3 %v6393_v14  ;;  %v6398_v17 = vld [vmem:[%s9407_s10 + $0x58] sm:$0xff]  ;;  %v7097_v33 = vperm.slane %v1292_v31, 2  ;;  %vm7119_vm2 = vcmp.lt.s32.totalorder %v880_v52, 7  ;;  %vm7133_vm4 = vcmp.ge.s32.totalorder %v880_v52, 1  ;;  %v864_v14 = vadd.s32 24, %v7106_v42 }
  0x46   : > { %856 = vst.msk [vmem:[#allocation2 + $0x40] sm:$0xff] %vm9277_vm0, %v6668_v12  ;;  %v9418_v63 = vsel %vm7133_vm4, 4294967295, %v9417_v63  ;;  %v9427_v31 = vmov 0  ;;  %v865_v52 = vadd.s32 32, %v7106_v42  ;;  %s9487_s0 = sld [smem:[#allocation35_spill]] }
  0x47   : > { %1177 = vmatpush.bf16.msra.mxu0 %v5317_v55  ;;  %857 = vst.msk [vmem:[#allocation2 + $0x48] sm:$0xff] %vm9277_vm0, %v6668_v12  ;;  %v1384_v44 = vld [vmem:[#allocation2 + $0x8] sm:$0xff]  ;;  %s9488_s13 = sld [smem:[#allocation39_spill]] }
  0x48   : > { %1206 = vmatpush.bf16.msra.mxu1 %v5321_v56  ;;  %858 = vst.msk [vmem:[#allocation2 + $0x50] sm:$0xff] %vm9277_vm0, %v6668_v12  ;;  %s9543_s14 = sld [smem:[#allocation40_spill]] }
  0x49   : > { %1237 = vmatpush.bf16.msra.mxu2 %v5301_v20  ;;  %859 = vst.msk [vmem:[#allocation2 + $0x58] sm:$0xff] %vm9277_vm0, %v6668_v12  ;;  %1447 = vmatpush.bf16.msra.mxu3 %v6392_v15  ;;  %v6405_v20 = vld [vmem:[%s9407_s10 + $0x90] sm:$0xff]  ;;  %v863_v12 = vadd.s32 16, %v7106_v42 }
  0x4b   : > { %1178 = vmatpush.bf16.msra.mxu0 %v5305_v61 }
  0x4c   : > { %1207 = vmatpush.bf16.msra.mxu1 %v5309_v62 }
  0x4d   : > { %1238 = vmatpush.bf16.msra.mxu2 %v5289_v23  ;;  %1448 = vmatpush.bf16.msra.mxu3 %v6391_v19  ;;  %v6404_v23 = vld [vmem:[%s9407_s10 + $0x88] sm:$0xff]  ;;  %v6387_v19 = vld [vmem:[%s9407_s10] sm:$0xff] }
  0x4f   : > { %1179 = vmatpush.bf16.msra.mxu0 %v5293_v3 }
  0x50   : > { %1239 = vmatmul.bf16.vlgmr.msra.gmra.mxu2 %v6917_v24  ;;  %1208 = vmatpush.bf16.msra.mxu1 %v5297_v4 }
  0x51   : > { %1816 = vmatpush.bf16.msrb.mxu2 %v6406_v16  ;;  %1510 = vmatpush.bf16.msrb.mxu3 %v6390_v29 }
  0x53   : > { %1180 = vmatpush.bf16.msra.mxu0 %v5281_v9 }
  0x54   : > { %1209 = vmatpush.bf16.msra.mxu1 %v5285_v11 }
  0x55   : > { %1817 = vmatpush.bf16.msrb.mxu2 %v6405_v20  ;;  %1511 = vmatpush.bf16.msrb.mxu3 %v6389_v39  ;;  %v894_v20 = vand.u32 7, %v864_v14  ;;  %v6415_v14 = vld [vmem:[%s9407_s10 + $0xe0] sm:$0xff] }
  0x56   : > { %1181 = vmatmul.bf16.vlgmr.msra.gmra.mxu0 %v6917_v24 }
  0x57   : > { %1210 = vmatmul.bf16.vlgmr.msra.gmra.mxu1 %v6917_v24  ;;  %1620 = vmatpush.bf16.msrb.mxu0 %v6398_v17  ;;  %v6396_v24 = vld [vmem:[%s9407_s10 + $0x48] sm:$0xff]  ;;  %vm7175_vm6 = vcmp.lt.s32.totalorder %v894_v20, 7  ;;  %vm7190_vm8 = vcmp.ge.s32.totalorder %v894_v20, 1  ;;  %v9436_v20 = vmov 0 }
  0x58   : > { %1722 = vmatpush.bf16.msrb.mxu1 %v6402_v18  ;;  %v887_v18 = vand.u32 7, %v863_v12  ;;  %v9428_v31 = vsel %vm7190_vm8, 4294967295, %v9427_v31 }
  0x59   : > { %1818 = vmatpush.bf16.msrb.mxu2 %v6404_v23  ;;  %1512 = vmatpush.bf16.msrb.mxu3 %v6388_v5  ;;  %9429 = vst [vmem:[#allocation15_spill] sm:$0xff] %v9428_v31  ;;  %v6416_v5 = vld [vmem:[%s9407_s10 + $0xe8] sm:$0xff] }
  0x5a   : > { %vm7169_vm5 = vcmp.lt.s32.totalorder %v887_v18, 7  ;;  %vm7186_vm7 = vcmp.ge.s32.totalorder %v887_v18, 1 }
  0x5b   : > { %1621 = vmatpush.bf16.msrb.mxu0 %v6397_v21  ;;  %v9426_v30 = vsel %vm7186_vm7, 4294967295, %v9425_v30 }
  0x5c   : > { %1723 = vmatpush.bf16.msrb.mxu1 %v6401_v22  ;;  %v9419_v22 = vmov 0 }
  0x5d   : > { %1819 = vmatpush.bf16.msrb.mxu2 %v6403_v26  ;;  %v9420_v22 = vsel %vm7169_vm5, 4294967295, %v9419_v22  ;;  %1513 = vmatpush.bf16.msrb.mxu3 %v6387_v19 }
  0x5e   : > { %9421 = vst [vmem:[#allocation13_spill] sm:$0xff] %v9420_v22 }
  0x5f   : > { %1622 = vmatpush.bf16.msrb.mxu0 %v6396_v24  ;;  %v9422_v24 = vmov 0 }
  0x60   : > { %1244 = vmatmul.bf16.gmra.mxu2 %v6921_v25  ;;  %v9423_v24 = vsel %vm7175_vm6, 4294967295, %v9422_v24 }
  0x61   : > { %9424 = vst [vmem:[#allocation14_spill] sm:$0xff] %v9423_v24 }
  0x63   : > { %1623 = vmatpush.bf16.msrb.mxu0 %v6395_v27 }
  0x66   : > { %1186 = vmatmul.bf16.gmra.mxu0 %v6921_v25 }
  0x67   : > { %1215 = vmatmul.bf16.gmra.mxu1 %v6921_v25  ;;  %v6400_v25 = vld [vmem:[%s9407_s10 + $0x68] sm:$0xff] }
  0x68   : > { %1724 = vmatpush.bf16.msrb.mxu1 %v6400_v25 }
  0x6c   : > { %1725 = vmatpush.bf16.msrb.mxu1 %v6399_v28 }
  0x70   : > { %1249 = vmatmul.bf16.gmra.mxu2 %v6361_v49 }
  0x76   : > { %1191 = vmatmul.bf16.gmra.mxu0 %v6361_v49 }
  0x77   : > { %1220 = vmatmul.bf16.gmra.mxu1 %v6361_v49  ;;  %v873_v49 = vand.u32 7, %v7106_v42 }
  0x79   : > { %vm7115_vm1 = vcmp.lt.s32.totalorder %v873_v49, 7  ;;  %vm7123_vm3 = vcmp.ge.s32.totalorder %v873_v49, 1  ;;  %v6413_v49 = vld [vmem:[%s9407_s10 + $0xd0] sm:$0xff] }
  0x7a   : > { %v9416_v57 = vsel %vm7123_vm3, 4294967295, %v9415_v57 }
  0x80   : > { %1254 = vmatmul.bf16.gmra.mxu2 %v6362_v10 }
  0x86   : > { %1196 = vmatmul.bf16.gmra.mxu0 %v6362_v10 }
  0x87   : > { %1225 = vmatmul.bf16.gmra.mxu1 %v6362_v10 }
  0xd3   : > { %v1240_v34 = vpop.f32.mrf.mxu2 }
  0xd4   : > { %v1270_v35 = vmul.f32 %v7095_v32, %v1240_v34 }
  0xd6   : > { %v1302_v36 = vadd.f32 %v7097_v33, %v1270_v35 }
  0xd8   : > { %v1324_v37 = vmax.f32 %v1302_v36, 0.0 }
  0xda   : > { %1332 = vst.msk [vmem:[#allocation2 + $0x10] sm:$0xff] %vm9277_vm0, %v1324_v37 }
  0xdb   : > { %v1242_v40 = vpop.f32.mrf.mxu2 }
  0xdc   : > { %v1273_v41 = vmul.f32 %v7095_v32, %v1242_v40 }
  0xde   : > { %v1305_v43 = vadd.f32 %v7097_v33, %v1273_v41 }
  0xe0   : > { %v1325_v45 = vmax.f32 %v1305_v43, 0.0  ;;  %v6422_v43 = vld [vmem:[%s9407_s10 + $0x118] sm:$0xff] }
  0xe1   : > { %v1385_v46 = vld [vmem:[#allocation2 + $0x10] sm:$0xff]  ;;  %2216 = vmatpush.bf16.msra.mxu2 %v6422_v43 }
  0xe2   : > { %1333 = vst.msk [vmem:[#allocation2 + $0x18] sm:$0xff] %vm9277_vm0, %v1325_v45  ;;  %v1392_v48 = vpack.c.bf16 %v1385_v46, %v1384_v44  ;;  %v1535_v55 = vld [vmem:[#allocation2 + $0x9] sm:$0xff]  ;;  %v6414_v45 = vld [vmem:[%s9407_s10 + $0xd8] sm:$0xff] }
  0xe3   : > { %v1245_v50 = vpop.f32.mrf.mxu2  ;;  %v7127_v58 = vld [vmem:[#allocation2 + $0xf] sm:$0xff]  ;;  %v1559_v62 = vsel %vm7115_vm1, %v1535_v55, 0.0  ;;  %2020 = vmatpush.bf16.msra.mxu0 %v6414_v45  ;;  %v866_v55 = vadd.s32 40, %v7106_v42 }
  0xe4   : > { %v1276_v51 = vmul.f32 %v7095_v32, %v1245_v50  ;;  %5398 = vmatmul.msk.bf16.vlgmr.msra.gmra.mxu3 %vm9277_vm0, %v1392_v48  ;;  %v1661_v3 = vsel %vm7123_vm3, %v7127_v58, 0.0  ;;  %v6421_v48 = vld [vmem:[%s9407_s10 + $0x110] sm:$0xff] }
  0xe5   : > { %v6417_v50 = vld [vmem:[%s9407_s10 + $0xf0] sm:$0xff]  ;;  %2217 = vmatpush.bf16.msra.mxu2 %v6421_v48 }
  0xe6   : > { %v1308_v53 = vadd.f32 %v7097_v33, %v1276_v51  ;;  %v6409_v48 = vld [vmem:[%s9407_s10 + $0xb0] sm:$0xff] }
  0xe7   : > { %2021 = vmatpush.bf16.msra.mxu0 %v6413_v49 }
  0xe8   : > { %v1326_v59 = vmax.f32 %v1308_v53, 0.0 }
  0xe9   : > { %v1756_v60 = vld [vmem:[#allocation2 + $0x18] sm:$0xff] }
  0xea   : > { %v7129_v61 = vld [vmem:[#allocation2 + $0x11] sm:$0xff]  ;;  %1334 = vst.msk [vmem:[#allocation2 + $0x20] sm:$0xff] %vm9277_vm0, %v1326_v59  ;;  %v1763_v1 = vpack.c.bf16 %v1756_v60, %v1385_v46 }
  0xeb   : > { %v7137_v0 = vld [vmem:[#allocation2 + $0x17] sm:$0xff]  ;;  %v1560_v2 = vsel %vm7119_vm2, %v7129_v61, 0.0  ;;  %v1247_v6 = vpop.f32.mrf.mxu2 }
  0xec   : > { %v1662_v4 = vsel %vm7133_vm4, %v7137_v0, 0.0  ;;  %v1567_v7 = vpack.c.bf16 %v1560_v2, %v1559_v62  ;;  %v1279_v9 = vmul.f32 %v7095_v32, %v1247_v6  ;;  %5502 = vmatmul.msk.bf16.vlgmr.msrb.gmra.mxu2 %vm9277_vm0, %v1763_v1  ;;  %v6418_v46 = vld [vmem:[%s9407_s10 + $0xf8] sm:$0xff]  ;;  %v6420_v62 = vld [vmem:[%s9407_s10 + $0x108] sm:$0xff]  ;;  %v901_v2 = vand.u32 7, %v865_v52 }
  0xed   : > { %v1669_v8 = vpack.c.bf16 %v1662_v4, %v1661_v3  ;;  %2114 = vmatpush.bf16.msra.mxu1 %v6418_v46  ;;  %v6410_v3 = vld [vmem:[%s9407_s10 + $0xb8] sm:$0xff]  ;;  %v6412_v4 = vld [vmem:[%s9407_s10 + $0xc8] sm:$0xff]  ;;  %v908_v6 = vand.u32 7, %v866_v55  ;;  %2218 = vmatpush.bf16.msra.mxu2 %v6420_v62  ;;  %v868_v46 = vadd.s32 56, %v7106_v42  ;;  %v9451_v62 = vmov 0 }
  0xee   : > { %5446 = vmatmul.msk.bf16.vlgmr.msrb.gmra.mxu0 %vm9277_vm0, %v1567_v7  ;;  %v1311_v10 = vadd.f32 %v7097_v33, %v1279_v9  ;;  %vm7250_vm9 = vcmp.lt.s32.totalorder %v901_v2, 7  ;;  %1918 = vmatpush.bf16.msra.mxu3 %v6410_v3  ;;  %vm7276_vm11 = vcmp.ge.s32.totalorder %v901_v2, 1 }
  0xef   : > { %5474 = vmatmul.msk.bf16.vlgmr.msrb.gmra.mxu1 %vm9277_vm0, %v1669_v8  ;;  %v9430_v8 = vmov 0  ;;  %vm7259_vm10 = vcmp.lt.s32.totalorder %v908_v6, 7  ;;  %2022 = vmatpush.bf16.msra.mxu0 %v6412_v4  ;;  %v9437_v20 = vsel %vm7276_vm11, 4294967295, %v9436_v20  ;;  %vm7280_vm12 = vcmp.ge.s32.totalorder %v908_v6, 1 }
  0xf0   : > { %v1327_v11 = vmax.f32 %v1311_v10, 0.0  ;;  %v9431_v8 = vsel %vm7250_vm9, 4294967295, %v9430_v8  ;;  %v6419_v10 = vld [vmem:[%s9407_s10 + $0x100] sm:$0xff]  ;;  %9438 = vst [vmem:[#allocation18_spill] sm:$0xff] %v9437_v20  ;;  %v922_v49 = vand.u32 7, %v868_v46  ;;  %v7403_v46 = vpop.f32.mrf.mxu1 }
  0xf1   : > { %v1387_v13 = vld [vmem:[#allocation2 + $0x20] sm:$0xff]  ;;  %2115 = vmatpush.bf16.msra.mxu1 %v6417_v50  ;;  %9432 = vst [vmem:[#allocation16_spill] sm:$0xff] %v9431_v8  ;;  %2219 = vmatpush.bf16.msra.mxu2 %v6419_v10 }
  0xf2   : > { %1335 = vst.msk [vmem:[#allocation2 + $0x28] sm:$0xff] %vm9277_vm0, %v1327_v11  ;;  %v7160_v15 = vpack.c.bf16 %v1387_v13, %v1756_v60  ;;  %v7173_v23 = vld [vmem:[#allocation2 + $0x19] sm:$0xff]  ;;  %v9433_v11 = vmov 0  ;;  %1919 = vmatpush.bf16.msra.mxu3 %v6409_v48  ;;  %vm7317_vm14 = vcmp.lt.s32.totalorder %v922_v49, 7  ;;  %v1340_v10 = vld [vmem:[#allocation2 + $0x7] sm:$0xff] }
  0xf3   : > { %v1250_v16 = vpop.f32.mrf.mxu2  ;;  %v7179_v25 = vld [vmem:[#allocation2 + $0x1f] sm:$0xff]  ;;  %v1561_v29 = vsel %vm7169_vm5, %v7173_v23, 0.0  ;;  %v9434_v11 = vsel %vm7259_vm10, 4294967295, %v9433_v11 }
  0xf4   : > { %v1282_v17 = vmul.f32 %v7095_v32, %v1250_v16  ;;  %5399 = vmatmul.msk.bf16.gmra.mxu3 %vm9277_vm0, %v7160_v15  ;;  %v1663_v37 = vsel %vm7186_vm7, %v7179_v25, 0.0  ;;  %9435 = vst [vmem:[#allocation17_spill] sm:$0xff] %v9434_v11 }
  0xf5   : > { %2116 = vmatpush.bf16.msra.mxu1 %v6416_v5 }
  0xf6   : > { %v1314_v21 = vadd.f32 %v7097_v33, %v1282_v17 }
  0xf8   : > { %v1328_v26 = vmax.f32 %v1314_v21, 0.0  ;;  %v9439_v21 = vmov 0 }
  0xf9   : > { %v1758_v27 = vld [vmem:[#allocation2 + $0x28] sm:$0xff]  ;;  %v9440_v21 = vsel %vm7280_vm12, 4294967295, %v9439_v21  ;;  %2117 = vmatpush.bf16.msra.mxu1 %v6415_v14  ;;  %v1365_v14 = vsel %vm7133_vm4, %v7127_v58, 0.0  ;;  %v2155_v58 = vsel %vm7115_vm1, %v7173_v23, 0.0 }
  0xfa   : > { %v7181_v28 = vld [vmem:[#allocation2 + $0x21] sm:$0xff]  ;;  %1336 = vst.msk [vmem:[#allocation2 + $0x30] sm:$0xff] %vm9277_vm0, %v1328_v26  ;;  %v1764_v35 = vpack.c.bf16 %v1758_v27, %v1387_v13 }
  0xfb   : > { %v7194_v34 = vld [vmem:[#allocation2 + $0x27] sm:$0xff]  ;;  %v1562_v36 = vsel %vm7175_vm6, %v7181_v28, 0.0  ;;  %v1252_v39 = vpop.f32.mrf.mxu2  ;;  %9441 = vst [vmem:[#allocation19_spill] sm:$0xff] %v9440_v21 }
  0xfc   : > { %v1664_v38 = vsel %vm7190_vm8, %v7194_v34, 0.0  ;;  %v1568_v40 = vpack.c.bf16 %v1562_v36, %v1561_v29  ;;  %v1285_v44 = vmul.f32 %v7095_v32, %v1252_v39  ;;  %5503 = vmatmul.msk.bf16.gmra.mxu2 %vm9277_vm0, %v1764_v35  ;;  %v6411_v13 = vld [vmem:[%s9407_s10 + $0xc0] sm:$0xff]  ;;  %v1368_v48 = vsel %vm7276_vm11, %v7194_v34, 0.0 }
  0xfd   : > { %v1670_v41 = vpack.c.bf16 %v1664_v38, %v1663_v37  ;;  %2023 = vmatpush.bf16.msra.mxu0 %v6411_v13  ;;  %v1364_v13 = vsel %vm7123_vm3, %v1340_v10, 0.0 }
  0xfe   : > { %5447 = vmatmul.msk.bf16.gmra.mxu0 %vm9277_vm0, %v1568_v40  ;;  %v1317_v47 = vadd.f32 %v7097_v33, %v1285_v44  ;;  %v867_v44 = vadd.s32 48, %v7106_v42  ;;  %v9445_v42 = vmov 0 }
  0xff   : > { %5475 = vmatmul.msk.bf16.gmra.mxu1 %vm9277_vm0, %v1670_v41  ;;  %v9446_v42 = vsel %vm7317_vm14, 4294967295, %v9445_v42 }
 0x100   : > { %v1329_v51 = vmax.f32 %v1317_v47, 0.0  ;;  %9447 = vst [vmem:[#allocation21_spill] sm:$0xff] %v9446_v42 }
 0x101   : > { %v1389_v53 = vld [vmem:[#allocation2 + $0x30] sm:$0xff] }
 0x102   : > { %1337 = vst.msk [vmem:[#allocation2 + $0x38] sm:$0xff] %vm9277_vm0, %v1329_v51  ;;  %v7232_v59 = vpack.c.bf16 %v1389_v53, %v1758_v27  ;;  %v7254_v9 = vld [vmem:[#allocation2 + $0x29] sm:$0xff] }
 0x103   : > { %v1255_v60 = vpop.f32.mrf.mxu2  ;;  %v7263_v12 = vld [vmem:[#allocation2 + $0x2f] sm:$0xff]  ;;  %v1563_v19 = vsel %vm7250_vm9, %v7254_v9, 0.0 }
 0x104   : > { %v1288_v1 = vmul.f32 %v7095_v32, %v1255_v60  ;;  %5400 = vmatmul.msk.bf16.gmra.mxu3 %vm9277_vm0, %v7232_v59  ;;  %v1665_v35 = vsel %vm7276_vm11, %v7263_v12, 0.0  ;;  %v9448_v60 = vmov 0 }
 0x106   : > { %v1320_v7 = vadd.f32 %v7097_v33, %v1288_v1 }
 0x108   : > { %v1330_v16 = vmax.f32 %v1320_v7, 0.0 }
 0x109   : > { %v1760_v17 = vld [vmem:[#allocation2 + $0x38] sm:$0xff] }
 0x10a   : > { %v7271_v18 = vld [vmem:[#allocation2 + $0x31] sm:$0xff]  ;;  %1338 = vst.msk [vmem:[#allocation2 + $0x40] sm:$0xff] %vm9277_vm0, %v1330_v16  ;;  %v1765_v27 = vpack.c.bf16 %v1760_v17, %v1389_v53  ;;  %v1372_v16 = vpack.c.bf16 %v1365_v14, %v1364_v13 }
 0x10b   : > { %v7284_v26 = vld [vmem:[#allocation2 + $0x37] sm:$0xff]  ;;  %v1564_v29 = vsel %vm7259_vm10, %v7271_v18, 0.0  ;;  %v1257_v37 = vpop.f32.mrf.mxu2 }
 0x10c   : > { %v1666_v36 = vsel %vm7280_vm12, %v7284_v26, 0.0  ;;  %v1569_v38 = vpack.c.bf16 %v1564_v29, %v1563_v19  ;;  %v1291_v40 = vmul.f32 %v7095_v32, %v1257_v37  ;;  %5504 = vmatmul.msk.bf16.gmra.mxu2 %vm9277_vm0, %v1765_v27  ;;  %v915_v32 = vand.u32 7, %v867_v44  ;;  %v7400_v44 = vpop.f32.mrf.mxu0 }
 0x10d   : > { %v1671_v39 = vpack.c.bf16 %v1666_v36, %v1665_v35  ;;  %v2156_v19 = vsel %vm7119_vm2, %v7181_v28, 0.0  ;;  %v1960_v27 = vsel %vm7133_vm4, %v7179_v25, 0.0  ;;  %v1959_v35 = vsel %vm7123_vm3, %v7137_v0, 0.0 }
 0x10e   : > { %5448 = vmatmul.msk.bf16.gmra.mxu0 %vm9277_vm0, %v1569_v38  ;;  %v1323_v41 = vadd.f32 %v7097_v33, %v1291_v40  ;;  %vm7311_vm13 = vcmp.lt.s32.totalorder %v915_v32, 7  ;;  %v9442_v33 = vmov 0  ;;  %vm7330_vm15 = vcmp.ge.s32.totalorder %v915_v32, 1  ;;  %v6407_v40 = vld [vmem:[%s9407_s10 + $0xa0] sm:$0xff] }
 0x10f   : > { %5476 = vmatmul.msk.bf16.gmra.mxu1 %vm9277_vm0, %v1671_v39  ;;  %v9443_v33 = vsel %vm7311_vm13, 4294967295, %v9442_v33  ;;  %v9449_v60 = vsel %vm7330_vm15, 4294967295, %v9448_v60  ;;  %v2163_v29 = vpack.c.bf16 %v2156_v19, %v2155_v58  ;;  %v1967_v36 = vpack.c.bf16 %v1960_v27, %v1959_v35 }
 0x110   : > { %v1331_v43 = vmax.f32 %v1323_v41, 0.0  ;;  %9444 = vst [vmem:[#allocation20_spill] sm:$0xff] %v9443_v33  ;;  %v1367_v37 = vsel %vm7190_vm8, %v7179_v25, 0.0  ;;  %v1366_v38 = vsel %vm7186_vm7, %v7137_v0, 0.0  ;;  %v1962_v25 = vsel %vm7190_vm8, %v7263_v12, 0.0 }
 0x111   : > { %v1391_v45 = vld [vmem:[#allocation2 + $0x40] sm:$0xff]  ;;  %9450 = vst [vmem:[#allocation22_spill] sm:$0xff] %v9449_v60  ;;  %v1373_v39 = vpack.c.bf16 %v1367_v37, %v1366_v38  ;;  %v2157_v0 = vsel %vm7169_vm5, %v7254_v9, 0.0  ;;  %v1369_v32 = vsel %vm7280_vm12, %v7263_v12, 0.0  ;;  %v1370_v13 = vsel %vm7330_vm15, %v7284_v26, 0.0 }
 0x112   : > { %1339 = vst.msk [vmem:[#allocation2 + $0x48] sm:$0xff] %vm9277_vm0, %v1331_v43  ;;  %v7304_v47 = vpack.c.bf16 %v1391_v45, %v1760_v17  ;;  %v7315_v50 = vld [vmem:[#allocation2 + $0x39] sm:$0xff]  ;;  %v6408_v17 = vld [vmem:[%s9407_s10 + $0xa8] sm:$0xff]  ;;  %v1961_v43 = vsel %vm7186_vm7, %v7194_v34, 0.0  ;;  %s6551_s10 = sshll.u32 %s6835_s3, 4 }
 0x113   : > { %v7321_v51 = vld [vmem:[#allocation2 + $0x3f] sm:$0xff]  ;;  %v1565_v55 = vsel %vm7311_vm13, %v7315_v50, 0.0  ;;  %vm9454_vm13 = vcmask 523264   ;;  %1920 = vmatpush.bf16.msra.mxu3 %v6408_v17  ;;  %v2154_v17 = vld [vmem:[#allocation2 + $0x51] sm:$0xff] }
 0x114   : > { %5401 = vmatmul.msk.bf16.gmra.mxu3 %vm9277_vm0, %v7304_v47  ;;  %vm7334_vm0 = vcmp.ge.s32.totalorder %v922_v49, 1  ;;  %v1667_v4 = vsel %vm7330_vm15, %v7321_v51, 0.0  ;;  %vm9455_vm9 = vmmov %vm9454_vm13  ;;  %v1374_v49 = vpack.c.bf16 %v1369_v32, %v1368_v48 }
 0x115   : > { %v9452_v62 = vsel %vm7334_vm0, 4294967295, %v9451_v62  ;;  %vm9456_vm10 = vmmov %vm9455_vm9 }
 0x116   : > { %9453 = vst [vmem:[#allocation23_spill] sm:$0xff] %v9452_v62 }
 0x117   : > { %1921 = vmatpush.bf16.msra.mxu3 %v6407_v40 }
 0x119   : > { %v7323_v52 = vld [vmem:[#allocation2 + $0x48] sm:$0xff] }
 0x11a   : > { %v7325_v53 = vld [vmem:[#allocation2 + $0x41] sm:$0xff]  ;;  %v1766_v2 = vpack.c.bf16 %v7323_v52, %v1391_v45  ;;  %v1968_v45 = vpack.c.bf16 %v1962_v25, %v1961_v43  ;;  %v1958_v19 = vld [vmem:[#allocation2 + $0x4f] sm:$0xff] }
 0x11b   : > { %v7338_v1 = vld [vmem:[#allocation2 + $0x47] sm:$0xff]  ;;  %v1566_v3 = vsel %vm7317_vm14, %v7325_v53, 0.0  ;;  %vm9457_vm14 = vmmov %vm9455_vm9  ;;  %v1966_v58 = vsel %vm7334_vm0, %v1958_v19, 0.0 }
 0x11c   : > { %v1668_v5 = vsel %vm7334_vm0, %v7338_v1, 0.0  ;;  %v1570_v6 = vpack.c.bf16 %v1566_v3, %v1565_v55  ;;  %5505 = vmatmul.msk.bf16.gmra.mxu2 %vm9454_vm13, %v1766_v2  ;;  %vm9459_vm13 = vmmov %vm9455_vm9  ;;  %v7415_v55 = vpop.f32.mrf.mxu0  ;;  %v7417_v2 = vpop.f32.mrf.mxu1 }
 0x11d   : > { %v1672_v7 = vpack.c.bf16 %v1668_v5, %v1667_v4  ;;  %v1963_v4 = vsel %vm7276_vm11, %v7284_v26, 0.0  ;;  %v2060_v26 = vld [vmem:[#allocation2 + $0x50] sm:$0xff] }
 0x11e   : > { %5449 = vmatmul.msk.bf16.gmra.mxu0 %vm9455_vm9, %v1570_v6  ;;  %v2064_v38 = vpack.c.bf16 %v2060_v26, %v7323_v52 }
 0x11f   : > { %5477 = vmatmul.msk.bf16.gmra.mxu1 %vm9456_vm10, %v1672_v7  ;;  %vm9458_vm10 = vmmov %vm9455_vm9  ;;  %v1371_v7 = vsel %vm7334_vm0, %v7321_v51, 0.0 }
 0x120   : > { %v1375_v14 = vpack.c.bf16 %v1371_v7, %v1370_v13 }
 0x124   : > { %5418 = vmatmul.msk.bf16.vlgmr.msrb.gmra.mxu3 %vm9457_vm14, %v1372_v16  ;;  %vm9460_vm14 = vmmov %vm9455_vm9  ;;  %v7435_v6 = vpop.f32.mrf.mxu0  ;;  %v7440_v10 = vpop.f32.mrf.mxu1  ;;  %v2153_v16 = vld [vmem:[#allocation2 + $0x49] sm:$0xff] }
 0x12c   : > { %5614 = vmatmul.msk.bf16.vlgmr.msra.gmra.mxu2 %vm9455_vm9, %v2163_v29  ;;  %v7455_v29 = vpop.f32.mrf.mxu0 }
 0x12e   : > { %5558 = vmatmul.msk.bf16.vlgmr.msra.gmra.mxu0 %vm9458_vm10, %v1967_v36  ;;  %vm9461_vm10 = vmmov %vm9455_vm9  ;;  %v7457_v36 = vpop.f32.mrf.mxu1 }
 0x12f   : > { %5586 = vmatmul.msk.bf16.vlgmr.msra.gmra.mxu1 %vm9459_vm13, %v7160_v15  ;;  %v2158_v15 = vsel %vm7175_vm6, %v7271_v18, 0.0  ;;  %vm9462_vm13 = vmmov %vm9455_vm9 }
 0x130   : > { %v2164_v41 = vpack.c.bf16 %v2158_v15, %v2157_v0  ;;  %vm9467_vm8 = vmmov %vm9462_vm13 }
 0x134   : > { %5419 = vmatmul.msk.bf16.gmra.mxu3 %vm9460_vm14, %v1373_v39  ;;  %vm9463_vm14 = vmmov %vm9455_vm9  ;;  %v1857_v39 = vsel %vm7115_vm1, %v7129_v61, 0.0  ;;  %v7469_v15 = vpop.f32.mrf.mxu0  ;;  %v1859_v61 = vsel %vm7169_vm5, %v7181_v28, 0.0 }
 0x136   : > { %v7472_v52 = vpop.f32.mrf.mxu1 }
 0x13c   : > { %5615 = vmatmul.msk.bf16.gmra.mxu2 %vm9455_vm9, %v2164_v41  ;;  %vm9464_vm9 = vnez %v9434_v11  ;;  %v7474_v0 = vpop.f32.mrf.mxu0 }
 0x13d   : > { %v2160_v3 = vsel %vm9464_vm9, %v7325_v53, 0.0 }
 0x13e   : > { %5559 = vmatmul.msk.bf16.gmra.mxu0 %vm9461_vm10, %v1968_v45  ;;  %vm9465_vm10 = vnez %v9431_v8  ;;  %v7476_v41 = vpop.f32.mrf.mxu1 }
 0x13f   : > { %5587 = vmatmul.msk.bf16.gmra.mxu1 %vm9462_vm13, %v7232_v59  ;;  %v1964_v59 = vsel %vm7280_vm12, %v7321_v51, 0.0  ;;  %v2159_v12 = vsel %vm9465_vm10, %v7315_v50, 0.0  ;;  %vm9468_vm12 = vmmov %vm9467_vm8  ;;  %v1965_v51 = vsel %vm7330_vm15, %v7338_v1, 0.0  ;;  %v1858_v1 = vsel %vm7119_vm2, %v7173_v23, 0.0 }
 0x140   : > { %v2165_v34 = vpack.c.bf16 %v2160_v3, %v2159_v12  ;;  %v1969_v5 = vpack.c.bf16 %v1964_v59, %v1963_v4  ;;  %v1970_v37 = vpack.c.bf16 %v1966_v58, %v1965_v51  ;;  %vm9472_vm11 = vmmov %vm9468_vm12  ;;  %v1865_v40 = vpack.c.bf16 %v1858_v1, %v1857_v39  ;;  %v5646_v39 = vld [vmem:[%s9476_s11 + $0x38] sm:$0xf0] }
 0x141   : > { %vm9473_vm0 = vmmov %vm9472_vm11  ;;  %v1860_v23 = vsel %vm7175_vm6, %v7254_v9, 0.0  ;;  %v1862_v59 = vsel %vm9464_vm9, %v7315_v50, 0.0  ;;  %v1861_v28 = vsel %vm9465_vm10, %v7271_v18, 0.0 }
 0x142   : > { %v1866_v45 = vpack.c.bf16 %v1860_v23, %v1859_v61  ;;  %v1867_v9 = vpack.c.bf16 %v1862_v59, %v1861_v28 }
 0x144   : > { %5420 = vmatmul.msk.bf16.gmra.mxu3 %vm9463_vm14, %v1374_v49  ;;  %vm9466_vm14 = vmmov %vm9462_vm13  ;;  %v7487_v32 = vpop.f32.mrf.mxu0 }
 0x146   : > { %v7489_v49 = vpop.f32.mrf.mxu1 }
 0x14c   : > { %5616 = vmatmul.msk.bf16.gmra.mxu2 %vm9462_vm13, %v2165_v34  ;;  %vm9470_vm13 = vnez %v9446_v42  ;;  %v7496_v12 = vpop.f32.mrf.mxu0 }
 0x14d   : > { %v2162_v27 = vsel %vm9470_vm13, %v2154_v17, 0.0  ;;  %v1864_v17 = vsel %vm9470_vm13, %v2153_v16, 0.0 }
 0x14e   : > { %5560 = vmatmul.msk.bf16.gmra.mxu0 %vm9466_vm14, %v1969_v5  ;;  %vm9471_vm14 = vmmov %vm9468_vm12  ;;  %v7501_v34 = vpop.f32.mrf.mxu1 }
 0x14f   : > { %5588 = vmatmul.msk.bf16.gmra.mxu1 %vm9467_vm8, %v7304_v47  ;;  %vm9469_vm8 = vnez %v9443_v33 }
 0x150   : > { %v2161_v47 = vsel %vm9469_vm8, %v2153_v16, 0.0  ;;  %v1863_v50 = vsel %vm9469_vm8, %v7325_v53, 0.0  ;;  %v5644_v53 = vld [vmem:[%s9476_s11 + $0x30] sm:$0xf]  ;;  %v6430_v16 = vld [vmem:[%s9476_s11 + $0x34] sm:$0xf0] }
 0x151   : > { %v2166_v35 = vpack.c.bf16 %v2162_v27, %v2161_v47  ;;  %v1868_v18 = vpack.c.bf16 %v1864_v17, %v1863_v50  ;;  %v5645_v1 = vor.u32 %v6430_v16, %v5644_v53  ;;  %v5636_v53 = vld [vmem:[%s9476_s11 + $0x20] sm:$0xf]  ;;  %v6428_v16 = vld [vmem:[%s9476_s11 + $0x24] sm:$0xf0] }
 0x153   : > { %2349 = vmatpush.bf16.msrb.mxu3 %v5645_v1 }
 0x154   : > { %5421 = vmatmul.msk.bf16.gmra.mxu3 %vm9468_vm12, %v1375_v14 }
 0x15c   : > { %5617 = vmatmul.msk.bf16.gmra.mxu2 %vm9468_vm12, %v2166_v35  ;;  %vm9475_vm12 = vmmov %vm9473_vm0 }
 0x15e   : > { %5561 = vmatmul.msk.bf16.gmra.mxu0 %vm9471_vm14, %v1970_v37  ;;  %v6429_v37 = vld [vmem:[%s9476_s11 + $0x34] sm:$0xf]  ;;  %vm9479_vm14 = vmmov %vm9473_vm0 }
 0x15f   : > { %5589 = vmatmul.msk.bf16.gmra.mxu1 %vm9472_vm11, %v2064_v38  ;;  %vm9474_vm11 = vmmov %vm9473_vm0 }
 0x164   : > { %5530 = vmatmul.msk.bf16.vlgmr.msra.gmra.mxu3 %vm9473_vm0, %v1865_v40  ;;  %v5649_v40 = vor.u32 %v6429_v37, %v5646_v39  ;;  %v5637_v37 = vor.u32 %v6428_v16, %v5636_v53 }
 0x166   : > { %2378 = vmatpush.bf16.msrb.mxu0 %v5649_v40  ;;  %2350 = vmatpush.bf16.msrb.mxu3 %v5637_v37  ;;  %v6426_v37 = vld [vmem:[%s9476_s11 + $0x14] sm:$0xf0] }
 0x167   : > { %v1450_v25 = vpop.f32.mrf.mxu3 }
 0x16b   : > { %v1625_v5 = vpop.f32.mrf.mxu0 }
 0x16c   : > { %v1727_v7 = vpop.f32.mrf.mxu1 }
 0x16f   : > { %v7478_v43 = vpop.f32.mrf.mxu3  ;;  %v1821_v13 = vpop.f32.mrf.mxu2 }
 0x173   : > { %v7514_v19 = vpop.f32.mrf.mxu0 }
 0x174   : > { %5531 = vmatmul.msk.bf16.gmra.mxu3 %vm9474_vm11, %v1866_v45  ;;  %v7516_v47 = vpop.f32.mrf.mxu1  ;;  %vm9480_vm11 = vmmov %vm9473_vm0 }
 0x177   : > { %v1455_v48 = vpop.f32.mrf.mxu3  ;;  %v7520_v51 = vpop.f32.mrf.mxu2 }
 0x17b   : > { %v1630_v58 = vpop.f32.mrf.mxu0 }
 0x17c   : > { %v1732_v35 = vpop.f32.mrf.mxu1 }
 0x17f   : > { %v7491_v3 = vpop.f32.mrf.mxu3  ;;  %v1826_v38 = vpop.f32.mrf.mxu2 }
 0x183   : > { %v7536_v45 = vpop.f32.mrf.mxu0 }
 0x184   : > { %5532 = vmatmul.msk.bf16.gmra.mxu3 %vm9473_vm0, %v1867_v9  ;;  %v7538_v28 = vpop.f32.mrf.mxu1 }
 0x187   : > { %v7504_v4 = vpop.f32.mrf.mxu3  ;;  %v7540_v50 = vpop.f32.mrf.mxu2 }
 0x18c   : > { %v1737_v1 = vpop.f32.mrf.mxu1 }
 0x18f   : > { %v7506_v14 = vpop.f32.mrf.mxu3  ;;  %v1831_v39 = vpop.f32.mrf.mxu2 }
 0x194   : > { %5533 = vmatmul.msk.bf16.gmra.mxu3 %vm9475_vm12, %v1868_v18  ;;  %v7560_v33 = vpop.f32.mrf.mxu1  ;;  %vm9481_vm12 = vmmov %vm9473_vm0 }
 0x197   : > { %v7518_v27 = vpop.f32.mrf.mxu3  ;;  %v7562_v16 = vpop.f32.mrf.mxu2 }
 0x19f   : > { %v7522_v26 = vpop.f32.mrf.mxu3 }
 0x1a7   : > { %v1515_v23 = vpop.f32.mrf.mxu3 }
 0x1a8   : > { %v1516_v61 = vadd.f32 %v1515_v23, %v1450_v25  ;;  %v6427_v25 = vld [vmem:[%s9476_s11 + $0x24] sm:$0xf] }
 0x1aa   : > { %v1645_v59 = vadd.f32 %v1625_v5, %v1516_v61  ;;  %v1635_v5 = vpop.f32.mrf.mxu0 }
 0x1ac   : > { %v1747_v9 = vadd.f32 %v1727_v7, %v1645_v59  ;;  %v5638_v7 = vld [vmem:[%s9476_s11 + $0x28] sm:$0xf0] }
 0x1ae   : > { %v7542_v17 = vadd.f32 %v1821_v13, %v1747_v9  ;;  %v5641_v13 = vor.u32 %v6427_v25, %v5638_v7  ;;  %v5628_v25 = vld [vmem:[%s9476_s11 + $0x10] sm:$0xf] }
 0x1af   : > { %v1517_v18 = vpop.f32.mrf.mxu3 }
 0x1b0   : > { %2379 = vmatpush.bf16.msrb.mxu0 %v5641_v13 }
 0x1b2   : > { %v7556_v9 = vpop.f32.mrf.mxu0 }
 0x1b7   : > { %v1520_v40 = vpop.f32.mrf.mxu3 }
 0x1b8   : > { %v1521_v23 = vadd.f32 %v1520_v40, %v1455_v48  ;;  %v6425_v48 = vld [vmem:[%s9476_s11 + $0x14] sm:$0xf] }
 0x1ba   : > { %v1647_v61 = vadd.f32 %v1630_v58, %v1521_v23  ;;  %v5629_v58 = vor.u32 %v6426_v37, %v5628_v25  ;;  %v1640_v7 = vpop.f32.mrf.mxu0  ;;  %v1742_v23 = vpop.f32.mrf.mxu1 }
 0x1bc   : > { %v1749_v59 = vadd.f32 %v1732_v35, %v1647_v61  ;;  %v5630_v35 = vld [vmem:[%s9476_s11 + $0x18] sm:$0xf0]  ;;  %2351 = vmatpush.bf16.msrb.mxu3 %v5629_v58 }
 0x1be   : > { %v7558_v42 = vadd.f32 %v1826_v38, %v1749_v59  ;;  %v5633_v38 = vor.u32 %v6425_v48, %v5630_v35  ;;  %v1836_v59 = vpop.f32.mrf.mxu2 }
 0x1bf   : > { %v1522_v53 = vpop.f32.mrf.mxu3 }
 0x1c0   : > { %2380 = vmatpush.bf16.msrb.mxu0 %v5633_v38 }
 0x1c2   : > { %v7581_v25 = vpop.f32.mrf.mxu0  ;;  %v7583_v37 = vpop.f32.mrf.mxu1 }
 0x1c6   : > { %v7585_v8 = vpop.f32.mrf.mxu2 }
 0x1c7   : > { %v1525_v13 = vpop.f32.mrf.mxu3 }
 0x1c8   : > { %v1526_v40 = vadd.f32 %v1525_v13, %v7504_v4 }
 0x1ca   : > { %v1649_v61 = vadd.f32 %v1635_v5, %v1526_v40  ;;  %v2025_v38 = vpop.f32.mrf.mxu0  ;;  %v2119_v13 = vpop.f32.mrf.mxu1  ;;  %v6424_v5 = vld [vmem:[%s9476_s11 + $0x4] sm:$0xf0] }
 0x1cc   : > { %v1751_v62 = vadd.f32 %v1737_v1, %v1649_v61  ;;  %v6423_v1 = vld [vmem:[%s9476_s11 + $0x4] sm:$0xf] }
 0x1ce   : > { %v7577_v60 = vadd.f32 %v1831_v39, %v1751_v62  ;;  %v5620_v62 = vld [vmem:[%s9476_s11] sm:$0xf]  ;;  %v2221_v40 = vpop.f32.mrf.mxu2 }
 0x1cf   : > { %v7579_v11 = vpop.f32.mrf.mxu3  ;;  %v5621_v39 = vor.u32 %v6424_v5, %v5620_v62 }
 0x1d1   : > { %2352 = vmatpush.bf16.msrb.mxu3 %v5621_v39 }
 0x1d2   : > { %v2121_v21 = vpop.f32.mrf.mxu1 }
 0x1d6   : > { %v2223_v5 = vpop.f32.mrf.mxu2 }
 0x1d7   : > { %v1530_v48 = vpop.f32.mrf.mxu3 }
 0x1d8   : > { %v1531_v58 = vadd.f32 %v1530_v48, %v7518_v27  ;;  %v5622_v27 = vld [vmem:[%s9476_s11 + $0x8] sm:$0xf0]  ;;  %v1518_v48 = vadd.f32 %v1517_v18, %v7478_v43  ;;  %v7612_v43 = vld [vmem:[%s9477_s9] ss:$0 sm:$0xff]  ;;  %s9491_s9 = sld [smem:[#allocation37_spill]] }
 0x1d9   : > { %v5625_v61 = vor.u32 %v6423_v1, %v5622_v27  ;;  %v1523_v27 = vadd.f32 %v1522_v53, %v7491_v3  ;;  %s9492_s11 = sld [smem:[#allocation38_spill]] }
 0x1da   : > { %v1651_v35 = vadd.f32 %v1640_v7, %v1531_v58  ;;  %v2027_v58 = vpop.f32.mrf.mxu0  ;;  %v2124_v18 = vpop.f32.mrf.mxu1 }
 0x1db   : > { %2381 = vmatpush.bf16.msrb.mxu0 %v5625_v61 }
 0x1dc   : > { %v1753_v4 = vadd.f32 %v1742_v23, %v1651_v35  ;;  %v1646_v35 = vadd.f32 %v7514_v19, %v1518_v48 }
 0x1de   : > { %v7600_v7 = vadd.f32 %v1836_v59, %v1753_v4  ;;  %v1748_v59 = vadd.f32 %v7516_v47, %v1646_v35 }
 0x1df   : > { %v7602_v23 = vpop.f32.mrf.mxu3 }
 0x1e0   : > { %v1842_v22 = vadd.f32 %v7520_v51, %v1748_v59  ;;  %v1648_v51 = vadd.f32 %v7536_v45, %v1523_v27 }
 0x1e2   : > { %v2030_v31 = vpop.f32.mrf.mxu0  ;;  %v1750_v35 = vadd.f32 %v7538_v28, %v1648_v51 }
 0x1e7   : > { %v1923_v20 = vpop.f32.mrf.mxu3 }
 0x1e8   : > { %v1943_v62 = vadd.f32 %v1923_v20, %v7542_v17  ;;  %v2226_v17 = vpop.f32.mrf.mxu2 }
 0x1ea   : > { %v2045_v24 = vadd.f32 %v2025_v38, %v1943_v62  ;;  %v2032_v53 = vpop.f32.mrf.mxu0  ;;  %v2126_v62 = vpop.f32.mrf.mxu1 }
 0x1ec   : > { %v2139_v4 = vadd.f32 %v2119_v13, %v2045_v24  ;;  %v7619_v24 = vld [vmem:[%s9478_s30] ss:$0 sm:$0xff]  ;;  %s5191_s30 = scalar_lea.hbm %s9261_s28, %s6551_s10 }
 0x1ed   : > { %s5195_s2 = sshll.u32 %s5191_s30, 4  ;;  %s5196_s2 = int_to_ptr.hbm [resolvable:$true] %s5195_s2 }
 0x1ee   : > { %v2241_v39 = vadd.f32 %v2221_v40, %v2139_v4 }
 0x1ef   : > { %v1925_v1 = vpop.f32.mrf.mxu3 }
 0x1f0   : > { %v1944_v19 = vadd.f32 %v1925_v1, %v1842_v22  ;;  %v2253_v38 = vmul.f32 %v7612_v43, %v2241_v39  ;;  %v2228_v1 = vpop.f32.mrf.mxu2 }
 0x1f2   : > { %v2046_v20 = vadd.f32 %v2027_v58, %v1944_v19  ;;  %v2265_v61 = vadd.f32 %v7619_v24, %v2253_v38  ;;  %v2035_v28 = vpop.f32.mrf.mxu0 }
 0x1f4   : > { %v2140_v47 = vadd.f32 %v2121_v21, %v2046_v20  ;;  %v2273_v59 = vmax.f32 %v2265_v61, 0.0 }
 0x1f6   : > { %v2242_v13 = vadd.f32 %v2223_v5, %v2140_v47  ;;  %v1844_v5 = vadd.f32 %v7540_v50, %v1750_v35 }
 0x1f7   : > { %v1928_v40 = vpop.f32.mrf.mxu3 }
 0x1f8   : > { %v2254_v22 = vmul.f32 %v7612_v43, %v2242_v13  ;;  %v1945_v3 = vadd.f32 %v1928_v40, %v7558_v42  ;;  %v2231_v50 = vpop.f32.mrf.mxu2 }
 0x1fa   : > { %v2266_v48 = vadd.f32 %v7619_v24, %v2254_v22  ;;  %v2047_v58 = vadd.f32 %v2030_v31, %v1945_v3  ;;  %v1528_v31 = vadd.f32 %v7579_v11, %v7506_v14 }
 0x1fc   : > { %v2274_v4 = vmax.f32 %v2266_v48, 0.0  ;;  %v2141_v21 = vadd.f32 %v2124_v18, %v2047_v58  ;;  %v2129_v18 = vpop.f32.mrf.mxu1  ;;  %v1650_v47 = vadd.f32 %v7556_v9, %v1528_v31  ;;  %v2037_v58 = vpop.f32.mrf.mxu0 }
 0x1fe   : > { %v2281_v45 = vpack.c.bf16 %v2274_v4, %v2273_v59  ;;  %v2243_v19 = vadd.f32 %v2226_v17, %v2141_v21  ;;  %v1752_v11 = vadd.f32 %v7560_v33, %v1650_v47  ;;  %v6446_v33 = vld [vmem:[%s9482_s29 + $0x78] sm:$0xff] }
 0x1ff   : > { %v1930_v39 = vpop.f32.mrf.mxu3  ;;  %2644 = vmatpush.bf16.msrb.mxu2 %v6446_v33 }
 0x200   : > { %v1946_v27 = vadd.f32 %v1930_v39, %v1844_v5  ;;  %5650 = vmatmul.msk.bf16.vlgmr.msrb.gmra.mxu3 %vm9479_vm14, %v2281_v45  ;;  %5654 = vmatmul.msk.bf16.vlgmr.msrb.gmra.mxu0 %vm9480_vm11, %v2281_v45  ;;  %v2255_v20 = vmul.f32 %v7612_v43, %v2243_v19  ;;  %v1846_v9 = vadd.f32 %v7562_v16, %v1752_v11  ;;  %v6445_v5 = vld [vmem:[%s9482_s29 + $0x70] sm:$0xff]  ;;  %vm9483_vm14 = vmmov %vm9473_vm0 }
 0x201   : > { %v1533_v16 = vadd.f32 %v7602_v23, %v7522_v26  ;;  %v6437_v39 = vld [vmem:[%s9482_s29 + $0x30] sm:$0xff]  ;;  %v6444_v26 = vld [vmem:[%s9482_s29 + $0x68] sm:$0xff]  ;;  %vm9484_vm11 = vmmov %vm9473_vm0 }
 0x202   : > { %v2048_v42 = vadd.f32 %v2032_v53, %v1946_v27  ;;  %v2267_v61 = vadd.f32 %v7619_v24, %v2255_v20  ;;  %v6436_v23 = vld [vmem:[%s9482_s29 + $0x28] sm:$0xff] }
 0x203   : > { %v1652_v31 = vadd.f32 %v7581_v25, %v1533_v16  ;;  %2645 = vmatpush.bf16.msrb.mxu2 %v6445_v5 }
 0x204   : > { %v2142_v38 = vadd.f32 %v2126_v62, %v2048_v42  ;;  %v2275_v53 = vmax.f32 %v2267_v61, 0.0  ;;  %v2131_v62 = vpop.f32.mrf.mxu1 }
 0x206   : > { %v2244_v51 = vadd.f32 %v2228_v1, %v2142_v38  ;;  %v2233_v1 = vpop.f32.mrf.mxu2 }
 0x207   : > { %v1933_v13 = vpop.f32.mrf.mxu3  ;;  %2646 = vmatpush.bf16.msrb.mxu2 %v6444_v26  ;;  %v2403_v26 = vld [vmem:[%s9486_s6] sm:$0x3] }
 0x208   : > { %v2256_v17 = vmul.f32 %v7612_v43, %v2244_v51  ;;  %v1947_v40 = vadd.f32 %v1933_v13, %v7577_v60  ;;  %v6438_v60 = vld [vmem:[%s9482_s29 + $0x38] sm:$0xff] }
 0x209   : > { %2615 = vmatpush.bf16.msrb.mxu1 %v6438_v60 }
 0x20a   : > { %v2049_v22 = vadd.f32 %v2035_v28, %v1947_v40  ;;  %v2268_v14 = vadd.f32 %v7619_v24, %v2256_v17  ;;  %v2040_v28 = vpop.f32.mrf.mxu0  ;;  %v6443_v17 = vld [vmem:[%s9482_s29 + $0x60] sm:$0xff] }
 0x20b   : > { %v6435_v40 = vld [vmem:[%s9482_s29 + $0x20] sm:$0xff]  ;;  %2647 = vmatpush.bf16.msrb.mxu2 %v6443_v17  ;;  %v7731_v17 = vperm.slane %v2403_v26, 0 }
 0x20c   : > { %v2143_v3 = vadd.f32 %v2129_v18, %v2049_v22  ;;  %v2276_v48 = vmax.f32 %v2268_v14, 0.0  ;;  %v2134_v25 = vpop.f32.mrf.mxu1 }
 0x20d   : > { %2616 = vmatpush.bf16.msrb.mxu1 %v6437_v39 }
 0x20e   : > { %v2282_v35 = vpack.c.bf16 %v2276_v48, %v2275_v53  ;;  %v2245_v4 = vadd.f32 %v2231_v50, %v2143_v3  ;;  %v1754_v50 = vadd.f32 %v7583_v37, %v1652_v31  ;;  %v2236_v61 = vpop.f32.mrf.mxu2  ;;  %v6442_v37 = vld [vmem:[%s9482_s29 + $0x58] sm:$0xff]  ;;  %v6440_v31 = vld [vmem:[%s9482_s29 + $0x48] sm:$0xff] }
 0x20f   : > { %v1935_v59 = vpop.f32.mrf.mxu3  ;;  %v6434_v53 = vld [vmem:[%s9482_s29 + $0x18] sm:$0xff]  ;;  %2648 = vmatpush.bf16.msrb.mxu2 %v6442_v37 }
 0x210   : > { %v1948_v21 = vadd.f32 %v1935_v59, %v1846_v9  ;;  %5651 = vmatmul.msk.bf16.gmra.mxu3 %vm9473_vm0, %v2282_v35  ;;  %5655 = vmatmul.msk.bf16.gmra.mxu0 %vm9481_vm12, %v2282_v35  ;;  %v2257_v19 = vmul.f32 %v7612_v43, %v2245_v4  ;;  %v1848_v14 = vadd.f32 %v7585_v8, %v1754_v50  ;;  %vm9485_vm12 = vmmov %vm9473_vm0  ;;  %v6603_v50 = vld [vmem:[%s9410_s1] sm:$0x7]  ;;  %s6618_s1 = sshra.s32 %s5196_s2, 4  ;;  %s6619_s1 = int_to_ptr.hbm [resolvable:$true] %s6618_s1 }
 0x211   : > { %2617 = vmatpush.bf16.msrb.mxu1 %v6436_v23  ;;  %v7711_v23 = vperm.slane %v2403_v26, 1  ;;  %p6625_p0 = scmp.lt.s32.totalorder %s6619_s1, %s9261_s28 }
 0x212   : > { %v2050_v45 = vadd.f32 %v2037_v58, %v1948_v21  ;;  %v2269_v47 = vadd.f32 %v7619_v24, %v2257_v19  ;;  %v2042_v35 = vpop.f32.mrf.mxu0 }
 0x214   : > { %v2144_v27 = vadd.f32 %v2131_v62, %v2050_v45  ;;  %v2277_v22 = vmax.f32 %v2269_v47, 0.0  ;;  %v6441_v62 = vld [vmem:[%s9482_s29 + $0x50] sm:$0xff]  ;;  %v2136_v59 = vpop.f32.mrf.mxu1 }
 0x215   : > { %2618 = vmatpush.bf16.msrb.mxu1 %v6435_v40  ;;  %2649 = vmatpush.bf16.msrb.mxu2 %v6441_v62 }
 0x216   : > { %v2246_v42 = vadd.f32 %v2233_v1, %v2144_v27  ;;  %v2238_v33 = vpop.f32.mrf.mxu2  ;;  %v6433_v27 = vld [vmem:[%s9482_s29 + $0x10] sm:$0xff] }
 0x217   : > { %v1938_v20 = vpop.f32.mrf.mxu3 }
 0x218   : > { %v2258_v38 = vmul.f32 %v7612_v43, %v2246_v42  ;;  %v1949_v18 = vadd.f32 %v1938_v20, %v7600_v7  ;;  %v6431_v42 = vld [vmem:[%s9482_s29] sm:$0xff] }
 0x219   : > { %2619 = vmatpush.bf16.msrb.mxu1 %v6434_v53  ;;  %2650 = vmatpush.bf16.msrb.mxu2 %v6440_v31  ;;  %v2425_v20 = vld [vmem:[%s9487_s0] sm:$0x3]  ;;  %v7743_v53 = vperm.slane %v6603_v50, 0 }
 0x21a   : > { %v2051_v51 = vadd.f32 %v2040_v28, %v1949_v18  ;;  %v2270_v13 = vadd.f32 %v7619_v24, %v2258_v38  ;;  %v6602_v38 = vld [vmem:[%s9409_s7] sm:$0x7]  ;;  %s6620_s7 = scalar_lea.hbm %s6619_s1, 16 }
 0x21b   : > { %v7719_v18 = vperm.slane %v6602_v38, 1  ;;  %p6621_p11 = scmp.ne.s32.totalorder %s6619_s1, %s6620_s7 }
 0x21c   : > { %v2145_v7 = vadd.f32 %v2134_v25, %v2051_v51  ;;  %v2278_v11 = vmax.f32 %v2270_v13, 0.0  ;;  %v7722_v25 = vperm.slane %v2425_v20, 1  ;;  %v7729_v13 = vperm.slane %v6603_v50, 1 }
 0x21d   : > { %2620 = vmatpush.bf16.msrb.mxu1 %v6433_v27  ;;  %v1269_v51 = vmul.f32 %v7719_v18, %v7403_v46  ;;  %p6622_p12 = pnand %p6621_p11, %p6852_p5 }
 0x21e   : > { %v2283_v3 = vpack.c.bf16 %v2278_v11, %v2277_v22  ;;  %v2247_v58 = vadd.f32 %v2236_v61, %v2145_v7  ;;  %v7733_v61 = vperm.slane %v6602_v38, 0  ;;  %v1272_v7 = vmul.f32 %v7719_v18, %v7417_v2 }
 0x21f   : > { %v1940_v48 = vpop.f32.mrf.mxu3  ;;  %p6623_p13 = pneg %p6622_p12 }
 0x220   : > { %v1950_v9 = vadd.f32 %v1940_v48, %v1848_v14  ;;  %5652 = vmatmul.msk.bf16.gmra.mxu3 %vm9483_vm14, %v2283_v3  ;;  %5656 = vmatmul.msk.bf16.gmra.mxu0 %vm9484_vm11, %v2283_v3  ;;  %v2259_v4 = vmul.f32 %v7612_v43, %v2247_v58  ;;  %v1301_v14 = vadd.f32 %v7729_v13, %v1269_v51  ;;  %v7740_v3 = vperm.slane %v2425_v20, 0  ;;  %vm9493_vm14 = vmmov %vm9473_vm0 }
 0x221   : > { %v1268_v48 = vmul.f32 %v7733_v61, %v7400_v44  ;;  %v1304_v58 = vadd.f32 %v7729_v13, %v1272_v7  ;;  %vm9494_vm11 = vmmov %vm9473_vm0 }
 0x222   : > { %v2052_v8 = vadd.f32 %v2042_v35, %v1950_v9  ;;  %v2271_v16 = vadd.f32 %v7619_v24, %v2259_v4  ;;  %v1271_v35 = vmul.f32 %v7733_v61, %v7415_v55 }
 0x223   : > { %v1300_v4 = vadd.f32 %v7743_v53, %v1268_v48 }
 0x224   : > { %v2146_v21 = vadd.f32 %v2136_v59, %v2052_v8  ;;  %v2279_v5 = vmax.f32 %v2271_v16, 0.0 }
 0x226   : > { %v2248_v60 = vadd.f32 %v2238_v33, %v2146_v21 }
 0x228   : > { %v2260_v1 = vmul.f32 %v7612_v43, %v2248_v60  ;;  %v6432_v43 = vld [vmem:[%s9482_s29 + $0x8] sm:$0xff] }
 0x229   : > { %2621 = vmatpush.bf16.msrb.mxu1 %v6432_v43 }
 0x22a   : > { %v2272_v45 = vadd.f32 %v7619_v24, %v2260_v1  ;;  %v6439_v24 = vld [vmem:[%s9482_s29 + $0x40] sm:$0xff]  ;;  %v1303_v1 = vadd.f32 %v7743_v53, %v1271_v35 }
 0x22b   : > { %2651 = vmatpush.bf16.msrb.mxu2 %v6439_v24  ;;  %v1278_v24 = vmul.f32 %v7719_v18, %v7457_v36 }
 0x22c   : > { %v2280_v39 = vmax.f32 %v2272_v45, 0.0 }
 0x22d   : > { %2622 = vmatpush.bf16.msrb.mxu1 %v6431_v42  ;;  %v1310_v36 = vadd.f32 %v7729_v13, %v1278_v24 }
 0x22e   : > { %v2284_v19 = vpack.c.bf16 %v2280_v39, %v2279_v5 }
 0x230   : > { %5653 = vmatmul.msk.bf16.gmra.mxu3 %vm9473_vm0, %v2284_v19  ;;  %5657 = vmatmul.msk.bf16.gmra.mxu0 %vm9485_vm12, %v2284_v19  ;;  %v1275_v19 = vmul.f32 %v7719_v18, %v7440_v10  ;;  %vm9495_vm12 = vmmov %vm9473_vm0 }
 0x232   : > { %v1307_v20 = vadd.f32 %v7729_v13, %v1275_v19 }
 0x27d   : > { %v2383_v28 = vpop.f32.mrf.mxu0 }
 0x27e   : > { %v2410_v47 = vmul.f32 %v7711_v23, %v2383_v28 }
 0x280   : > { %v2432_v22 = vadd.f32 %v7722_v25, %v2410_v47  ;;  %v1274_v47 = vmul.f32 %v7733_v61, %v7435_v6 }
 0x282   : > { %v7748_v9 = vadd.f32 %v2432_v22, %v1301_v14  ;;  %v1306_v14 = vadd.f32 %v7743_v53, %v1274_v47 }
 0x283   : > { %v2354_v40 = vpop.f32.mrf.mxu3 }
 0x284   : > { %v2409_v46 = vmul.f32 %v7731_v17, %v2354_v40  ;;  %v9336_v21 = vmax.f32 %v7748_v9, 0.0  ;;  %v1277_v40 = vmul.f32 %v7733_v61, %v7455_v29 }
 0x285   : > { %v2385_v11 = vpop.f32.mrf.mxu0 }
 0x286   : > { %v2412_v37 = vmul.f32 %v7711_v23, %v2385_v11  ;;  %v2431_v8 = vadd.f32 %v7740_v3, %v2409_v46 }
 0x288   : > { %v2434_v2 = vadd.f32 %v7722_v25, %v2412_v37  ;;  %v7761_v16 = vadd.f32 %v2431_v8, %v1300_v4  ;;  %v1281_v4 = vmul.f32 %v7719_v18, %v7472_v52 }
 0x28a   : > { %v7754_v62 = vadd.f32 %v2434_v2, %v1304_v58  ;;  %v9337_v27 = vmax.f32 %v7761_v16, 0.0  ;;  %v1309_v58 = vadd.f32 %v7743_v53, %v1277_v40 }
 0x28b   : > { %v2356_v59 = vpop.f32.mrf.mxu3 }
 0x28c   : > { %v9332_v44 = vmax.f32 %v7754_v62, 0.0  ;;  %v2411_v33 = vmul.f32 %v7731_v17, %v2356_v59 }
 0x28d   : > { %v2388_v60 = vpop.f32.mrf.mxu0 }
 0x28e   : > { %v2480_v55 = vpack.c.bf16 %v9332_v44, %v9336_v21  ;;  %v2433_v45 = vadd.f32 %v7740_v3, %v2411_v33  ;;  %v2414_v39 = vmul.f32 %v7711_v23, %v2388_v60 }
 0x290   : > { %v7768_v5 = vadd.f32 %v2433_v45, %v1303_v1  ;;  %2652 = vmatmul.bf16.vlgmr.msrb.gmra.mxu2 %v2480_v55  ;;  %v2436_v26 = vadd.f32 %v7722_v25, %v2414_v39  ;;  %v1284_v55 = vmul.f32 %v7719_v18, %v7476_v41  ;;  %v1280_v41 = vmul.f32 %v7733_v61, %v7469_v15 }
 0x292   : > { %v9333_v31 = vmax.f32 %v7768_v5, 0.0  ;;  %v7788_v51 = vadd.f32 %v2436_v26, %v1307_v20  ;;  %v1316_v26 = vadd.f32 %v7729_v13, %v1284_v55  ;;  %v1312_v15 = vadd.f32 %v7743_v53, %v1280_v41 }
 0x293   : > { %v2359_v43 = vpop.f32.mrf.mxu3  ;;  %v1286_v41 = vmul.f32 %v7733_v61, %v7487_v32 }
 0x294   : > { %v2479_v42 = vpack.c.bf16 %v9333_v31, %v9337_v27  ;;  %v2413_v10 = vmul.f32 %v7731_v17, %v2359_v43  ;;  %v9330_v46 = vmax.f32 %v7788_v51, 0.0  ;;  %v1313_v43 = vadd.f32 %v7729_v13, %v1281_v4 }
 0x295   : > { %v2390_v28 = vpop.f32.mrf.mxu0  ;;  %v1287_v4 = vmul.f32 %v7719_v18, %v7489_v49 }
 0x296   : > { %v2416_v38 = vmul.f32 %v7711_v23, %v2390_v28  ;;  %2623 = vmatmul.bf16.vlgmr.msrb.gmra.mxu1 %v2479_v42  ;;  %v2435_v7 = vadd.f32 %v7740_v3, %v2413_v10  ;;  %v6454_v42 = vld [vmem:[%s9488_s13 + $0x38] sm:$0xff]  ;;  %v6453_v10 = vld [vmem:[%s9488_s13 + $0x30] sm:$0xff] }
 0x297   : > { %2802 = vmatpush.bf16.msra.mxu3 %v6454_v42 }
 0x298   : > { %v2438_v50 = vadd.f32 %v7722_v25, %v2416_v38  ;;  %v7801_v2 = vadd.f32 %v2435_v7, %v1306_v14  ;;  %v1283_v38 = vmul.f32 %v7733_v61, %v7474_v0  ;;  %v6452_v14 = vld [vmem:[%s9488_s13 + $0x28] sm:$0xff] }
 0x29a   : > { %v7794_v22 = vadd.f32 %v2438_v50, %v1310_v36  ;;  %v9331_v33 = vmax.f32 %v7801_v2, 0.0  ;;  %v1315_v0 = vadd.f32 %v7743_v53, %v1283_v38 }
 0x29b   : > { %v2361_v11 = vpop.f32.mrf.mxu3  ;;  %2803 = vmatpush.bf16.msra.mxu3 %v6453_v10 }
 0x29c   : > { %v2415_v6 = vmul.f32 %v7731_v17, %v2361_v11  ;;  %v9328_v37 = vmax.f32 %v7794_v22, 0.0 }
 0x29d   : > { %v2393_v48 = vpop.f32.mrf.mxu0 }
 0x29e   : > { %v2437_v29 = vadd.f32 %v7740_v3, %v2415_v6  ;;  %v2482_v35 = vpack.c.bf16 %v9328_v37, %v9330_v46  ;;  %v2418_v59 = vmul.f32 %v7711_v23, %v2393_v48 }
 0x29f   : > { %2804 = vmatpush.bf16.msra.mxu3 %v6452_v14 }
 0x2a0   : > { %v7808_v8 = vadd.f32 %v2437_v29, %v1309_v58  ;;  %2657 = vmatmul.bf16.gmra.mxu2 %v2482_v35  ;;  %v2440_v45 = vadd.f32 %v7722_v25, %v2418_v59 }
 0x2a2   : > { %v9329_v60 = vmax.f32 %v7808_v8, 0.0  ;;  %v7831_v28 = vadd.f32 %v2440_v45, %v1313_v43 }
 0x2a3   : > { %v2364_v1 = vpop.f32.mrf.mxu3 }
 0x2a4   : > { %v2481_v39 = vpack.c.bf16 %v9329_v60, %v9331_v33  ;;  %v2417_v52 = vmul.f32 %v7731_v17, %v2364_v1  ;;  %v9326_v40 = vmax.f32 %v7831_v28, 0.0 }
 0x2a5   : > { %v2395_v19 = vpop.f32.mrf.mxu0 }
 0x2a6   : > { %v2420_v24 = vmul.f32 %v7711_v23, %v2395_v19  ;;  %2628 = vmatmul.bf16.gmra.mxu1 %v2481_v39  ;;  %v2439_v47 = vadd.f32 %v7740_v3, %v2417_v52  ;;  %v1290_v39 = vmul.f32 %v7719_v18, %v7501_v34 }
 0x2a8   : > { %v2442_v20 = vadd.f32 %v7722_v25, %v2420_v24  ;;  %v7850_v48 = vadd.f32 %v2439_v47, %v1312_v15  ;;  %v1319_v24 = vadd.f32 %v7729_v13, %v1287_v4  ;;  %v1322_v34 = vadd.f32 %v7729_v13, %v1290_v39  ;;  %v6447_v4 = vld [vmem:[%s9488_s13] sm:$0xff]  ;;  %v6461_v39 = vld [vmem:[%s9488_s13 + $0x70] sm:$0xff] }
 0x2aa   : > { %v7840_v36 = vadd.f32 %v2442_v20, %v1316_v26  ;;  %v9327_v1 = vmax.f32 %v7850_v48, 0.0  ;;  %v1289_v20 = vmul.f32 %v7733_v61, %v7496_v12 }
 0x2ab   : > { %v2366_v50 = vpop.f32.mrf.mxu3 }
 0x2ac   : > { %v2419_v7 = vmul.f32 %v7731_v17, %v2366_v50  ;;  %v9322_v11 = vmax.f32 %v7840_v36, 0.0  ;;  %v1321_v15 = vadd.f32 %v7743_v53, %v1289_v20  ;;  %v7955_v20 = vld [vmem:[%s9492_s11] ss:$0 sm:$0xff] }
 0x2ad   : > { %v2398_v6 = vpop.f32.mrf.mxu0 }
 0x2ae   : > { %v2441_v58 = vadd.f32 %v7740_v3, %v2419_v7  ;;  %v2484_v29 = vpack.c.bf16 %v9322_v11, %v9326_v40  ;;  %v2422_v59 = vmul.f32 %v7711_v23, %v2398_v6  ;;  %v6451_v6 = vld [vmem:[%s9488_s13 + $0x20] sm:$0xff] }
 0x2af   : > { %2805 = vmatpush.bf16.msra.mxu3 %v6451_v6 }
 0x2b0   : > { %v7857_v35 = vadd.f32 %v2441_v58, %v1315_v0  ;;  %2662 = vmatmul.bf16.gmra.mxu2 %v2484_v29  ;;  %v2444_v19 = vadd.f32 %v7722_v25, %v2422_v59  ;;  %v6449_v0 = vld [vmem:[%s9488_s13 + $0x10] sm:$0xff]  ;;  %v6448_v58 = vld [vmem:[%s9488_s13 + $0x8] sm:$0xff]  ;;  %v6458_v29 = vld [vmem:[%s9488_s13 + $0x58] sm:$0xff] }
 0x2b1   : > { %v6462_v59 = vld [vmem:[%s9488_s13 + $0x78] sm:$0xff]  ;;  %2961 = vmatpush.bf16.msra.mxu1 %v6458_v29 }
 0x2b2   : > { %v9325_v55 = vmax.f32 %v7857_v35, 0.0  ;;  %v7877_v18 = vadd.f32 %v2444_v19, %v1319_v24  ;;  %3063 = vmatpush.bf16.msra.mxu2 %v6462_v59  ;;  %v6456_v19 = vld [vmem:[%s9488_s13 + $0x48] sm:$0xff]  ;;  %v6455_v24 = vld [vmem:[%s9488_s13 + $0x40] sm:$0xff] }
 0x2b3   : > { %v2369_v45 = vpop.f32.mrf.mxu3 }
 0x2b4   : > { %v2483_v43 = vpack.c.bf16 %v9325_v55, %v9327_v1  ;;  %v2421_v49 = vmul.f32 %v7731_v17, %v2369_v45  ;;  %v9320_v50 = vmax.f32 %v7877_v18, 0.0  ;;  %v6457_v45 = vld [vmem:[%s9488_s13 + $0x50] sm:$0xff] }
 0x2b5   : > { %v2400_v52 = vpop.f32.mrf.mxu0  ;;  %2962 = vmatpush.bf16.msra.mxu1 %v6457_v45 }
 0x2b6   : > { %v2424_v42 = vmul.f32 %v7711_v23, %v2400_v52  ;;  %2633 = vmatmul.bf16.gmra.mxu1 %v2483_v43  ;;  %v2443_v10 = vadd.f32 %v7740_v3, %v2421_v49  ;;  %v1318_v23 = vadd.f32 %v7743_v53, %v1286_v41  ;;  %3064 = vmatpush.bf16.msra.mxu2 %v6461_v39  ;;  %v6460_v43 = vld [vmem:[%s9488_s13 + $0x68] sm:$0xff]  ;;  %v6466_v52 = vld [vmem:[%s9488_s13 + $0x98] sm:$0xff]  ;;  %v6459_v49 = vld [vmem:[%s9488_s13 + $0x60] sm:$0xff] }
 0x2b7   : > { %3157 = vmatpush.bf16.msrb.mxu3 %v6466_v52 }
 0x2b8   : > { %v2446_v26 = vadd.f32 %v7722_v25, %v2424_v42  ;;  %v7890_v7 = vadd.f32 %v2443_v10, %v1318_v23  ;;  %v7950_v42 = vld [vmem:[%s9491_s9] ss:$0 sm:$0xff]  ;;  %s837_s9 = sand.u32 1, %s6658_s5  }
 0x2b9   : > { %2963 = vmatpush.bf16.msra.mxu1 %v6456_v19  ;;  %s5259_s12 = sshll.u32 %s837_s9, 4  ;;  %s5180_s0 = scalar_lea.sflag [#allocation4], %s837_s9 }
 0x2ba   : > { %v7883_v38 = vadd.f32 %v2446_v26, %v1322_v34  ;;  %v9321_v14 = vmax.f32 %v7890_v7, 0.0  ;;  %3065 = vmatpush.bf16.msra.mxu2 %v6460_v43  ;;  %s839_s4 = scalar_lea.vmem [#allocation3], %s5259_s12  ;;  %s6624_s12 = scalar_lea.hbm %s9261_s28, 32 }
 0x2bb   : > { %v2371_v47 = vpop.f32.mrf.mxu3  ;;  %s5193_s3 = sshll.u32 %s839_s4, 4  ;;  %p6626_p1 = scmp.lt.s32.totalorder %s6624_s12, %s6620_s7  ;;  %s5194_s3 = int_to_ptr.vmem [resolvable:$true] %s5193_s3 }
 0x2bc   : > { %9489 = vst [vmem:[#allocation24_spill] sm:$0xff] %v7883_v38  ;;  %v2423_v32 = vmul.f32 %v7731_v17, %v2371_v47  ;;  %v9318_v13 = vmax.f32 %v7883_v38, 0.0 }
 0x2bd   : > { %2964 = vmatpush.bf16.msra.mxu1 %v6455_v24  ;;  %p6627_p2 = por %p6626_p1, %p6625_p0 }
 0x2be   : > { %v2445_v25 = vadd.f32 %v7740_v3, %v2423_v32  ;;  %v2486_v12 = vpack.c.bf16 %v9318_v13, %v9320_v50  ;;  %v6450_v3 = vld [vmem:[%s9488_s13 + $0x18] sm:$0xff]  ;;  %3066 = vmatpush.bf16.msra.mxu2 %v6459_v49 }
 0x2bf   : > { %2867 = vmatpush.bf16.msra.mxu0 %v6450_v3  ;;  %v2713_v3 = vld [vmem:[#allocation2 + $0x7] sm:$0xff]  ;;  %p6628_p3 = pnand %p6627_p2, %p6623_p13 }
 0x2c0   : > { %v7897_v61 = vadd.f32 %v2445_v25, %v1321_v15  ;;  %2667 = vmatmul.bf16.gmra.mxu2 %v2486_v12  ;;  %v6465_v12 = vld [vmem:[%s9488_s13 + $0x90] sm:$0xff]  ;;  %v2721_v29 = vsel %vm7123_vm3, %v2713_v3, 0.0 }
 0x2c1   : > { %3158 = vmatpush.bf16.msrb.mxu3 %v6465_v12 }
 0x2c2   : > { %9490 = vst [vmem:[#allocation25_spill] sm:$0xff] %v7897_v61  ;;  %v9319_v17 = vmax.f32 %v7897_v61, 0.0 }
 0x2c3   : > { %2868 = vmatpush.bf16.msra.mxu0 %v6449_v0  ;;  %v2741_v0 = vld [vmem:[#allocation2 + $0x8] sm:$0xff] }
 0x2c4   : > { %v2485_v53 = vpack.c.bf16 %v9319_v17, %v9321_v14  ;;  %v9509_v17 = vld [vmem:[#allocation19_spill] sm:$0xff] }
 0x2c6   : > { %2638 = vmatmul.bf16.gmra.mxu1 %v2485_v53 }
 0x2c7   : > { %2869 = vmatpush.bf16.msra.mxu0 %v6448_v58 }
 0x2cb   : > { %2870 = vmatpush.bf16.msra.mxu0 %v6447_v4 }
 0x313   : > { %v2624_v41 = vpop.f32.mrf.mxu1  ;;  %v2653_v34 = vpop.f32.mrf.mxu2 }
 0x314   : > { %v2654_v26 = vadd.f32 %v2653_v34, %v2624_v41 }
 0x316   : > { %v2677_v10 = vmul.f32 %v7950_v42, %v2654_v26 }
 0x318   : > { %v2689_v47 = vadd.f32 %v7955_v20, %v2677_v10 }
 0x31a   : > { %v2697_v23 = vmax.f32 %v2689_v47, 0.0 }
 0x31b   : > { %v2626_v32 = vpop.f32.mrf.mxu1  ;;  %v2655_v15 = vpop.f32.mrf.mxu2 }
 0x31c   : > { %2705 = vst.msk [vmem:[#allocation2 + $0x10] sm:$0xff] %vm9493_vm14, %v2697_v23  ;;  %v2656_v25 = vadd.f32 %v2655_v15, %v2626_v32  ;;  %vm9496_vm14 = vmmov %vm9473_vm0 }
 0x31e   : > { %v2678_v53 = vmul.f32 %v7950_v42, %v2656_v25 }
 0x320   : > { %v2690_v6 = vadd.f32 %v7955_v20, %v2678_v53 }
 0x322   : > { %v2698_v58 = vmax.f32 %v2690_v6, 0.0  ;;  %v6464_v6 = vld [vmem:[%s9488_s13 + $0x88] sm:$0xff] }
 0x323   : > { %v2629_v59 = vpop.f32.mrf.mxu1  ;;  %v2658_v4 = vpop.f32.mrf.mxu2  ;;  %v7967_v45 = vld [vmem:[#allocation2 + $0x10] sm:$0xff]  ;;  %3159 = vmatpush.bf16.msrb.mxu3 %v6464_v6 }
 0x324   : > { %v2714_v39 = vld [vmem:[#allocation2 + $0xf] sm:$0xff]  ;;  %2706 = vst.msk [vmem:[#allocation2 + $0x18] sm:$0xff] %vm9494_vm11, %v2698_v58  ;;  %v2659_v19 = vadd.f32 %v2658_v4, %v2629_v59  ;;  %v2749_v43 = vpack.c.bf16 %v7967_v45, %v2741_v0  ;;  %vm9497_vm11 = vmmov %vm9473_vm0 }
 0x325   : > { %v2722_v52 = vsel %vm7133_vm4, %v2714_v39, 0.0  ;;  %v2892_v34 = vld [vmem:[#allocation2 + $0x9] sm:$0xff]  ;;  %v3002_v53 = vsel %vm7123_vm3, %v2714_v39, 0.0 }
 0x326   : > { %v2729_v24 = vpack.c.bf16 %v2722_v52, %v2721_v29  ;;  %v2679_v49 = vmul.f32 %v7950_v42, %v2659_v19  ;;  %5746 = vmatmul.msk.bf16.vlgmr.msra.gmra.mxu3 %vm9473_vm0, %v2749_v43  ;;  %v2900_v32 = vsel %vm7115_vm1, %v2892_v34, 0.0  ;;  %v6469_v6 = vld [vmem:[%s9488_s13 + $0xb0] sm:$0xff] }
 0x328   : > { %5766 = vmatmul.msk.bf16.vlgmr.msra.gmra.mxu0 %vm9495_vm12, %v2729_v24  ;;  %v2691_v41 = vadd.f32 %v7955_v20, %v2679_v49  ;;  %vm9498_vm12 = vmmov %vm9473_vm0 }
 0x32a   : > { %v2699_v26 = vmax.f32 %v2691_v41, 0.0 }
 0x32b   : > { %v2631_v10 = vpop.f32.mrf.mxu1  ;;  %v2660_v47 = vpop.f32.mrf.mxu2  ;;  %v7977_v23 = vld [vmem:[#allocation2 + $0x11] sm:$0xff] }
 0x32c   : > { %v7981_v15 = vld [vmem:[#allocation2 + $0x17] sm:$0xff]  ;;  %2707 = vst.msk [vmem:[#allocation2 + $0x20] sm:$0xff] %vm9496_vm14, %v2699_v26  ;;  %v2661_v25 = vadd.f32 %v2660_v47, %v2631_v10  ;;  %v2901_v12 = vsel %vm7119_vm2, %v7977_v23, 0.0  ;;  %v3198_v38 = vsel %vm7115_vm1, %v7977_v23, 0.0  ;;  %v6479_v23 = vld [vmem:[%s9488_s13 + $0x100] sm:$0xff] }
 0x32d   : > { %v3003_v3 = vsel %vm7133_vm4, %v7981_v15, 0.0  ;;  %v2908_v0 = vpack.c.bf16 %v2901_v12, %v2900_v32  ;;  %v7999_v43 = vld [vmem:[#allocation2 + $0x18] sm:$0xff]  ;;  %v2723_v34 = vsel %vm7186_vm7, %v7981_v15, 0.0  ;;  %v9499_v26 = vld [vmem:[#allocation15_spill] sm:$0xff] }
 0x32e   : > { %v3010_v58 = vpack.c.bf16 %v3003_v3, %v3002_v53  ;;  %v2680_v29 = vmul.f32 %v7950_v42, %v2661_v25  ;;  %vm9500_vm14 = vnez %v9499_v26  ;;  %v6463_v25 = vld [vmem:[%s9488_s13 + $0x80] sm:$0xff]  ;;  %v6470_v12 = vld [vmem:[%s9488_s13 + $0xb8] sm:$0xff]  ;;  %v3104_v27 = vpack.c.bf16 %v7999_v43, %v7967_v45 }
 0x32f   : > { %5794 = vmatmul.msk.bf16.vlgmr.msra.gmra.mxu1 %vm9497_vm11, %v2908_v0  ;;  %vm9501_vm11 = vmmov %vm9473_vm0  ;;  %3160 = vmatpush.bf16.msrb.mxu3 %v6463_v25  ;;  %v3300_v45 = vsel %vm7123_vm3, %v7981_v15, 0.0 }
 0x330   : > { %5822 = vmatmul.msk.bf16.vlgmr.msra.gmra.mxu2 %vm9473_vm0, %v3010_v58  ;;  %v2692_v59 = vadd.f32 %v7955_v20, %v2680_v29  ;;  %3259 = vmatpush.bf16.msrb.mxu0 %v6470_v12 }
 0x332   : > { %v2700_v4 = vmax.f32 %v2692_v59, 0.0 }
 0x333   : > { %v2634_v39 = vpop.f32.mrf.mxu1  ;;  %v2663_v19 = vpop.f32.mrf.mxu2  ;;  %v8001_v52 = vld [vmem:[#allocation2 + $0x20] sm:$0xff] }
 0x334   : > { %v8003_v24 = vld [vmem:[#allocation2 + $0x1f] sm:$0xff]  ;;  %2708 = vst.msk [vmem:[#allocation2 + $0x28] sm:$0xff] %vm9498_vm12, %v2700_v4  ;;  %v2664_v49 = vadd.f32 %v2663_v19, %v2634_v39  ;;  %v8008_v41 = vpack.c.bf16 %v8001_v52, %v7999_v43  ;;  %vm9503_vm12 = vmmov %vm9473_vm0  ;;  %3260 = vmatpush.bf16.msrb.mxu0 %v6469_v6 }
 0x335   : > { %v2724_v10 = vsel %vm9500_vm14, %v8003_v24, 0.0  ;;  %v8027_v3 = vld [vmem:[#allocation2 + $0x19] sm:$0xff] }
 0x336   : > { %v2730_v47 = vpack.c.bf16 %v2724_v10, %v2723_v34  ;;  %v2681_v32 = vmul.f32 %v7950_v42, %v2664_v49  ;;  %5747 = vmatmul.msk.bf16.gmra.mxu3 %vm9501_vm11, %v8008_v41  ;;  %v2902_v39 = vsel %vm7169_vm5, %v8027_v3, 0.0  ;;  %vm9505_vm11 = vmmov %vm9473_vm0  ;;  %v3199_v21 = vsel %vm7119_vm2, %v8027_v3, 0.0 }
 0x337   : > { %v3206_v61 = vpack.c.bf16 %v3199_v21, %v3198_v38 }
 0x338   : > { %5767 = vmatmul.msk.bf16.gmra.mxu0 %vm9473_vm0, %v2730_v47  ;;  %v2693_v53 = vadd.f32 %v7955_v20, %v2681_v32  ;;  %v3004_v47 = vsel %vm7186_vm7, %v8003_v24, 0.0 }
 0x33a   : > { %v2701_v0 = vmax.f32 %v2693_v53, 0.0 }
 0x33b   : > { %v2636_v58 = vpop.f32.mrf.mxu1  ;;  %v2665_v29 = vpop.f32.mrf.mxu2  ;;  %v8032_v59 = vld [vmem:[#allocation2 + $0x21] sm:$0xff] }
 0x33c   : > { %v8037_v19 = vld [vmem:[#allocation2 + $0x27] sm:$0xff]  ;;  %2709 = vst.msk [vmem:[#allocation2 + $0x30] sm:$0xff] %vm9503_vm12, %v2701_v0  ;;  %v2666_v49 = vadd.f32 %v2665_v29, %v2636_v58  ;;  %v2903_v10 = vsel %vm7175_vm6, %v8032_v59, 0.0  ;;  %v6474_v58 = vld [vmem:[%s9488_s13 + $0xd8] sm:$0xff]  ;;  %vm9506_vm12 = vmmov %vm9473_vm0  ;;  %v3200_v38 = vsel %vm7169_vm5, %v8032_v59, 0.0 }
 0x33d   : > { %v3005_v32 = vsel %vm9500_vm14, %v8037_v19, 0.0  ;;  %v2909_v25 = vpack.c.bf16 %v2903_v10, %v2902_v39  ;;  %v6468_v0 = vld [vmem:[%s9488_s13 + $0xa8] sm:$0xff]  ;;  %v6478_v29 = vld [vmem:[%s9488_s13 + $0xf8] sm:$0xff]  ;;  %3361 = vmatpush.bf16.msrb.mxu1 %v6474_v58  ;;  %v6467_v39 = vld [vmem:[%s9488_s13 + $0xa0] sm:$0xff] }
 0x33e   : > { %v3011_v12 = vpack.c.bf16 %v3005_v32, %v3004_v47  ;;  %v2682_v53 = vmul.f32 %v7950_v42, %v2666_v49  ;;  %3261 = vmatpush.bf16.msrb.mxu0 %v6468_v0  ;;  %v6473_v49 = vld [vmem:[%s9488_s13 + $0xd0] sm:$0xff]  ;;  %3455 = vmatpush.bf16.msrb.mxu2 %v6478_v29  ;;  %v9507_v29 = vld [vmem:[#allocation18_spill] sm:$0xff]  ;;  %vm9511_vm7 = vmmov %vm9506_vm12 }
 0x33f   : > { %5795 = vmatmul.msk.bf16.gmra.mxu1 %vm9505_vm11, %v2909_v25  ;;  %v6477_v47 = vld [vmem:[%s9488_s13 + $0xf0] sm:$0xff]  ;;  %vm9508_vm11 = vnez %v9507_v29 }
 0x340   : > { %5823 = vmatmul.msk.bf16.gmra.mxu2 %vm9473_vm0, %v3011_v12  ;;  %v2694_v6 = vadd.f32 %v7955_v20, %v2682_v53  ;;  %v8071_v12 = vld [vmem:[#allocation2 + $0x28] sm:$0xff]  ;;  %vm9510_vm0 = vnez %v9509_v17 }
 0x341   : > { %3362 = vmatpush.bf16.msrb.mxu1 %v6473_v49 }
 0x342   : > { %v2702_v10 = vmax.f32 %v2694_v6, 0.0  ;;  %v2725_v6 = vsel %vm9508_vm11, %v8037_v19, 0.0  ;;  %3262 = vmatpush.bf16.msrb.mxu0 %v6467_v39  ;;  %3456 = vmatpush.bf16.msrb.mxu2 %v6477_v47  ;;  %v6471_v47 = vld [vmem:[%s9488_s13 + $0xc0] sm:$0xff] }
 0x343   : > { %v2639_v32 = vpop.f32.mrf.mxu1  ;;  %v2668_v25 = vpop.f32.mrf.mxu2  ;;  %v8073_v53 = vld [vmem:[#allocation2 + $0x30] sm:$0xff] }
 0x344   : > { %v8075_v0 = vld [vmem:[#allocation2 + $0x2f] sm:$0xff]  ;;  %2710 = vst.msk [vmem:[#allocation2 + $0x38] sm:$0xff] %vm9506_vm12, %v2702_v10  ;;  %v2669_v58 = vadd.f32 %v2668_v25, %v2639_v32  ;;  %v8080_v13 = vpack.c.bf16 %v8073_v53, %v8071_v12  ;;  %v6482_v10 = vld [vmem:[%s9488_s13 + $0x118] sm:$0xff] }
 0x345   : > { %v2726_v50 = vsel %vm9510_vm0, %v8075_v0, 0.0  ;;  %v6472_v32 = vld [vmem:[%s9488_s13 + $0xc8] sm:$0xff]  ;;  %3557 = vmatpush.bf16.msra.mxu3 %v6482_v10  ;;  %v3006_v1 = vsel %vm9508_vm11, %v8075_v0, 0.0  ;;  %vm9515_vm11 = vmmov %vm9511_vm7  ;;  %v3303_v15 = vsel %vm9500_vm14, %v8075_v0, 0.0 }
 0x346   : > { %v2731_v14 = vpack.c.bf16 %v2726_v50, %v2725_v6  ;;  %v2683_v11 = vmul.f32 %v7950_v42, %v2669_v58  ;;  %5748 = vmatmul.msk.bf16.gmra.mxu3 %vm9506_vm12, %v8080_v13  ;;  %v6476_v50 = vld [vmem:[%s9488_s13 + $0xe8] sm:$0xff]  ;;  %3363 = vmatpush.bf16.msrb.mxu1 %v6472_v32  ;;  %vm9514_vm12 = vmmov %vm9511_vm7 }
 0x347   : > { %v8102_v49 = vld [vmem:[#allocation2 + $0x29] sm:$0xff]  ;;  %3457 = vmatpush.bf16.msrb.mxu2 %v6476_v50 }
 0x348   : > { %5768 = vmatmul.msk.bf16.gmra.mxu0 %vm9511_vm7, %v2731_v14  ;;  %v2695_v39 = vadd.f32 %v7955_v20, %v2683_v11  ;;  %v6475_v14 = vld [vmem:[%s9488_s13 + $0xe0] sm:$0xff]  ;;  %v2904_v40 = vsel %vm9465_vm10, %v8102_v49, 0.0  ;;  %v3201_v21 = vsel %vm7175_vm6, %v8102_v49, 0.0 }
 0x34a   : > { %v2703_v25 = vmax.f32 %v2695_v39, 0.0  ;;  %3364 = vmatpush.bf16.msrb.mxu1 %v6471_v47 }
 0x34b   : > { %v2641_v58 = vpop.f32.mrf.mxu1  ;;  %v2670_v6 = vpop.f32.mrf.mxu2  ;;  %v8110_v55 = vld [vmem:[#allocation2 + $0x31] sm:$0xff]  ;;  %3458 = vmatpush.bf16.msrb.mxu2 %v6475_v14 }
 0x34c   : > { %v8115_v10 = vld [vmem:[#allocation2 + $0x37] sm:$0xff]  ;;  %2711 = vst.msk [vmem:[#allocation2 + $0x40] sm:$0xff] %vm9511_vm7, %v2703_v25  ;;  %v2671_v32 = vadd.f32 %v2670_v6, %v2641_v58  ;;  %v2905_v50 = vsel %vm9464_vm9, %v8110_v55, 0.0  ;;  %v3202_v0 = vsel %vm9465_vm10, %v8110_v55, 0.0 }
 0x34d   : > { %v3007_v37 = vsel %vm9510_vm0, %v8115_v10, 0.0  ;;  %v2910_v60 = vpack.c.bf16 %v2905_v50, %v2904_v40  ;;  %v2747_v6 = vld [vmem:[#allocation2 + $0x38] sm:$0xff] }
 0x34e   : > { %v3012_v46 = vpack.c.bf16 %v3007_v37, %v3006_v1  ;;  %v2684_v33 = vmul.f32 %v7950_v42, %v2671_v32  ;;  %v2727_v1 = vsel %vm7330_vm15, %v8115_v10, 0.0  ;;  %v9517_v42 = vld [vmem:[#allocation23_spill] sm:$0xff] }
 0x34f   : > { %5796 = vmatmul.msk.bf16.gmra.mxu1 %vm9514_vm12, %v2910_v60  ;;  %vm9518_vm0 = vnez %v9517_v42  ;;  %vm9519_vm12 = vmmov %vm9511_vm7 }
 0x350   : > { %5824 = vmatmul.msk.bf16.gmra.mxu2 %vm9511_vm7, %v3012_v46  ;;  %v2696_v25 = vadd.f32 %v7955_v20, %v2684_v33  ;;  %v6481_v46 = vld [vmem:[%s9488_s13 + $0x110] sm:$0xff] }
 0x351   : > { %3558 = vmatpush.bf16.msra.mxu3 %v6481_v46 }
 0x352   : > { %v2704_v58 = vmax.f32 %v2696_v25, 0.0 }
 0x353   : > { %v8131_v44 = vld [vmem:[#allocation2 + $0x40] sm:$0xff] }
 0x354   : > { %v2720_v31 = vld [vmem:[#allocation2 + $0x3f] sm:$0xff]  ;;  %2712 = vst.msk [vmem:[#allocation2 + $0x48] sm:$0xff] %vm9515_vm11, %v2704_v58  ;;  %v2752_v40 = vpack.c.bf16 %v8131_v44, %v2747_v6  ;;  %vm9522_vm11 = vmmov %vm9511_vm7 }
 0x355   : > { %v2728_v60 = vsel %vm9518_vm0, %v2720_v31, 0.0  ;;  %v8145_v33 = vld [vmem:[#allocation2 + $0x39] sm:$0xff] }
 0x356   : > { %v2732_v47 = vpack.c.bf16 %v2728_v60, %v2727_v1  ;;  %5749 = vmatmul.msk.bf16.gmra.mxu3 %vm9519_vm12, %v2752_v40  ;;  %v2906_v50 = vsel %vm9469_vm8, %v8145_v33, 0.0  ;;  %v3008_v1 = vsel %vm7330_vm15, %v2720_v31, 0.0  ;;  %vm9523_vm12 = vmmov %vm9511_vm7 }
 0x358   : > { %5769 = vmatmul.msk.bf16.gmra.mxu0 %vm9511_vm7, %v2732_v47 }
 0x35b   : > { %v8147_v20 = vld [vmem:[#allocation2 + $0x41] sm:$0xff] }
 0x35c   : > { %v3001_v14 = vld [vmem:[#allocation2 + $0x47] sm:$0xff]  ;;  %v2907_v58 = vsel %vm9470_vm13, %v8147_v20, 0.0 }
 0x35d   : > { %v3009_v60 = vsel %vm9518_vm0, %v3001_v14, 0.0  ;;  %v2911_v47 = vpack.c.bf16 %v2907_v58, %v2906_v50  ;;  %v6480_v50 = vld [vmem:[%s9488_s13 + $0x108] sm:$0xff]  ;;  %v3301_v58 = vsel %vm7133_vm4, %v8003_v24, 0.0 }
 0x35e   : > { %v3013_v46 = vpack.c.bf16 %v3009_v60, %v3008_v1  ;;  %3559 = vmatpush.bf16.msra.mxu3 %v6480_v50  ;;  %v3308_v43 = vpack.c.bf16 %v3301_v58, %v3300_v45  ;;  %v3401_v45 = vld [vmem:[#allocation2 + $0x50] sm:$0xff] }
 0x35f   : > { %5797 = vmatmul.msk.bf16.gmra.mxu1 %vm9522_vm11, %v2911_v47  ;;  %vm9524_vm11 = vmmov %vm9511_vm7  ;;  %v3204_v47 = vsel %vm9469_vm8, %v8147_v20, 0.0 }
 0x360   : > { %5825 = vmatmul.msk.bf16.gmra.mxu2 %vm9523_vm12, %v3013_v46  ;;  %vm9525_vm12 = vmmov %vm9511_vm7 }
 0x362   : > { %3560 = vmatpush.bf16.msra.mxu3 %v6479_v23 }
 0x366   : > { %5850 = vmatmul.msk.bf16.vlgmr.msrb.gmra.mxu3 %vm9511_vm7, %v3104_v27  ;;  %v3105_v27 = vpack.c.bf16 %v8071_v12, %v8001_v52  ;;  %v3106_v12 = vpack.c.bf16 %v2747_v6, %v8073_v53  ;;  %v8221_v53 = vld [vmem:[#allocation2 + $0x49] sm:$0xff] }
 0x367   : > { %v3103_v6 = vld [vmem:[#allocation2 + $0x48] sm:$0xff] }
 0x368   : > { %5878 = vmatmul.msk.bf16.vlgmr.msrb.gmra.mxu0 %vm9524_vm11, %v3206_v61  ;;  %v3207_v61 = vpack.c.bf16 %v3201_v21, %v3200_v38  ;;  %vm9526_vm11 = vmmov %vm9511_vm7  ;;  %v3107_v46 = vpack.c.bf16 %v3103_v6, %v8131_v44  ;;  %v3405_v21 = vpack.c.bf16 %v3401_v45, %v3103_v6  ;;  %v3497_v44 = vsel %vm7119_vm2, %v8032_v59, 0.0 }
 0x369   : > { %vm9529_vm4 = vmmov %vm9526_vm11  ;;  %v3499_v59 = vsel %vm7175_vm6, %v8110_v55, 0.0 }
 0x36a   : > { %vm9532_vm14 = vmmov %vm9529_vm4 }
 0x36f   : > { %5906 = vmatmul.msk.bf16.vlgmr.msrb.gmra.mxu1 %vm9525_vm12, %v3308_v43  ;;  %vm9527_vm12 = vmmov %vm9511_vm7 }
 0x370   : > { %5934 = vmatmul.msk.bf16.vlgmr.msrb.gmra.mxu2 %vm9511_vm7, %v8008_v41  ;;  %vm9528_vm7 = vnez %v9426_v30  ;;  %v3203_v41 = vsel %vm9464_vm9, %v8145_v33, 0.0 }
 0x371   : > { %v3302_v52 = vsel %vm9528_vm7, %v8037_v19, 0.0  ;;  %v3208_v1 = vpack.c.bf16 %v3203_v41, %v3202_v0 }
 0x372   : > { %v3309_v24 = vpack.c.bf16 %v3303_v15, %v3302_v52 }
 0x376   : > { %5851 = vmatmul.msk.bf16.gmra.mxu3 %vm9526_vm11, %v3105_v27  ;;  %vm9530_vm11 = vmmov %vm9529_vm4  ;;  %v3496_v27 = vsel %vm7115_vm1, %v8027_v3, 0.0  ;;  %v3498_v3 = vsel %vm7169_vm5, %v8102_v49, 0.0  ;;  %v3501_v49 = vsel %vm9464_vm9, %v8147_v20, 0.0 }
 0x378   : > { %5879 = vmatmul.msk.bf16.gmra.mxu0 %vm9527_vm12, %v3207_v61  ;;  %vm9531_vm12 = vmmov %vm9529_vm4 }
 0x379   : > { %vm9535_vm7 = vmmov %vm9531_vm12 }
 0x37a   : > { %vm9536_vm3 = vmmov %vm9535_vm7 }
 0x37f   : > { %5907 = vmatmul.msk.bf16.gmra.mxu1 %vm9529_vm4, %v3309_v24  ;;  %vm9533_vm4 = vnez %v9509_v17 }
 0x380   : > { %5935 = vmatmul.msk.bf16.gmra.mxu2 %vm9530_vm11, %v8080_v13  ;;  %v3305_v19 = vsel %vm9533_vm4, %v2720_v31, 0.0  ;;  %vm9534_vm11 = vnez %v9507_v29  ;;  %v3205_v31 = vsel %vm9470_vm13, %v8221_v53, 0.0 }
 0x381   : > { %v3304_v13 = vsel %vm9534_vm11, %v8115_v10, 0.0  ;;  %v3209_v50 = vpack.c.bf16 %v3205_v31, %v3204_v47  ;;  %v3299_v10 = vld [vmem:[#allocation2 + $0x4f] sm:$0xff] }
 0x382   : > { %v3310_v60 = vpack.c.bf16 %v3305_v19, %v3304_v13  ;;  %v3307_v58 = vsel %vm9518_vm0, %v3299_v10, 0.0  ;;  %v3505_v13 = vpack.c.bf16 %v3499_v59, %v3498_v3 }
 0x386   : > { %5852 = vmatmul.msk.bf16.gmra.mxu3 %vm9531_vm12, %v3106_v12  ;;  %vm9538_vm12 = vmmov %vm9536_vm3 }
 0x388   : > { %5880 = vmatmul.msk.bf16.gmra.mxu0 %vm9532_vm14, %v3208_v1  ;;  %vm9537_vm14 = vmmov %vm9536_vm3 }
 0x38f   : > { %5908 = vmatmul.msk.bf16.gmra.mxu1 %vm9535_vm7, %v3310_v60  ;;  %vm9539_vm7 = vmmov %vm9536_vm3 }
 0x390   : > { %5936 = vmatmul.msk.bf16.gmra.mxu2 %vm9536_vm3, %v2752_v40  ;;  %v3306_v40 = vsel %vm7330_vm15, %v3001_v14, 0.0  ;;  %v3504_v14 = vpack.c.bf16 %v3497_v44, %v3496_v27 }
 0x391   : > { %v3311_v43 = vpack.c.bf16 %v3307_v58, %v3306_v40  ;;  %v3500_v58 = vsel %vm9465_vm10, %v8145_v33, 0.0  ;;  %v3502_v33 = vsel %vm9469_vm8, %v8221_v53, 0.0  ;;  %v5992_v53 = vld [vmem:[%s9249_s16 + $0x30] sm:$0xf] }
 0x396   : > { %5853 = vmatmul.msk.bf16.gmra.mxu3 %vm9537_vm14, %v3107_v46  ;;  %vm9540_vm14 = vmmov %vm9536_vm3 }
 0x398   : > { %5881 = vmatmul.msk.bf16.gmra.mxu0 %vm9538_vm12, %v3209_v50  ;;  %vm9541_vm12 = vmmov %vm9536_vm3 }
 0x39f   : > { %5909 = vmatmul.msk.bf16.gmra.mxu1 %vm9536_vm3, %v3311_v43  ;;  %v3506_v43 = vpack.c.bf16 %v3501_v49, %v3500_v58  ;;  %v6489_v58 = vld [vmem:[%s9249_s16 + $0x34] sm:$0xf] }
 0x3a0   : > { %5937 = vmatmul.msk.bf16.gmra.mxu2 %vm9539_vm7, %v3405_v21  ;;  %vm9542_vm7 = vmmov %vm9536_vm3 }
 0x3a5   : > { %v2872_v38 = vpop.f32.mrf.mxu0 }
 0x3a6   : > { %5962 = vmatmul.msk.bf16.vlgmr.msra.gmra.mxu3 %vm9540_vm14, %v3504_v14  ;;  %vm9544_vm14 = vmmov %vm9536_vm3 }
 0x3a9   : > { %v2807_v61 = vpop.f32.mrf.mxu3 }
 0x3aa   : > { %v2873_v23 = vadd.f32 %v2872_v38, %v2807_v61 }
 0x3ac   : > { %v2966_v52 = vpop.f32.mrf.mxu1 }
 0x3ad   : > { %v8245_v15 = vpop.f32.mrf.mxu0  ;;  %v2986_v24 = vadd.f32 %v2966_v52, %v2873_v23  ;;  %v3495_v23 = vld [vmem:[#allocation2 + $0x51] sm:$0xff] }
 0x3b1   : > { %v8247_v41 = vpop.f32.mrf.mxu3 }
 0x3b2   : > { %v2875_v32 = vadd.f32 %v8245_v15, %v8247_v41  ;;  %v8360_v15 = vld [vmem:[%s9543_s14] ss:$0 sm:$0xff] }
 0x3b3   : > { %v3068_v12 = vpop.f32.mrf.mxu2 }
 0x3b4   : > { %v3088_v0 = vadd.f32 %v3068_v12, %v2986_v24  ;;  %v8255_v19 = vpop.f32.mrf.mxu1  ;;  %v3503_v24 = vsel %vm9470_vm13, %v3495_v23, 0.0  ;;  %vm9576_vm13 = vmmov %vm9536_vm3 }
 0x3b5   : > { %v2877_v1 = vpop.f32.mrf.mxu0 }
 0x3b6   : > { %5963 = vmatmul.msk.bf16.gmra.mxu3 %vm9541_vm12, %v3505_v13  ;;  %vm9545_vm12 = vmmov %vm9536_vm3 }
 0x3b9   : > { %v2812_v60 = vpop.f32.mrf.mxu3 }
 0x3ba   : > { %v2878_v6 = vadd.f32 %v2877_v1, %v2812_v60  ;;  %v3507_v1 = vpack.c.bf16 %v3503_v24, %v3502_v33  ;;  %v5984_v24 = vld [vmem:[%s9249_s16 + $0x20] sm:$0xf] }
 0x3bb   : > { %v8258_v47 = vpop.f32.mrf.mxu2 }
 0x3bc   : > { %v2971_v46 = vpop.f32.mrf.mxu1 }
 0x3bd   : > { %v8260_v31 = vpop.f32.mrf.mxu0  ;;  %v2988_v55 = vadd.f32 %v2971_v46, %v2878_v6 }
 0x3c1   : > { %v8262_v50 = vpop.f32.mrf.mxu3 }
 0x3c3   : > { %v3073_v10 = vpop.f32.mrf.mxu2 }
 0x3c4   : > { %v3090_v40 = vadd.f32 %v3073_v10, %v2988_v55  ;;  %v8270_v45 = vpop.f32.mrf.mxu1  ;;  %v6490_v10 = vld [vmem:[%s9249_s16 + $0x34] sm:$0xf0] }
 0x3c5   : > { %v2882_v21 = vpop.f32.mrf.mxu0 }
 0x3c6   : > { %5964 = vmatmul.msk.bf16.gmra.mxu3 %vm9536_vm3, %v3506_v43  ;;  %v5993_v43 = vor.u32 %v6490_v10, %v5992_v53  ;;  %v5976_v53 = vld [vmem:[%s9249_s16 + $0x10] sm:$0xf]  ;;  %v6486_v10 = vld [vmem:[%s9249_s16 + $0x14] sm:$0xf0] }
 0x3c8   : > { %3690 = vmatpush.bf16.msra.mxu0 %v5993_v43  ;;  %v5977_v43 = vor.u32 %v6486_v10, %v5976_v53  ;;  %v5970_v53 = vld [vmem:[%s9249_s16 + $0x8] sm:$0xf0] }
 0x3c9   : > { %v2817_v44 = vpop.f32.mrf.mxu3 }
 0x3ca   : > { %v2883_v27 = vadd.f32 %v2882_v21, %v2817_v44  ;;  %v5994_v21 = vld [vmem:[%s9249_s16 + $0x38] sm:$0xf0] }
 0x3cb   : > { %v8273_v38 = vpop.f32.mrf.mxu2  ;;  %v5997_v44 = vor.u32 %v6489_v58, %v5994_v21  ;;  %v6485_v58 = vld [vmem:[%s9249_s16 + $0x14] sm:$0xf]  ;;  %v5978_v21 = vld [vmem:[%s9249_s16 + $0x18] sm:$0xf0] }
 0x3cc   : > { %v2976_v14 = vpop.f32.mrf.mxu1 }
 0x3cd   : > { %v2990_v61 = vadd.f32 %v2976_v14, %v2883_v27  ;;  %v8275_v20 = vpop.f32.mrf.mxu0  ;;  %3719 = vmatpush.bf16.msra.mxu1 %v5997_v44  ;;  %v5981_v44 = vor.u32 %v6485_v58, %v5978_v21 }
 0x3d1   : > { %v8277_v52 = vpop.f32.mrf.mxu3 }
 0x3d3   : > { %v3078_v59 = vpop.f32.mrf.mxu2 }
 0x3d4   : > { %v3092_v12 = vadd.f32 %v3078_v59, %v2990_v61  ;;  %v8284_v3 = vpop.f32.mrf.mxu1  ;;  %v6488_v59 = vld [vmem:[%s9249_s16 + $0x24] sm:$0xf0] }
 0x3d5   : > { %v2887_v13 = vpop.f32.mrf.mxu0 }
 0x3d6   : > { %5965 = vmatmul.msk.bf16.gmra.mxu3 %vm9542_vm7, %v3507_v1  ;;  %v6487_v1 = vld [vmem:[%s9249_s16 + $0x24] sm:$0xf]  ;;  %vm9546_vm7 = vmmov %vm9536_vm3 }
 0x3d9   : > { %v2822_v60 = vpop.f32.mrf.mxu3 }
 0x3da   : > { %v2888_v6 = vadd.f32 %v2887_v13, %v2822_v60  ;;  %v5985_v13 = vor.u32 %v6488_v59, %v5984_v24  ;;  %v5986_v60 = vld [vmem:[%s9249_s16 + $0x28] sm:$0xf0] }
 0x3db   : > { %v8287_v46 = vpop.f32.mrf.mxu2 }
 0x3dc   : > { %v2981_v55 = vpop.f32.mrf.mxu1  ;;  %3691 = vmatpush.bf16.msra.mxu0 %v5985_v13  ;;  %v5968_v13 = vld [vmem:[%s9249_s16] sm:$0xf] }
 0x3dd   : > { %v2992_v49 = vadd.f32 %v2981_v55, %v2888_v6  ;;  %v5989_v6 = vor.u32 %v6487_v1, %v5986_v60  ;;  %v6484_v60 = vld [vmem:[%s9249_s16 + $0x4] sm:$0xf0] }
 0x3df   : > { %3720 = vmatpush.bf16.msra.mxu1 %v5989_v6  ;;  %v6483_v6 = vld [vmem:[%s9249_s16 + $0x4] sm:$0xf] }
 0x3e0   : > { %3692 = vmatpush.bf16.msra.mxu0 %v5977_v43  ;;  %v5973_v10 = vor.u32 %v6483_v6, %v5970_v53 }
 0x3e1   : > { %v8301_v27 = vpop.f32.mrf.mxu3 }
 0x3e3   : > { %v3083_v14 = vpop.f32.mrf.mxu2  ;;  %3721 = vmatpush.bf16.msra.mxu1 %v5981_v44 }
 0x3e4   : > { %v3094_v61 = vadd.f32 %v3083_v14, %v2992_v49  ;;  %v8331_v59 = vpop.f32.mrf.mxu1 }
 0x3e7   : > { %3722 = vmatpush.bf16.msra.mxu1 %v5973_v10 }
 0x3e9   : > { %v3162_v23 = vpop.f32.mrf.mxu3 }
 0x3ea   : > { %v3182_v33 = vadd.f32 %v3162_v23, %v3088_v0 }
 0x3eb   : > { %v8333_v1 = vpop.f32.mrf.mxu2 }
 0x3ec   : > { %v3366_v43 = vpop.f32.mrf.mxu1 }
 0x3f1   : > { %v3164_v55 = vpop.f32.mrf.mxu3 }
 0x3f3   : > { %v3460_v21 = vpop.f32.mrf.mxu2 }
 0x3f4   : > { %v3368_v42 = vpop.f32.mrf.mxu1 }
 0x3f9   : > { %v3167_v0 = vpop.f32.mrf.mxu3 }
 0x3fa   : > { %v3184_v49 = vadd.f32 %v3167_v0, %v3090_v40  ;;  %v8327_v40 = vpop.f32.mrf.mxu0 }
 0x3fb   : > { %v3462_v37 = vpop.f32.mrf.mxu2 }
 0x3fc   : > { %v3371_v11 = vpop.f32.mrf.mxu1 }
 0x401   : > { %v3169_v14 = vpop.f32.mrf.mxu3 }
 0x402   : > { %v3264_v58 = vpop.f32.mrf.mxu0 }
 0x403   : > { %v3284_v53 = vadd.f32 %v3264_v58, %v3182_v33  ;;  %v3465_v29 = vpop.f32.mrf.mxu2  ;;  %v8368_v33 = vld [vmem:[%s9248_s15] ss:$0 sm:$0xff] }
 0x404   : > { %v3373_v58 = vpop.f32.mrf.mxu1 }
 0x405   : > { %v3386_v39 = vadd.f32 %v3366_v43, %v3284_v53 }
 0x409   : > { %v3172_v23 = vpop.f32.mrf.mxu3 }
 0x40a   : > { %v8329_v24 = vadd.f32 %v3172_v23, %v3092_v12  ;;  %v5969_v12 = vor.u32 %v6484_v60, %v5968_v13  ;;  %v3266_v25 = vpop.f32.mrf.mxu0  ;;  %v2987_v60 = vadd.f32 %v8255_v19, %v2875_v32  ;;  %v2880_v32 = vadd.f32 %v8260_v31, %v8262_v50 }
 0x40c   : > { %3693 = vmatpush.bf16.msra.mxu0 %v5969_v12  ;;  %v3089_v6 = vadd.f32 %v8258_v47, %v2987_v60 }
 0x40e   : > { %v3183_v12 = vadd.f32 %v3164_v55, %v3089_v6 }
 0x411   : > { %v8344_v0 = vpop.f32.mrf.mxu3 }
 0x412   : > { %v3269_v10 = vpop.f32.mrf.mxu0 }
 0x419   : > { %v3177_v44 = vpop.f32.mrf.mxu3 }
 0x41a   : > { %v8349_v23 = vadd.f32 %v3177_v44, %v3094_v61  ;;  %v3480_v61 = vadd.f32 %v3460_v21, %v3386_v39  ;;  %v3285_v44 = vadd.f32 %v3266_v25, %v3183_v12  ;;  %v3271_v39 = vpop.f32.mrf.mxu0  ;;  %v3286_v21 = vadd.f32 %v3269_v10, %v3184_v49 }
 0x41b   : > { %v2885_v49 = vadd.f32 %v8275_v20, %v8277_v52 }
 0x41c   : > { %v3387_v41 = vadd.f32 %v3368_v42, %v3285_v44  ;;  %v3467_v42 = vpop.f32.mrf.mxu2  ;;  %v3388_v60 = vadd.f32 %v3371_v11, %v3286_v21 }
 0x41e   : > { %v3481_v19 = vadd.f32 %v3462_v37, %v3387_v41 }
 0x421   : > { %v8353_v13 = vpop.f32.mrf.mxu3 }
 0x424   : > { %v3470_v10 = vpop.f32.mrf.mxu2 }
 0x429   : > { %v3562_v17 = vpop.f32.mrf.mxu3 }
 0x42a   : > { %v3582_v34 = vadd.f32 %v3562_v17, %v3480_v61  ;;  %v2989_v17 = vadd.f32 %v8270_v45, %v2880_v32  ;;  %v3482_v61 = vadd.f32 %v3465_v29, %v3388_v60  ;;  %v3274_v32 = vpop.f32.mrf.mxu0  ;;  %v2991_v29 = vadd.f32 %v8284_v3, %v2885_v49 }
 0x42c   : > { %v3594_v47 = vmul.f32 %v8360_v15, %v3582_v34  ;;  %v3091_v43 = vadd.f32 %v8273_v38, %v2989_v17  ;;  %v3376_v38 = vpop.f32.mrf.mxu1  ;;  %v3288_v17 = vadd.f32 %v3274_v32, %v8329_v24  ;;  %v6498_v24 = vld [vmem:[%s9252_s19 + $0x38] sm:$0xff] }
 0x42d   : > { %3956 = vmatpush.bf16.msra.mxu2 %v6498_v24 }
 0x42e   : > { %v3606_v31 = vadd.f32 %v8368_v33, %v3594_v47  ;;  %v3185_v34 = vadd.f32 %v3169_v14, %v3091_v43 }
 0x430   : > { %v3614_v6 = vmax.f32 %v3606_v31, 0.0  ;;  %v3287_v44 = vadd.f32 %v3271_v39, %v3185_v34  ;;  %v3390_v31 = vadd.f32 %v3376_v38, %v3288_v17  ;;  %v3472_v34 = vpop.f32.mrf.mxu2  ;;  %v6495_v17 = vld [vmem:[%s9252_s19 + $0x20] sm:$0xff] }
 0x431   : > { %v3564_v25 = vpop.f32.mrf.mxu3 }
 0x432   : > { %v3583_v55 = vadd.f32 %v3564_v25, %v3481_v19  ;;  %v3389_v14 = vadd.f32 %v3373_v58, %v3287_v44  ;;  %v3093_v25 = vadd.f32 %v8287_v46, %v2991_v29  ;;  %v3276_v21 = vpop.f32.mrf.mxu0  ;;  %v6505_v44 = vld [vmem:[%s9252_s19 + $0x70] sm:$0xff] }
 0x434   : > { %v3595_v37 = vmul.f32 %v8360_v15, %v3583_v55  ;;  %v3483_v19 = vadd.f32 %v3467_v42, %v3389_v14  ;;  %v3187_v20 = vadd.f32 %v8344_v0, %v3093_v25  ;;  %v3378_v58 = vpop.f32.mrf.mxu1  ;;  %v6506_v0 = vld [vmem:[%s9252_s19 + $0x78] sm:$0xff] }
 0x435   : > { %3985 = vmatpush.bf16.msrb.mxu3 %v6506_v0 }
 0x436   : > { %v3607_v50 = vadd.f32 %v8368_v33, %v3595_v37  ;;  %v3289_v60 = vadd.f32 %v3276_v21, %v3187_v20 }
 0x438   : > { %v3615_v53 = vmax.f32 %v3607_v50, 0.0  ;;  %v3484_v50 = vadd.f32 %v3470_v10, %v3390_v31  ;;  %v6504_v10 = vld [vmem:[%s9252_s19 + $0x68] sm:$0xff]  ;;  %v6494_v31 = vld [vmem:[%s9252_s19 + $0x18] sm:$0xff] }
 0x439   : > { %v3567_v12 = vpop.f32.mrf.mxu3  ;;  %3986 = vmatpush.bf16.msrb.mxu3 %v6505_v44 }
 0x43a   : > { %v3622_v45 = vpack.c.bf16 %v3615_v53, %v3614_v6  ;;  %v3584_v41 = vadd.f32 %v3567_v12, %v3482_v61  ;;  %v2890_v53 = vadd.f32 %v8327_v40, %v8301_v27  ;;  %v3391_v12 = vadd.f32 %v3378_v58, %v3289_v60  ;;  %v6497_v61 = vld [vmem:[%s9252_s19 + $0x30] sm:$0xff]  ;;  %v6496_v40 = vld [vmem:[%s9252_s19 + $0x28] sm:$0xff] }
 0x43b   : > { %3957 = vmatpush.bf16.msra.mxu2 %v6497_v61  ;;  %v6493_v60 = vld [vmem:[%s9252_s19 + $0x10] sm:$0xff] }
 0x43c   : > { %5998 = vmatmul.msk.bf16.vlgmr.msra.gmra.mxu0 %vm9544_vm14, %v3622_v45  ;;  %6002 = vmatmul.msk.bf16.vlgmr.msra.gmra.mxu1 %vm9545_vm12, %v3622_v45  ;;  %v3596_v11 = vmul.f32 %v8360_v15, %v3584_v41  ;;  %v3279_v45 = vpop.f32.mrf.mxu0  ;;  %v3485_v32 = vadd.f32 %v3472_v34, %v3391_v12  ;;  %v3381_v38 = vpop.f32.mrf.mxu1  ;;  %v2993_v14 = vadd.f32 %v8331_v59, %v2890_v53  ;;  %vm9547_vm14 = vmmov %vm9536_vm3 }
 0x43d   : > { %3987 = vmatpush.bf16.msrb.mxu3 %v6504_v10  ;;  %vm9548_vm12 = vmmov %vm9536_vm3 }
 0x43e   : > { %v3608_v55 = vadd.f32 %v8368_v33, %v3596_v11  ;;  %v3095_v11 = vadd.f32 %v8333_v1, %v2993_v14  ;;  %v6503_v1 = vld [vmem:[%s9252_s19 + $0x60] sm:$0xff] }
 0x43f   : > { %3958 = vmatpush.bf16.msra.mxu2 %v6496_v40  ;;  %v3744_v14 = vld [vmem:[%s9250_s17] sm:$0x3] }
 0x440   : > { %v3616_v37 = vmax.f32 %v3608_v55, 0.0  ;;  %v8460_v40 = vperm.slane %v3744_v14, 1 }
 0x441   : > { %v3569_v47 = vpop.f32.mrf.mxu3  ;;  %3988 = vmatpush.bf16.msrb.mxu3 %v6503_v1 }
 0x442   : > { %v3585_v39 = vadd.f32 %v3569_v47, %v3483_v19  ;;  %v3475_v19 = vpop.f32.mrf.mxu2  ;;  %v3290_v47 = vadd.f32 %v3279_v45, %v8349_v23 }
 0x443   : > { %3959 = vmatpush.bf16.msra.mxu2 %v6495_v17 }
 0x444   : > { %v3597_v43 = vmul.f32 %v8360_v15, %v3585_v39  ;;  %v3189_v39 = vadd.f32 %v8353_v13, %v3095_v11  ;;  %v3392_v55 = vadd.f32 %v3381_v38, %v3290_v47  ;;  %v3281_v21 = vpop.f32.mrf.mxu0  ;;  %v6492_v38 = vld [vmem:[%s9252_s19 + $0x8] sm:$0xff] }
 0x446   : > { %v3609_v52 = vadd.f32 %v8368_v33, %v3597_v43  ;;  %v3291_v58 = vadd.f32 %v3281_v21, %v3189_v39  ;;  %v9550_v21 = vmax.f32 %v7761_v16, 0.0 }
 0x447   : > { %3960 = vmatpush.bf16.msra.mxu2 %v6494_v31 }
 0x448   : > { %v3617_v42 = vmax.f32 %v3609_v52, 0.0  ;;  %v3486_v52 = vadd.f32 %v3475_v19, %v3392_v55  ;;  %v3766_v19 = vld [vmem:[%s9251_s18] sm:$0x3] }
 0x449   : > { %v3572_v3 = vpop.f32.mrf.mxu3  ;;  %v8469_v39 = vperm.slane %v3766_v19, 1 }
 0x44a   : > { %v3623_v46 = vpack.c.bf16 %v3617_v42, %v3616_v37  ;;  %v3586_v6 = vadd.f32 %v3572_v3, %v3484_v50  ;;  %v6502_v37 = vld [vmem:[%s9252_s19 + $0x58] sm:$0xff]  ;;  %v3383_v42 = vpop.f32.mrf.mxu1  ;;  %v3477_v3 = vpop.f32.mrf.mxu2 }
 0x44b   : > { %v3393_v50 = vadd.f32 %v3383_v42, %v3291_v58  ;;  %3989 = vmatpush.bf16.msrb.mxu3 %v6502_v37  ;;  %3961 = vmatpush.bf16.msra.mxu2 %v6493_v60  ;;  %v9552_v37 = vmax.f32 %v7768_v5, 0.0 }
 0x44c   : > { %5999 = vmatmul.msk.bf16.gmra.mxu0 %vm9536_vm3, %v3623_v46  ;;  %6003 = vmatmul.msk.bf16.gmra.mxu1 %vm9546_vm7, %v3623_v46  ;;  %v3598_v41 = vmul.f32 %v8360_v15, %v3586_v6  ;;  %v6501_v46 = vld [vmem:[%s9252_s19 + $0x50] sm:$0xff]  ;;  %vm9549_vm7 = vmmov %vm9536_vm3 }
 0x44d   : > { %v3487_v6 = vadd.f32 %v3477_v3, %v3393_v50 }
 0x44e   : > { %v3610_v29 = vadd.f32 %v8368_v33, %v3598_v41 }
 0x44f   : > { %3990 = vmatpush.bf16.msrb.mxu3 %v6501_v46  ;;  %3962 = vmatpush.bf16.msra.mxu2 %v6492_v38 }
 0x450   : > { %v3618_v23 = vmax.f32 %v3610_v29, 0.0  ;;  %v8466_v29 = vperm.slane %v3766_v19, 0 }
 0x451   : > { %v3574_v49 = vpop.f32.mrf.mxu3 }
 0x452   : > { %v3587_v27 = vadd.f32 %v3574_v49, %v3485_v32  ;;  %v6500_v49 = vld [vmem:[%s9252_s19 + $0x48] sm:$0xff] }
 0x453   : > { %3991 = vmatpush.bf16.msrb.mxu3 %v6500_v49  ;;  %v9555_v49 = vmax.f32 %v7788_v51, 0.0 }
 0x454   : > { %v3599_v59 = vmul.f32 %v8360_v15, %v3587_v27  ;;  %v8458_v27 = vperm.slane %v3744_v14, 0 }
 0x456   : > { %v3611_v25 = vadd.f32 %v8368_v33, %v3599_v59 }
 0x458   : > { %v3619_v43 = vmax.f32 %v3611_v25, 0.0 }
 0x459   : > { %v3577_v20 = vpop.f32.mrf.mxu3 }
 0x45a   : > { %v3624_v13 = vpack.c.bf16 %v3619_v43, %v3618_v23  ;;  %v3588_v34 = vadd.f32 %v3577_v20, %v3486_v52  ;;  %v9551_v52 = vmax.f32 %v7748_v9, 0.0 }
 0x45c   : > { %6000 = vmatmul.msk.bf16.gmra.mxu0 %vm9547_vm14, %v3624_v13  ;;  %6004 = vmatmul.msk.bf16.gmra.mxu1 %vm9548_vm12, %v3624_v13  ;;  %v3600_v24 = vmul.f32 %v8360_v15, %v3588_v34  ;;  %v9553_v34 = vmax.f32 %v7754_v62, 0.0  ;;  %vm9572_vm14 = vmmov %vm9536_vm3  ;;  %vm9573_vm12 = vnez %v9416_v57 }
 0x45e   : > { %v3612_v12 = vadd.f32 %v8368_v33, %v3600_v24 }
 0x460   : > { %v3620_v45 = vmax.f32 %v3612_v12, 0.0 }
 0x461   : > { %v3579_v0 = vpop.f32.mrf.mxu3 }
 0x462   : > { %v3589_v53 = vadd.f32 %v3579_v0, %v3487_v6 }
 0x464   : > { %v3601_v61 = vmul.f32 %v8360_v15, %v3589_v53  ;;  %v6491_v15 = vld [vmem:[%s9252_s19] sm:$0xff] }
 0x465   : > { %3963 = vmatpush.bf16.msra.mxu2 %v6491_v15 }
 0x466   : > { %v3613_v44 = vadd.f32 %v8368_v33, %v3601_v61  ;;  %v6499_v33 = vld [vmem:[%s9252_s19 + $0x40] sm:$0xff] }
 0x467   : > { %3992 = vmatpush.bf16.msrb.mxu3 %v6499_v33 }
 0x468   : > { %v3621_v32 = vmax.f32 %v3613_v44, 0.0 }
 0x46a   : > { %v3625_v41 = vpack.c.bf16 %v3621_v32, %v3620_v45 }
 0x46c   : > { %6001 = vmatmul.msk.bf16.gmra.mxu0 %vm9536_vm3, %v3625_v41  ;;  %6005 = vmatmul.msk.bf16.gmra.mxu1 %vm9549_vm7, %v3625_v41  ;;  %v9554_v41 = vmax.f32 %v7801_v2, 0.0  ;;  %vm9574_vm7 = vnez %v9418_v63 }
 0x4b9   : > { %v3695_v10 = vpop.f32.mrf.mxu0  ;;  %v3724_v11 = vpop.f32.mrf.mxu1 }
 0x4ba   : > { %v3750_v47 = vmul.f32 %v8458_v27, %v3695_v10  ;;  %v3751_v59 = vmul.f32 %v8460_v40, %v3724_v11  ;;  %v9556_v10 = vmax.f32 %v7808_v8, 0.0  ;;  %v9557_v11 = vmax.f32 %v7794_v22, 0.0 }
 0x4bc   : > { %v3772_v25 = vadd.f32 %v8466_v29, %v3750_v47  ;;  %v3773_v17 = vadd.f32 %v8469_v39, %v3751_v59 }
 0x4be   : > { %v8477_v20 = vadd.f32 %v3772_v25, %v9550_v21  ;;  %v8481_v58 = vadd.f32 %v3773_v17, %v9551_v52  ;;  %v6513_v21 = vld [vmem:[%s9255_s22 + $0x30] sm:$0xff] }
 0x4c0   : > { %v9371_v16 = vmax.f32 %v8477_v20, 0.0  ;;  %v9365_v50 = vmax.f32 %v8481_v58, 0.0 }
 0x4c1   : > { %v3697_v1 = vpop.f32.mrf.mxu0  ;;  %v3726_v55 = vpop.f32.mrf.mxu1 }
 0x4c2   : > { %v3752_v23 = vmul.f32 %v8458_v27, %v3697_v1  ;;  %v3753_v43 = vmul.f32 %v8460_v40, %v3726_v55 }
 0x4c4   : > { %v3774_v13 = vadd.f32 %v8466_v29, %v3752_v23  ;;  %v3775_v31 = vadd.f32 %v8469_v39, %v3753_v43  ;;  %v6514_v43 = vld [vmem:[%s9255_s22 + $0x38] sm:$0xff] }
 0x4c5   : > { %4143 = vmatpush.bf16.msrb.mxu0 %v6514_v43  ;;  %v9563_v43 = vmax.f32 %v7890_v7, 0.0 }
 0x4c6   : > { %v8487_v42 = vadd.f32 %v3774_v13, %v9552_v37  ;;  %v8491_v3 = vadd.f32 %v3775_v31, %v9553_v34 }
 0x4c8   : > { %v9372_v9 = vmax.f32 %v8487_v42, 0.0  ;;  %v9367_v60 = vmax.f32 %v8491_v3, 0.0 }
 0x4c9   : > { %v3700_v46 = vpop.f32.mrf.mxu0  ;;  %v3729_v6 = vpop.f32.mrf.mxu1  ;;  %4144 = vmatpush.bf16.msrb.mxu0 %v6513_v21 }
 0x4ca   : > { %v3820_v5 = vpack.c.bf16 %v9372_v9, %v9371_v16  ;;  %v3821_v62 = vpack.c.bf16 %v9367_v60, %v9365_v50  ;;  %v3754_v24 = vmul.f32 %v8458_v27, %v3700_v46  ;;  %v3755_v0 = vmul.f32 %v8460_v40, %v3729_v6  ;;  %v6512_v6 = vld [vmem:[%s9255_s22 + $0x28] sm:$0xff]  ;;  %v9597_v16 = vld [vmem:[#allocation21_spill] sm:$0xff] }
 0x4cc   : > { %3964 = vmatmul.bf16.vlgmr.msra.gmra.mxu2 %v3820_v5  ;;  %3993 = vmatmul.bf16.vlgmr.msrb.gmra.mxu3 %v3821_v62  ;;  %v3776_v53 = vadd.f32 %v8466_v29, %v3754_v24  ;;  %v3777_v12 = vadd.f32 %v8469_v39, %v3755_v0  ;;  %v9558_v5 = vmax.f32 %v7850_v48, 0.0  ;;  %v9559_v24 = vmax.f32 %v7831_v28, 0.0 }
 0x4cd   : > { %4145 = vmatpush.bf16.msrb.mxu0 %v6512_v6 }
 0x4ce   : > { %v8513_v38 = vadd.f32 %v3776_v53, %v9554_v41  ;;  %v8517_v15 = vadd.f32 %v3777_v12, %v9555_v49 }
 0x4d0   : > { %v9370_v2 = vmax.f32 %v8513_v38, 0.0  ;;  %v9364_v59 = vmax.f32 %v8517_v15, 0.0 }
 0x4d1   : > { %v3702_v61 = vpop.f32.mrf.mxu0  ;;  %v3731_v44 = vpop.f32.mrf.mxu1 }
 0x4d2   : > { %v3756_v45 = vmul.f32 %v8458_v27, %v3702_v61  ;;  %v3757_v32 = vmul.f32 %v8460_v40, %v3731_v44  ;;  %v9560_v61 = vmax.f32 %v7857_v35, 0.0 }
 0x4d4   : > { %v3778_v33 = vadd.f32 %v8466_v29, %v3756_v45  ;;  %v3779_v14 = vadd.f32 %v8469_v39, %v3757_v32  ;;  %v9561_v45 = vmax.f32 %v7840_v36, 0.0 }
 0x4d6   : > { %v8523_v19 = vadd.f32 %v3778_v33, %v9556_v10  ;;  %v8527_v47 = vadd.f32 %v3779_v14, %v9557_v11 }
 0x4d8   : > { %v9368_v51 = vmax.f32 %v8523_v19, 0.0  ;;  %v9362_v25 = vmax.f32 %v8527_v47, 0.0 }
 0x4d9   : > { %v3705_v17 = vpop.f32.mrf.mxu0  ;;  %v3734_v1 = vpop.f32.mrf.mxu1 }
 0x4da   : > { %v3822_v8 = vpack.c.bf16 %v9368_v51, %v9370_v2  ;;  %v3823_v22 = vpack.c.bf16 %v9362_v25, %v9364_v59  ;;  %v3758_v55 = vmul.f32 %v8458_v27, %v3705_v17  ;;  %v3759_v23 = vmul.f32 %v8460_v40, %v3734_v1 }
 0x4dc   : > { %3969 = vmatmul.bf16.gmra.mxu2 %v3822_v8  ;;  %3998 = vmatmul.bf16.gmra.mxu3 %v3823_v22  ;;  %v3780_v52 = vadd.f32 %v8466_v29, %v3758_v55  ;;  %v3781_v13 = vadd.f32 %v8469_v39, %v3759_v23 }
 0x4de   : > { %v8558_v62 = vadd.f32 %v3780_v52, %v9558_v5  ;;  %v8562_v0 = vadd.f32 %v3781_v13, %v9559_v24  ;;  %v9564_v52 = vmax.f32 %v7877_v18, 0.0  ;;  %v9569_v5 = vld [vmem:[#allocation24_spill] sm:$0xff] }
 0x4e0   : > { %v9366_v48 = vmax.f32 %v8558_v62, 0.0  ;;  %v9360_v41 = vmax.f32 %v8562_v0, 0.0 }
 0x4e1   : > { %v3707_v31 = vpop.f32.mrf.mxu0  ;;  %v3736_v37 = vpop.f32.mrf.mxu1 }
 0x4e2   : > { %v3760_v34 = vmul.f32 %v8458_v27, %v3707_v31  ;;  %v3761_v46 = vmul.f32 %v8460_v40, %v3736_v37 }
 0x4e4   : > { %v3782_v53 = vadd.f32 %v8466_v29, %v3760_v34  ;;  %v3783_v12 = vadd.f32 %v8469_v39, %v3761_v46  ;;  %v9566_v34 = vld [vmem:[#allocation25_spill] sm:$0xff] }
 0x4e5   : > { %v9567_v46 = vmax.f32 %v9566_v34, 0.0 }
 0x4e6   : > { %v8568_v44 = vadd.f32 %v3782_v53, %v9560_v61  ;;  %v8572_v32 = vadd.f32 %v3783_v12, %v9561_v45  ;;  %v6510_v12 = vld [vmem:[%s9255_s22 + $0x18] sm:$0xff]  ;;  %v6511_v61 = vld [vmem:[%s9255_s22 + $0x20] sm:$0xff]  ;;  %v6509_v45 = vld [vmem:[%s9255_s22 + $0x10] sm:$0xff] }
 0x4e7   : > { %4208 = vmatpush.bf16.msrb.mxu1 %v6510_v12  ;;  %4146 = vmatpush.bf16.msrb.mxu0 %v6511_v61  ;;  %v6525_v12 = vld [vmem:[%s9255_s22 + $0x90] sm:$0xff] }
 0x4e8   : > { %9562 = vst [vmem:[#allocation15_spill] sm:$0xff] %v8572_v32  ;;  %v9363_v28 = vmax.f32 %v8568_v44, 0.0  ;;  %v9359_v49 = vmax.f32 %v8572_v32, 0.0 }
 0x4e9   : > { %v3710_v33 = vpop.f32.mrf.mxu0  ;;  %v3739_v14 = vpop.f32.mrf.mxu1 }
 0x4ea   : > { %v3824_v35 = vpack.c.bf16 %v9363_v28, %v9366_v48  ;;  %v3825_v36 = vpack.c.bf16 %v9359_v49, %v9360_v41  ;;  %v3762_v10 = vmul.f32 %v8458_v27, %v3710_v33  ;;  %v3763_v11 = vmul.f32 %v8460_v40, %v3739_v14  ;;  %v6518_v33 = vld [vmem:[%s9255_s22 + $0x58] sm:$0xff] }
 0x4eb   : > { %4209 = vmatpush.bf16.msrb.mxu1 %v6509_v45  ;;  %v6522_v14 = vld [vmem:[%s9255_s22 + $0x78] sm:$0xff]  ;;  %4302 = vmatpush.bf16.msrb.mxu2 %v6518_v33  ;;  %v4054_v45 = vld [vmem:[#allocation2 + $0x7] sm:$0xff] }
 0x4ec   : > { %3974 = vmatmul.bf16.gmra.mxu2 %v3824_v35  ;;  %4003 = vmatmul.bf16.gmra.mxu3 %v3825_v36  ;;  %v3784_v17 = vadd.f32 %v8466_v29, %v3762_v10  ;;  %v3785_v1 = vadd.f32 %v8469_v39, %v3763_v11  ;;  %v6508_v35 = vld [vmem:[%s9255_s22 + $0x8] sm:$0xff]  ;;  %v6507_v36 = vld [vmem:[%s9255_s22] sm:$0xff]  ;;  %v6517_v10 = vld [vmem:[%s9255_s22 + $0x50] sm:$0xff] }
 0x4ed   : > { %4404 = vmatpush.bf16.msra.mxu3 %v6522_v14  ;;  %v6521_v11 = vld [vmem:[%s9255_s22 + $0x70] sm:$0xff]  ;;  %v4082_v14 = vld [vmem:[#allocation2 + $0x8] sm:$0xff] }
 0x4ee   : > { %v8594_v21 = vadd.f32 %v3784_v17, %v9563_v43  ;;  %v8598_v13 = vadd.f32 %v3785_v1, %v9564_v52  ;;  %v6516_v17 = vld [vmem:[%s9255_s22 + $0x48] sm:$0xff] }
 0x4ef   : > { %4210 = vmatpush.bf16.msrb.mxu1 %v6508_v35  ;;  %4303 = vmatpush.bf16.msrb.mxu2 %v6517_v10  ;;  %v6520_v1 = vld [vmem:[%s9255_s22 + $0x68] sm:$0xff] }
 0x4f0   : > { %9565 = vst [vmem:[#allocation13_spill] sm:$0xff] %v8598_v13  ;;  %v9361_v7 = vmax.f32 %v8594_v21, 0.0 }
 0x4f1   : > { %v3712_v8 = vpop.f32.mrf.mxu0  ;;  %v3741_v22 = vpop.f32.mrf.mxu1  ;;  %4405 = vmatpush.bf16.msra.mxu3 %v6521_v11 }
 0x4f2   : > { %v3764_v55 = vmul.f32 %v8458_v27, %v3712_v8  ;;  %v3765_v23 = vmul.f32 %v8460_v40, %v3741_v22  ;;  %v9570_v27 = vmax.f32 %v9569_v5, 0.0  ;;  %v9358_v40 = vmax.f32 %v8598_v13, 0.0  ;;  %v6526_v8 = vld [vmem:[%s9255_s22 + $0x98] sm:$0xff]  ;;  %v6515_v22 = vld [vmem:[%s9255_s22 + $0x40] sm:$0xff] }
 0x4f3   : > { %4211 = vmatpush.bf16.msrb.mxu1 %v6507_v36  ;;  %4304 = vmatpush.bf16.msrb.mxu2 %v6516_v17  ;;  %v4062_v36 = vsel %vm9573_vm12, %v4054_v45, 0.0 }
 0x4f4   : > { %v3786_v31 = vadd.f32 %v8466_v29, %v3764_v55  ;;  %v3787_v37 = vadd.f32 %v8469_v39, %v3765_v23  ;;  %v6519_v55 = vld [vmem:[%s9255_s22 + $0x60] sm:$0xff]  ;;  %4498 = vmatpush.bf16.msra.mxu0 %v6526_v8 }
 0x4f5   : > { %4406 = vmatpush.bf16.msra.mxu3 %v6520_v1  ;;  %v8667_v23 = vld [vmem:[%s9253_s20] ss:$0 sm:$0xff] }
 0x4f6   : > { %v8604_v6 = vadd.f32 %v3786_v31, %v9567_v46  ;;  %v8608_v24 = vadd.f32 %v3787_v37, %v9570_v27  ;;  %v8672_v37 = vld [vmem:[%s9254_s21] ss:$0 sm:$0xff] }
 0x4f7   : > { %4305 = vmatpush.bf16.msrb.mxu2 %v6515_v22 }
 0x4f8   : > { %9568 = vst [vmem:[#allocation25_spill] sm:$0xff] %v8604_v6  ;;  %v9357_v18 = vmax.f32 %v8604_v6, 0.0  ;;  %v9356_v53 = vmax.f32 %v8608_v24, 0.0  ;;  %4499 = vmatpush.bf16.msra.mxu0 %v6525_v12 }
 0x4f9   : > { %9571 = vst [vmem:[#allocation24_spill] sm:$0xff] %v8608_v24  ;;  %4407 = vmatpush.bf16.msra.mxu3 %v6519_v55 }
 0x4fa   : > { %v3826_v29 = vpack.c.bf16 %v9357_v18, %v9361_v7  ;;  %v3827_v39 = vpack.c.bf16 %v9356_v53, %v9358_v40  ;;  %v9585_v18 = vld [vmem:[#allocation18_spill] sm:$0xff] }
 0x4fc   : > { %3979 = vmatmul.bf16.gmra.mxu2 %v3826_v29  ;;  %4008 = vmatmul.bf16.gmra.mxu3 %v3827_v39 }
 0x54f   : > { %v3965_v43 = vpop.f32.mrf.mxu2  ;;  %v3994_v52 = vpop.f32.mrf.mxu3 }
 0x550   : > { %v3995_v31 = vadd.f32 %v3994_v52, %v3965_v43 }
 0x552   : > { %v4018_v34 = vmul.f32 %v8667_v23, %v3995_v31 }
 0x554   : > { %v4030_v46 = vadd.f32 %v8672_v37, %v4018_v34 }
 0x556   : > { %v4038_v5 = vmax.f32 %v4030_v46, 0.0 }
 0x557   : > { %v3967_v27 = vpop.f32.mrf.mxu2  ;;  %v3996_v29 = vpop.f32.mrf.mxu3 }
 0x558   : > { %4046 = vst.msk [vmem:[#allocation2 + $0x10] sm:$0xff] %vm9572_vm14, %v4038_v5  ;;  %v3997_v39 = vadd.f32 %v3996_v29, %v3967_v27  ;;  %vm9575_vm14 = vmmov %vm9536_vm3 }
 0x55a   : > { %v4019_v61 = vmul.f32 %v8667_v23, %v3997_v39 }
 0x55c   : > { %v4031_v33 = vadd.f32 %v8672_v37, %v4019_v61 }
 0x55e   : > { %v4039_v35 = vmax.f32 %v4031_v33, 0.0 }
 0x55f   : > { %v3970_v10 = vpop.f32.mrf.mxu2  ;;  %v3999_v11 = vpop.f32.mrf.mxu3  ;;  %v8684_v17 = vld [vmem:[#allocation2 + $0x10] sm:$0xff] }
 0x560   : > { %v4055_v1 = vld [vmem:[#allocation2 + $0xf] sm:$0xff]  ;;  %4047 = vst.msk [vmem:[#allocation2 + $0x18] sm:$0xff] %vm9536_vm3, %v4039_v35  ;;  %v4000_v8 = vadd.f32 %v3999_v11, %v3970_v10  ;;  %v4090_v22 = vpack.c.bf16 %v8684_v17, %v4082_v14 }
 0x561   : > { %v4063_v55 = vsel %vm9574_vm7, %v4055_v1, 0.0  ;;  %v4233_v34 = vld [vmem:[#allocation2 + $0x9] sm:$0xff]  ;;  %v4343_v33 = vsel %vm9573_vm12, %v4055_v1, 0.0  ;;  %vm9581_vm12 = vmmov %vm9536_vm3 }
 0x562   : > { %v4070_v43 = vpack.c.bf16 %v4063_v55, %v4062_v36  ;;  %v4020_v52 = vmul.f32 %v8667_v23, %v4000_v8  ;;  %6094 = vmatmul.msk.bf16.vlgmr.msrb.gmra.mxu0 %vm9575_vm14, %v4090_v22  ;;  %v4241_v39 = vsel %vm7115_vm1, %v4233_v34, 0.0  ;;  %v6524_v35 = vld [vmem:[%s9255_s22 + $0x88] sm:$0xff]  ;;  %vm9578_vm14 = vmmov %vm9536_vm3 }
 0x563   : > { %4500 = vmatpush.bf16.msra.mxu0 %v6524_v35 }
 0x564   : > { %6114 = vmatmul.msk.bf16.vlgmr.msrb.gmra.mxu1 %vm9576_vm13, %v4070_v43  ;;  %v4032_v31 = vadd.f32 %v8672_v37, %v4020_v52  ;;  %vm9577_vm13 = vmmov %vm9536_vm3 }
 0x566   : > { %v4040_v46 = vmax.f32 %v4032_v31, 0.0 }
 0x567   : > { %v3972_v5 = vpop.f32.mrf.mxu2  ;;  %v4001_v27 = vpop.f32.mrf.mxu3  ;;  %v8694_v29 = vld [vmem:[#allocation2 + $0x11] sm:$0xff] }
 0x568   : > { %v8698_v12 = vld [vmem:[#allocation2 + $0x17] sm:$0xff]  ;;  %4048 = vst.msk [vmem:[#allocation2 + $0x20] sm:$0xff] %vm9536_vm3, %v4040_v46  ;;  %v4002_v61 = vadd.f32 %v4001_v27, %v3972_v5  ;;  %v4242_v45 = vsel %vm7119_vm2, %v8694_v29, 0.0 }
 0x569   : > { %v4344_v14 = vsel %vm9574_vm7, %v8698_v12, 0.0  ;;  %v4249_v36 = vpack.c.bf16 %v4242_v45, %v4241_v39  ;;  %v8716_v43 = vld [vmem:[#allocation2 + $0x18] sm:$0xff]  ;;  %v6523_v45 = vld [vmem:[%s9255_s22 + $0x80] sm:$0xff] }
 0x56a   : > { %v4351_v10 = vpack.c.bf16 %v4344_v14, %v4343_v33  ;;  %v4021_v11 = vmul.f32 %v8667_v23, %v4002_v61  ;;  %v6530_v33 = vld [vmem:[%s9255_s22 + $0xb8] sm:$0xff]  ;;  %4501 = vmatpush.bf16.msra.mxu0 %v6523_v45 }
 0x56b   : > { %6142 = vmatmul.msk.bf16.vlgmr.msrb.gmra.mxu2 %vm9577_vm13, %v4249_v36  ;;  %vm9579_vm13 = vnez %v9426_v30  ;;  %v6534_v14 = vld [vmem:[%s9255_s22 + $0xd8] sm:$0xff]  ;;  %4600 = vmatpush.bf16.msra.mxu1 %v6530_v33 }
 0x56c   : > { %6170 = vmatmul.msk.bf16.vlgmr.msra.gmra.mxu3 %vm9578_vm14, %v4351_v10  ;;  %v4033_v8 = vadd.f32 %v8672_v37, %v4021_v11  ;;  %v4064_v5 = vsel %vm9579_vm13, %v8698_v12, 0.0  ;;  %vm9580_vm14 = vnez %v9499_v26  ;;  %v6538_v10 = vld [vmem:[%s9255_s22 + $0xf8] sm:$0xff]  ;;  %v6529_v11 = vld [vmem:[%s9255_s22 + $0xb0] sm:$0xff]  ;;  %4702 = vmatpush.bf16.msra.mxu2 %v6534_v14 }
 0x56d   : > { %4796 = vmatpush.bf16.msrb.mxu3 %v6538_v10 }
 0x56e   : > { %v4041_v1 = vmax.f32 %v4033_v8, 0.0 }
 0x56f   : > { %v3975_v22 = vpop.f32.mrf.mxu2  ;;  %v4004_v55 = vpop.f32.mrf.mxu3  ;;  %v8718_v52 = vld [vmem:[#allocation2 + $0x20] sm:$0xff]  ;;  %4601 = vmatpush.bf16.msra.mxu1 %v6529_v11  ;;  %v6533_v11 = vld [vmem:[%s9255_s22 + $0xd0] sm:$0xff] }
 0x570   : > { %v8720_v31 = vld [vmem:[#allocation2 + $0x1f] sm:$0xff]  ;;  %4049 = vst.msk [vmem:[#allocation2 + $0x28] sm:$0xff] %vm9536_vm3, %v4041_v1  ;;  %v4005_v34 = vadd.f32 %v4004_v55, %v3975_v22  ;;  %v8725_v46 = vpack.c.bf16 %v8718_v52, %v8716_v43  ;;  %4703 = vmatpush.bf16.msra.mxu2 %v6533_v11 }
 0x571   : > { %v4065_v27 = vsel %vm9580_vm14, %v8720_v31, 0.0  ;;  %v8747_v36 = vld [vmem:[#allocation2 + $0x19] sm:$0xff]  ;;  %v4345_v45 = vsel %vm9579_vm13, %v8720_v31, 0.0  ;;  %v4642_v56 = vsel %vm9574_vm7, %v8720_v31, 0.0 }
 0x572   : > { %v4071_v39 = vpack.c.bf16 %v4065_v27, %v4064_v5  ;;  %v4022_v61 = vmul.f32 %v8667_v23, %v4005_v34  ;;  %6095 = vmatmul.msk.bf16.gmra.mxu0 %vm9581_vm12, %v8725_v46  ;;  %v4243_v34 = vsel %vm7169_vm5, %v8747_v36, 0.0  ;;  %vm9582_vm12 = vmmov %vm9536_vm3  ;;  %v4540_v32 = vsel %vm7119_vm2, %v8747_v36, 0.0 }
 0x574   : > { %6115 = vmatmul.msk.bf16.gmra.mxu1 %vm9536_vm3, %v4071_v39  ;;  %v4034_v35 = vadd.f32 %v8672_v37, %v4022_v61 }
 0x576   : > { %v4042_v8 = vmax.f32 %v4034_v35, 0.0 }
 0x577   : > { %v3977_v1 = vpop.f32.mrf.mxu2  ;;  %v4006_v22 = vpop.f32.mrf.mxu3  ;;  %v8755_v55 = vld [vmem:[#allocation2 + $0x21] sm:$0xff] }
 0x578   : > { %v8760_v5 = vld [vmem:[#allocation2 + $0x27] sm:$0xff]  ;;  %4050 = vst.msk [vmem:[#allocation2 + $0x30] sm:$0xff] %vm9582_vm12, %v4042_v8  ;;  %v4007_v27 = vadd.f32 %v4006_v22, %v3977_v1  ;;  %v4244_v61 = vsel %vm7175_vm6, %v8755_v55, 0.0  ;;  %v4837_v8 = vsel %vm7115_vm1, %v8747_v36, 0.0  ;;  %v4838_v1 = vsel %vm7119_vm2, %v8755_v55, 0.0  ;;  %vm9584_vm12 = vmmov %vm9536_vm3 }
 0x579   : > { %v4346_v33 = vsel %vm9580_vm14, %v8760_v5, 0.0  ;;  %v4250_v14 = vpack.c.bf16 %v4244_v61, %v4243_v34  ;;  %v6528_v22 = vld [vmem:[%s9255_s22 + $0xa8] sm:$0xff]  ;;  %v8787_v34 = vpack.c.bf16 %v4838_v1, %v4837_v8  ;;  %v6537_v61 = vld [vmem:[%s9255_s22 + $0xf0] sm:$0xff]  ;;  %v4066_v11 = vsel %vm9534_vm11, %v8760_v5, 0.0 }
 0x57a   : > { %v4352_v35 = vpack.c.bf16 %v4346_v33, %v4345_v45  ;;  %v4023_v10 = vmul.f32 %v8667_v23, %v4007_v27  ;;  %4602 = vmatpush.bf16.msra.mxu1 %v6528_v22  ;;  %v6527_v45 = vld [vmem:[%s9255_s22 + $0xa0] sm:$0xff]  ;;  %4797 = vmatpush.bf16.msrb.mxu3 %v6537_v61  ;;  %v8796_v53 = vld [vmem:[#allocation2 + $0x28] sm:$0xff]  ;;  %vm9602_vm2 = vnez %v9416_v57  ;;  %v4541_v63 = vsel %vm7169_vm5, %v8755_v55, 0.0 }
 0x57b   : > { %6143 = vmatmul.msk.bf16.gmra.mxu2 %vm9536_vm3, %v4250_v14  ;;  %v6539_v57 = vld [vmem:[%s9255_s22 + $0x100] sm:$0xff] }
 0x57c   : > { %6171 = vmatmul.msk.bf16.gmra.mxu3 %vm9584_vm12, %v4352_v35  ;;  %v4035_v27 = vadd.f32 %v8672_v37, %v4023_v10  ;;  %vm9587_vm12 = vmmov %vm9536_vm3 }
 0x57e   : > { %v4043_v33 = vmax.f32 %v4035_v27, 0.0  ;;  %4603 = vmatpush.bf16.msra.mxu1 %v6527_v45 }
 0x57f   : > { %v3980_v14 = vpop.f32.mrf.mxu2  ;;  %v4009_v35 = vpop.f32.mrf.mxu3  ;;  %v8798_v8 = vld [vmem:[#allocation2 + $0x30] sm:$0xff] }
 0x580   : > { %v8800_v1 = vld [vmem:[#allocation2 + $0x2f] sm:$0xff]  ;;  %4051 = vst.msk [vmem:[#allocation2 + $0x38] sm:$0xff] %vm9536_vm3, %v4043_v33  ;;  %v4010_v10 = vadd.f32 %v4009_v35, %v3980_v14  ;;  %v8805_v22 = vpack.c.bf16 %v8798_v8, %v8796_v53  ;;  %v6542_v33 = vld [vmem:[%s9255_s22 + $0x118] sm:$0xff] }
 0x581   : > { %v4067_v61 = vsel %vm9533_vm4, %v8800_v1, 0.0  ;;  %v6532_v14 = vld [vmem:[%s9255_s22 + $0xc8] sm:$0xff]  ;;  %4898 = vmatpush.bf16.msrb.mxu0 %v6542_v33 }
 0x582   : > { %v4072_v40 = vpack.c.bf16 %v4067_v61, %v4066_v11  ;;  %v4024_v49 = vmul.f32 %v8667_v23, %v4010_v10  ;;  %6096 = vmatmul.msk.bf16.gmra.mxu0 %vm9587_vm12, %v8805_v22  ;;  %v6536_v35 = vld [vmem:[%s9255_s22 + $0xe8] sm:$0xff]  ;;  %4704 = vmatpush.bf16.msra.mxu2 %v6532_v14  ;;  %v6531_v11 = vld [vmem:[%s9255_s22 + $0xc0] sm:$0xff]  ;;  %vm9589_vm12 = vmmov %vm9536_vm3 }
 0x583   : > { %v8827_v10 = vld [vmem:[#allocation2 + $0x29] sm:$0xff]  ;;  %4798 = vmatpush.bf16.msrb.mxu3 %v6536_v35 }
 0x584   : > { %6116 = vmatmul.msk.bf16.gmra.mxu1 %vm9536_vm3, %v4072_v40  ;;  %v4036_v45 = vadd.f32 %v8672_v37, %v4024_v49  ;;  %v6535_v40 = vld [vmem:[%s9255_s22 + $0xe0] sm:$0xff]  ;;  %v4245_v28 = vsel %vm9465_vm10, %v8827_v10, 0.0 }
 0x586   : > { %v4044_v61 = vmax.f32 %v4036_v45, 0.0  ;;  %v4347_v45 = vsel %vm9534_vm11, %v8800_v1, 0.0  ;;  %4705 = vmatpush.bf16.msra.mxu2 %v6531_v11  ;;  %vm9592_vm11 = vmmov %vm9536_vm3 }
 0x587   : > { %v3982_v41 = vpop.f32.mrf.mxu2  ;;  %v4011_v7 = vpop.f32.mrf.mxu3  ;;  %v8835_v25 = vld [vmem:[#allocation2 + $0x31] sm:$0xff]  ;;  %4799 = vmatpush.bf16.msrb.mxu3 %v6535_v40 }
 0x588   : > { %v8840_v33 = vld [vmem:[#allocation2 + $0x37] sm:$0xff]  ;;  %4052 = vst.msk [vmem:[#allocation2 + $0x40] sm:$0xff] %vm9589_vm12, %v4044_v61  ;;  %v4012_v14 = vadd.f32 %v4011_v7, %v3982_v41  ;;  %v4246_v59 = vsel %vm9464_vm9, %v8835_v25, 0.0  ;;  %v4839_v41 = vsel %vm7169_vm5, %v8827_v10, 0.0  ;;  %v4840_v7 = vsel %vm7175_vm6, %v8835_v25, 0.0  ;;  %vm9591_vm12 = vmmov %vm9536_vm3 }
 0x589   : > { %v4348_v50 = vsel %vm9533_vm4, %v8840_v33, 0.0  ;;  %v4251_v48 = vpack.c.bf16 %v4246_v59, %v4245_v28  ;;  %v8861_v61 = vpack.c.bf16 %v4840_v7, %v4839_v41  ;;  %v4088_v28 = vld [vmem:[#allocation2 + $0x38] sm:$0xff]  ;;  %v4543_v26 = vsel %vm9465_vm10, %v8835_v25, 0.0 }
 0x58a   : > { %v4353_v60 = vpack.c.bf16 %v4348_v50, %v4347_v45  ;;  %v4025_v51 = vmul.f32 %v8667_v23, %v4012_v14  ;;  %v4068_v45 = vsel %vm7330_vm15, %v8840_v33, 0.0 }
 0x58b   : > { %6144 = vmatmul.msk.bf16.gmra.mxu2 %vm9536_vm3, %v4251_v48  ;;  %v9594_v48 = vld [vmem:[#allocation23_spill] sm:$0xff] }
 0x58c   : > { %6172 = vmatmul.msk.bf16.gmra.mxu3 %vm9591_vm12, %v4353_v60  ;;  %v4037_v50 = vadd.f32 %v8672_v37, %v4025_v51  ;;  %v6541_v51 = vld [vmem:[%s9255_s22 + $0x110] sm:$0xff]  ;;  %vm9595_vm12 = vmmov %vm9536_vm3 }
 0x58d   : > { %4899 = vmatpush.bf16.msrb.mxu0 %v6541_v51 }
 0x58e   : > { %v4045_v59 = vmax.f32 %v4037_v50, 0.0 }
 0x58f   : > { %v8864_v11 = vld [vmem:[#allocation2 + $0x40] sm:$0xff] }
 0x590   : > { %v4061_v23 = vld [vmem:[#allocation2 + $0x3f] sm:$0xff]  ;;  %4053 = vst.msk [vmem:[#allocation2 + $0x48] sm:$0xff] %vm9592_vm11, %v4045_v59  ;;  %v4093_v40 = vpack.c.bf16 %v8864_v11, %v4088_v28  ;;  %vm9598_vm11 = vnez %v9597_v16 }
 0x591   : > { %v4069_v60 = vsel %vm9518_vm0, %v4061_v23, 0.0  ;;  %v4239_v37 = vld [vmem:[#allocation2 + $0x39] sm:$0xff]  ;;  %v4646_v30 = vsel %vm9533_vm4, %v4061_v23, 0.0 }
 0x592   : > { %v4073_v41 = vpack.c.bf16 %v4069_v60, %v4068_v45  ;;  %6097 = vmatmul.msk.bf16.gmra.mxu0 %vm9536_vm3, %v4093_v40  ;;  %v4247_v2 = vsel %vm9469_vm8, %v4239_v37, 0.0  ;;  %v4349_v45 = vsel %vm7330_vm15, %v4061_v23, 0.0  ;;  %v6342_v59 = vld [vmem:[%s9258_s25 + $0x38] sm:$0xf0] }
 0x594   : > { %6117 = vmatmul.msk.bf16.gmra.mxu1 %vm9595_vm12, %v4073_v41  ;;  %v4841_v41 = vsel %vm9465_vm10, %v4239_v37, 0.0  ;;  %vm9599_vm12 = vmmov %vm9536_vm3 }
 0x597   : > { %v4240_v7 = vld [vmem:[#allocation2 + $0x41] sm:$0xff]  ;;  %v4538_v55 = vld [vmem:[#allocation2 + $0x49] sm:$0xff] }
 0x598   : > { %v4342_v50 = vld [vmem:[#allocation2 + $0x47] sm:$0xff]  ;;  %v4248_v9 = vsel %vm9598_vm11, %v4240_v7, 0.0  ;;  %v4842_v51 = vsel %vm9464_vm9, %v4240_v7, 0.0  ;;  %v4545_v25 = vsel %vm9469_vm8, %v4240_v7, 0.0  ;;  %v4546_v39 = vsel %vm9598_vm11, %v4538_v55, 0.0 }
 0x599   : > { %v4350_v60 = vsel %vm9518_vm0, %v4342_v50, 0.0  ;;  %v4252_v24 = vpack.c.bf16 %v4248_v9, %v4247_v2  ;;  %v8892_v13 = vpack.c.bf16 %v4842_v51, %v4841_v41  ;;  %v4445_v9 = vpack.c.bf16 %v8716_v43, %v8684_v17  ;;  %vm9600_vm0 = vmmov %vm9536_vm3 }
 0x59a   : > { %v4354_v6 = vpack.c.bf16 %v4350_v60, %v4349_v45  ;;  %v4539_v2 = vsel %vm7115_vm1, %v8694_v29, 0.0  ;;  %vm9603_vm1 = vmmov %vm9600_vm0  ;;  %v4446_v17 = vpack.c.bf16 %v8796_v53, %v8718_v52  ;;  %v4643_v53 = vsel %vm9579_vm13, %v8760_v5, 0.0  ;;  %v4444_v5 = vld [vmem:[#allocation2 + $0x48] sm:$0xff] }
 0x59b   : > { %6145 = vmatmul.msk.bf16.gmra.mxu2 %vm9536_vm3, %v4252_v24  ;;  %v4547_v45 = vpack.c.bf16 %v4540_v32, %v4539_v2  ;;  %vm9601_vm3 = vmmov %vm9600_vm0  ;;  %v4641_v24 = vsel %vm9602_vm2, %v8698_v12, 0.0  ;;  %v4542_v32 = vsel %vm7175_vm6, %v8827_v10, 0.0  ;;  %v4644_v12 = vsel %vm9580_vm14, %v8800_v1, 0.0  ;;  %v4742_v10 = vld [vmem:[#allocation2 + $0x50] sm:$0xff] }
 0x59c   : > { %6173 = vmatmul.msk.bf16.gmra.mxu3 %vm9599_vm12, %v4354_v6  ;;  %v6540_v6 = vld [vmem:[%s9255_s22 + $0x108] sm:$0xff]  ;;  %v4649_v54 = vpack.c.bf16 %v4642_v56, %v4641_v24  ;;  %v4548_v29 = vpack.c.bf16 %v4542_v32, %v4541_v63  ;;  %vm9604_vm7 = vmmov %vm9600_vm0  ;;  %v4650_v4 = vpack.c.bf16 %v4644_v12, %v4643_v53  ;;  %v4544_v43 = vsel %vm9464_vm9, %v4239_v37, 0.0  ;;  %v4836_v12 = vld [vmem:[#allocation2 + $0x51] sm:$0xff] }
 0x59d   : > { %4900 = vmatpush.bf16.msrb.mxu0 %v6540_v6  ;;  %vm9605_vm12 = vmmov %vm9600_vm0  ;;  %v4447_v52 = vpack.c.bf16 %v4088_v28, %v8798_v8  ;;  %v4549_v31 = vpack.c.bf16 %v4544_v43, %v4543_v26  ;;  %vm9610_vm13 = vnez %v9585_v18  ;;  %v4448_v8 = vpack.c.bf16 %v4444_v5, %v8864_v11  ;;  %v4640_v18 = vld [vmem:[#allocation2 + $0x4f] sm:$0xff] }
 0x59e   : > { %vm9606_vm5 = vmmov %vm9600_vm0  ;;  %v4550_v1 = vpack.c.bf16 %v4546_v39, %v4545_v25  ;;  %v4843_v53 = vsel %vm9469_vm8, %v4538_v55, 0.0 }
 0x59f   : > { %vm9607_vm6 = vmmov %vm9600_vm0 }
 0x5a0   : > { %vm9608_vm14 = vmmov %vm9600_vm0 }
 0x5a1   : > { %4901 = vmatpush.bf16.msrb.mxu0 %v6539_v57  ;;  %vm9611_vm9 = vmmov %vm9600_vm0 }
 0x5a2   : > { %6198 = vmatmul.msk.bf16.vlgmr.msra.gmra.mxu0 %vm9600_vm0, %v4445_v9  ;;  %vm9612_vm2 = vmmov %vm9600_vm0 }
 0x5a3   : > { %vm9613_vm10 = vmmov %vm9600_vm0 }
 0x5a4   : > { %6226 = vmatmul.msk.bf16.vlgmr.msra.gmra.mxu1 %vm9601_vm3, %v4547_v45  ;;  %vm9609_vm3 = vmmov %vm9600_vm0 }
 0x5a5   : > { %vm9614_vm4 = vmmov %vm9600_vm0 }
 0x5a6   : > { %vm9621_vm8 = vmmov %vm9600_vm0 }
 0x5ab   : > { %6254 = vmatmul.msk.bf16.vlgmr.msra.gmra.mxu2 %vm9603_vm1, %v4649_v54  ;;  %vm9615_vm1 = vnez %v9594_v48 }
 0x5ac   : > { %6282 = vmatmul.msk.bf16.vlgmr.msrb.gmra.mxu3 %vm9600_vm0, %v8725_v46  ;;  %v4645_v46 = vsel %vm9610_vm13, %v8840_v33, 0.0  ;;  %v4648_v27 = vsel %vm9615_vm1, %v4640_v18, 0.0  ;;  %v4746_v33 = vpack.c.bf16 %v4742_v10, %v4444_v5  ;;  %v6549_v5 = vld [vmem:[%s9258_s25 + $0x34] sm:$0xf]  ;;  %vm9625_vm13 = vmmov %vm9600_vm0 }
 0x5ad   : > { %v4651_v36 = vpack.c.bf16 %v4646_v30, %v4645_v46  ;;  %v6345_v16 = vor.u32 %v6549_v5, %v6342_v59 }
 0x5af   : > { %5060 = vmatpush.bf16.msrb.mxu2 %v6345_v16 }
 0x5b2   : > { %6199 = vmatmul.msk.bf16.gmra.mxu0 %vm9604_vm7, %v4446_v17  ;;  %vm9616_vm7 = vmmov %vm9600_vm0 }
 0x5b4   : > { %6227 = vmatmul.msk.bf16.gmra.mxu1 %vm9605_vm12, %v4548_v29  ;;  %vm9617_vm12 = vmmov %vm9600_vm0 }
 0x5bb   : > { %6255 = vmatmul.msk.bf16.gmra.mxu2 %vm9606_vm5, %v4650_v4  ;;  %vm9619_vm5 = vmmov %vm9600_vm0  ;;  %v4844_v4 = vsel %vm9598_vm11, %v4836_v12, 0.0 }
 0x5bc   : > { %6283 = vmatmul.msk.bf16.gmra.mxu3 %vm9607_vm6, %v8805_v22  ;;  %v4647_v22 = vsel %vm7330_vm15, %v4342_v50, 0.0  ;;  %vm9618_vm15 = vmmov %vm9600_vm0  ;;  %v4848_v30 = vpack.c.bf16 %v4844_v4, %v4843_v53 }
 0x5bd   : > { %v4652_v49 = vpack.c.bf16 %v4648_v27, %v4647_v22  ;;  %vm9620_vm6 = vmmov %vm9600_vm0 }
 0x5be   : > { %vm9622_vm11 = vmmov %vm9600_vm0 }
 0x5c2   : > { %6200 = vmatmul.msk.bf16.gmra.mxu0 %vm9608_vm14, %v4447_v52  ;;  %vm9623_vm14 = vmmov %vm9600_vm0 }
 0x5c4   : > { %6228 = vmatmul.msk.bf16.gmra.mxu1 %vm9609_vm3, %v4549_v31  ;;  %vm9624_vm3 = vmmov %vm9600_vm0 }
 0x5cb   : > { %6256 = vmatmul.msk.bf16.gmra.mxu2 %vm9611_vm9, %v4651_v36  ;;  %vm9626_vm9 = vmmov %vm9600_vm0 }
 0x5cc   : > { %6284 = vmatmul.msk.bf16.gmra.mxu3 %vm9612_vm2, %v4093_v40  ;;  %vm9627_vm2 = vmmov %vm9600_vm0 }
 0x5d2   : > { %6201 = vmatmul.msk.bf16.gmra.mxu0 %vm9613_vm10, %v4448_v8  ;;  %v6340_v8 = vld [vmem:[%s9258_s25 + $0x30] sm:$0xf]  ;;  %vm9628_vm10 = vmmov %vm9600_vm0 }
 0x5d4   : > { %6229 = vmatmul.msk.bf16.gmra.mxu1 %vm9614_vm4, %v4550_v1  ;;  %v6550_v1 = vld [vmem:[%s9258_s25 + $0x34] sm:$0xf0] }
 0x5d5   : > { %v6341_v18 = vor.u32 %v6550_v1, %v6340_v8  ;;  %v6544_v8 = vld [vmem:[%s9258_s25 + $0x4] sm:$0xf0] }
 0x5d7   : > { %5031 = vmatpush.bf16.msrb.mxu1 %v6341_v18 }
 0x5db   : > { %6257 = vmatmul.msk.bf16.gmra.mxu2 %vm9600_vm0, %v4652_v49 }
 0x5dc   : > { %6285 = vmatmul.msk.bf16.gmra.mxu3 %vm9616_vm7, %v4746_v33 }
 0x5df   : > { %v4148_v35 = vpop.f32.mrf.mxu0 }
 0x5e1   : > { %v4213_v28 = vpop.f32.mrf.mxu1 }
 0x5e2   : > { %v4214_v11 = vadd.f32 %v4213_v28, %v4148_v35  ;;  %6310 = vmatmul.msk.bf16.vlgmr.msrb.gmra.mxu0 %vm9617_vm12, %v8787_v34  ;;  %v6547_v28 = vld [vmem:[%s9258_s25 + $0x24] sm:$0xf] }
 0x5e7   : > { %v8968_v23 = vpop.f32.mrf.mxu0 }
 0x5e9   : > { %v8970_v40 = vpop.f32.mrf.mxu1 }
 0x5ee   : > { %v4307_v14 = vpop.f32.mrf.mxu2 }
 0x5ef   : > { %v4409_v48 = vpop.f32.mrf.mxu3  ;;  %v4327_v37 = vadd.f32 %v4307_v14, %v4214_v11  ;;  %v4153_v7 = vpop.f32.mrf.mxu0  ;;  %v6334_v11 = vld [vmem:[%s9258_s25 + $0x28] sm:$0xf0] }
 0x5f0   : > { %v6337_v14 = vor.u32 %v6547_v28, %v6334_v11 }
 0x5f1   : > { %v4218_v50 = vpop.f32.mrf.mxu1  ;;  %v4429_v60 = vadd.f32 %v4409_v48, %v4327_v37  ;;  %v6332_v37 = vld [vmem:[%s9258_s25 + $0x20] sm:$0xf] }
 0x5f2   : > { %v4219_v41 = vadd.f32 %v4218_v50, %v4153_v7  ;;  %6311 = vmatmul.msk.bf16.gmra.mxu0 %vm9618_vm15, %v8861_v61  ;;  %5061 = vmatpush.bf16.msrb.mxu2 %v6337_v14  ;;  %v6548_v7 = vld [vmem:[%s9258_s25 + $0x24] sm:$0xf0] }
 0x5f3   : > { %v6333_v50 = vor.u32 %v6548_v7, %v6332_v37 }
 0x5f5   : > { %5032 = vmatpush.bf16.msrb.mxu1 %v6333_v50 }
 0x5f6   : > { %v8974_v51 = vpop.f32.mrf.mxu2 }
 0x5f7   : > { %v8976_v9 = vpop.f32.mrf.mxu3  ;;  %v8978_v2 = vpop.f32.mrf.mxu0 }
 0x5f9   : > { %v8980_v34 = vpop.f32.mrf.mxu1 }
 0x5fe   : > { %v4312_v45 = vpop.f32.mrf.mxu2 }
 0x5ff   : > { %v4414_v6 = vpop.f32.mrf.mxu3  ;;  %v4329_v56 = vadd.f32 %v4312_v45, %v4219_v41  ;;  %v4158_v24 = vpop.f32.mrf.mxu0  ;;  %v6545_v45 = vld [vmem:[%s9258_s25 + $0x14] sm:$0xf] }
 0x601   : > { %v4223_v54 = vpop.f32.mrf.mxu1  ;;  %v4431_v32 = vadd.f32 %v4414_v6, %v4329_v56  ;;  %v6326_v6 = vld [vmem:[%s9258_s25 + $0x18] sm:$0xf0] }
 0x602   : > { %v4224_v17 = vadd.f32 %v4223_v54, %v4158_v24  ;;  %6312 = vmatmul.msk.bf16.gmra.mxu0 %vm9619_vm5, %v8892_v13  ;;  %v6329_v56 = vor.u32 %v6545_v45, %v6326_v6  ;;  %v6324_v54 = vld [vmem:[%s9258_s25 + $0x10] sm:$0xf] }
 0x604   : > { %5062 = vmatpush.bf16.msrb.mxu2 %v6329_v56 }
 0x606   : > { %v8984_v63 = vpop.f32.mrf.mxu2 }
 0x607   : > { %v8986_v61 = vpop.f32.mrf.mxu3  ;;  %v8988_v29 = vpop.f32.mrf.mxu0 }
 0x609   : > { %v8990_v57 = vpop.f32.mrf.mxu1 }
 0x60e   : > { %v4317_v43 = vpop.f32.mrf.mxu2 }
 0x60f   : > { %v4419_v52 = vpop.f32.mrf.mxu3  ;;  %v4331_v26 = vadd.f32 %v4317_v43, %v4224_v17  ;;  %v4163_v31 = vpop.f32.mrf.mxu0  ;;  %v6546_v17 = vld [vmem:[%s9258_s25 + $0x14] sm:$0xf0] }
 0x611   : > { %v4228_v13 = vpop.f32.mrf.mxu1  ;;  %v4433_v46 = vadd.f32 %v4419_v52, %v4331_v26  ;;  %v6543_v26 = vld [vmem:[%s9258_s25 + $0x4] sm:$0xf] }
 0x612   : > { %v4229_v36 = vadd.f32 %v4228_v13, %v4163_v31  ;;  %6313 = vmatmul.msk.bf16.gmra.mxu0 %vm9620_vm6, %v4848_v30  ;;  %v6318_v31 = vld [vmem:[%s9258_s25 + $0x8] sm:$0xf0] }
 0x616   : > { %v9003_v55 = vpop.f32.mrf.mxu2 }
 0x617   : > { %v9005_v25 = vpop.f32.mrf.mxu3  ;;  %v9007_v39 = vpop.f32.mrf.mxu0 }
 0x619   : > { %v9039_v12 = vpop.f32.mrf.mxu1 }
 0x61e   : > { %v4322_v22 = vpop.f32.mrf.mxu2 }
 0x61f   : > { %v4333_v27 = vadd.f32 %v4322_v22, %v4229_v36  ;;  %v4503_v10 = vpop.f32.mrf.mxu0  ;;  %v4424_v49 = vpop.f32.mrf.mxu3  ;;  %v6321_v36 = vor.u32 %v6543_v26, %v6318_v31 }
 0x620   : > { %v4523_v33 = vadd.f32 %v4503_v10, %v4429_v60  ;;  %v4216_v10 = vadd.f32 %v8970_v40, %v8968_v23  ;;  %v9072_v23 = vld [vmem:[%s9256_s23] ss:$0 sm:$0xff] }
 0x621   : > { %v4435_v35 = vadd.f32 %v4424_v49, %v4333_v27  ;;  %v4605_v13 = vpop.f32.mrf.mxu1  ;;  %5063 = vmatpush.bf16.msrb.mxu2 %v6321_v36 }
 0x622   : > { %v4328_v49 = vadd.f32 %v8974_v51, %v4216_v10  ;;  %v4625_v37 = vadd.f32 %v4605_v13, %v4523_v33  ;;  %v4221_v51 = vadd.f32 %v8980_v34, %v8978_v2 }
 0x624   : > { %v4430_v14 = vadd.f32 %v8976_v9, %v4328_v49  ;;  %v4330_v33 = vadd.f32 %v8984_v63, %v4221_v51 }
 0x626   : > { %v9041_v53 = vpop.f32.mrf.mxu2  ;;  %v4432_v36 = vadd.f32 %v8986_v61, %v4330_v33 }
 0x627   : > { %v4505_v48 = vpop.f32.mrf.mxu0  ;;  %v9045_v52 = vpop.f32.mrf.mxu3 }
 0x628   : > { %v4524_v50 = vadd.f32 %v4505_v48, %v4430_v14 }
 0x629   : > { %v4607_v22 = vpop.f32.mrf.mxu1 }
 0x62a   : > { %v4626_v6 = vadd.f32 %v4607_v22, %v4524_v50 }
 0x62e   : > { %v4707_v5 = vpop.f32.mrf.mxu2 }
 0x62f   : > { %v4508_v60 = vpop.f32.mrf.mxu0  ;;  %v4801_v59 = vpop.f32.mrf.mxu3 }
 0x630   : > { %v4525_v41 = vadd.f32 %v4508_v60, %v4431_v32  ;;  %v6325_v32 = vor.u32 %v6546_v17, %v6324_v54  ;;  %v4727_v60 = vadd.f32 %v4707_v5, %v4625_v37 }
 0x631   : > { %v4610_v7 = vpop.f32.mrf.mxu1 }
 0x632   : > { %5033 = vmatpush.bf16.msrb.mxu1 %v6325_v32  ;;  %v4821_v56 = vadd.f32 %v4801_v59, %v4727_v60  ;;  %v4627_v5 = vadd.f32 %v4610_v7, %v4525_v41  ;;  %v4226_v41 = vadd.f32 %v8990_v57, %v8988_v29 }
 0x636   : > { %v4709_v27 = vpop.f32.mrf.mxu2 }
 0x637   : > { %v4510_v24 = vpop.f32.mrf.mxu0  ;;  %v4803_v11 = vpop.f32.mrf.mxu3  ;;  %v4728_v54 = vadd.f32 %v4709_v27, %v4626_v6 }
 0x638   : > { %v4526_v34 = vadd.f32 %v4510_v24, %v4432_v36  ;;  %v4332_v24 = vadd.f32 %v9003_v55, %v4226_v41 }
 0x639   : > { %v4612_v9 = vpop.f32.mrf.mxu1  ;;  %v4822_v48 = vadd.f32 %v4803_v11, %v4728_v54 }
 0x63a   : > { %v4628_v10 = vadd.f32 %v4612_v9, %v4526_v34 }
 0x63f   : > { %v4513_v4 = vpop.f32.mrf.mxu0  ;;  %v4806_v40 = vpop.f32.mrf.mxu3 }
 0x640   : > { %v9043_v43 = vadd.f32 %v4513_v4, %v4433_v46  ;;  %v6316_v46 = vld [vmem:[%s9258_s25] sm:$0xf] }
 0x641   : > { %v6317_v18 = vor.u32 %v6544_v8, %v6316_v46  ;;  %v9081_v4 = vld [vmem:[%s9257_s24] ss:$0 sm:$0xff]  ;;  %v4615_v22 = vpop.f32.mrf.mxu1 }
 0x642   : > { %v4629_v54 = vadd.f32 %v4615_v22, %v9043_v43 }
 0x643   : > { %5034 = vmatpush.bf16.msrb.mxu1 %v6317_v18 }
 0x647   : > { %v9053_v30 = vpop.f32.mrf.mxu0  ;;  %v4808_v46 = vpop.f32.mrf.mxu3 }
 0x649   : > { %v4617_v6 = vpop.f32.mrf.mxu1 }
 0x64f   : > { %v4518_v16 = vpop.f32.mrf.mxu0  ;;  %v4811_v60 = vpop.f32.mrf.mxu3 }
 0x650   : > { %v9061_v1 = vadd.f32 %v4518_v16, %v4435_v35  ;;  %v4712_v35 = vpop.f32.mrf.mxu2 }
 0x651   : > { %v4729_v63 = vadd.f32 %v4712_v35, %v4627_v5  ;;  %v4620_v43 = vpop.f32.mrf.mxu1 }
 0x653   : > { %v4823_v49 = vadd.f32 %v4806_v40, %v4729_v63 }
 0x657   : > { %v9066_v28 = vpop.f32.mrf.mxu0 }
 0x658   : > { %v4714_v26 = vpop.f32.mrf.mxu2 }
 0x659   : > { %v4730_v37 = vadd.f32 %v4714_v26, %v4628_v10 }
 0x65b   : > { %v4824_v7 = vadd.f32 %v4808_v46, %v4730_v37 }
 0x65f   : > { %v4903_v45 = vpop.f32.mrf.mxu0 }
 0x660   : > { %v4923_v17 = vadd.f32 %v4903_v45, %v4821_v56  ;;  %v4717_v14 = vpop.f32.mrf.mxu2  ;;  %v4434_v56 = vadd.f32 %v9005_v25, %v4332_v24 }
 0x661   : > { %v4731_v57 = vadd.f32 %v4717_v14, %v4629_v54 }
 0x662   : > { %v4935_v32 = vmul.f32 %v9072_v23, %v4923_v17  ;;  %v4528_v29 = vadd.f32 %v9053_v30, %v4434_v56  ;;  %v4231_v30 = vadd.f32 %v9039_v12, %v9007_v39 }
 0x663   : > { %v4825_v26 = vadd.f32 %v4811_v60, %v4731_v57 }
 0x664   : > { %v4947_v59 = vadd.f32 %v9081_v4, %v4935_v32  ;;  %v4630_v32 = vadd.f32 %v4617_v6, %v4528_v29 }
 0x666   : > { %v4955_v8 = vmax.f32 %v4947_v59, 0.0  ;;  %v4334_v59 = vadd.f32 %v9041_v53, %v4231_v30  ;;  %v4622_v53 = vpop.f32.mrf.mxu1 }
 0x667   : > { %v4905_v31 = vpop.f32.mrf.mxu0 }
 0x668   : > { %v4924_v13 = vadd.f32 %v4905_v31, %v4822_v48  ;;  %v4719_v51 = vpop.f32.mrf.mxu2  ;;  %v4436_v46 = vadd.f32 %v9045_v52, %v4334_v59 }
 0x669   : > { %v4732_v25 = vadd.f32 %v4719_v51, %v4630_v32 }
 0x66a   : > { %v4936_v2 = vmul.f32 %v9072_v23, %v4924_v13  ;;  %v4813_v13 = vpop.f32.mrf.mxu3  ;;  %v4530_v10 = vadd.f32 %v9066_v28, %v4436_v46 }
 0x66c   : > { %v4948_v16 = vadd.f32 %v9081_v4, %v4936_v2  ;;  %v4826_v2 = vadd.f32 %v4813_v13, %v4732_v25 }
 0x66e   : > { %v4956_v18 = vmax.f32 %v4948_v16, 0.0 }
 0x66f   : > { %v4908_v27 = vpop.f32.mrf.mxu0 }
 0x670   : > { %v4963_v11 = vpack.c.bf16 %v4956_v18, %v4955_v8  ;;  %v4925_v61 = vadd.f32 %v4908_v27, %v4823_v49  ;;  %v4722_v5 = vpop.f32.mrf.mxu2  ;;  %v4631_v8 = vadd.f32 %v4620_v43, %v9061_v1 }
 0x672   : > { %6346 = vmatmul.msk.bf16.vlgmr.msrb.gmra.mxu1 %vm9621_vm8, %v4963_v11  ;;  %6350 = vmatmul.msk.bf16.vlgmr.msrb.gmra.mxu2 %vm9622_vm11, %v4963_v11  ;;  %v4937_v50 = vmul.f32 %v9072_v23, %v4925_v61  ;;  %v4816_v27 = vpop.f32.mrf.mxu3  ;;  %v4733_v39 = vadd.f32 %v4722_v5, %v4631_v8  ;;  %v4632_v61 = vadd.f32 %v4622_v53, %v4530_v10 }
 0x674   : > { %v4949_v17 = vadd.f32 %v9081_v4, %v4937_v50  ;;  %v4827_v41 = vadd.f32 %v4816_v27, %v4733_v39  ;;  %v9629_v27 = vmax.f32 %v8487_v42, 0.0 }
 0x676   : > { %v4957_v9 = vmax.f32 %v4949_v17, 0.0 }
 0x677   : > { %v4910_v35 = vpop.f32.mrf.mxu0 }
 0x678   : > { %v4926_v45 = vadd.f32 %v4910_v35, %v4824_v7  ;;  %v4724_v14 = vpop.f32.mrf.mxu2 }
 0x679   : > { %v4734_v24 = vadd.f32 %v4724_v14, %v4632_v61 }
 0x67a   : > { %v4938_v40 = vmul.f32 %v9072_v23, %v4926_v45  ;;  %v4818_v7 = vpop.f32.mrf.mxu3 }
 0x67b   : > { %v4828_v50 = vadd.f32 %v4818_v7, %v4734_v24 }
 0x67c   : > { %v4950_v55 = vadd.f32 %v9081_v4, %v4938_v40 }
 0x67e   : > { %v4958_v33 = vmax.f32 %v4950_v55, 0.0 }
 0x67f   : > { %v4913_v48 = vpop.f32.mrf.mxu0 }
 0x680   : > { %v4964_v31 = vpack.c.bf16 %v4958_v33, %v4957_v9  ;;  %v4927_v36 = vadd.f32 %v4913_v48, %v4825_v26 }
 0x682   : > { %6347 = vmatmul.msk.bf16.gmra.mxu1 %vm9623_vm14, %v4964_v31  ;;  %6351 = vmatmul.msk.bf16.gmra.mxu2 %vm9624_vm3, %v4964_v31  ;;  %v4939_v34 = vmul.f32 %v9072_v23, %v4927_v36  ;;  %v5107_v31 = vld [vmem:[%s9260_s27] sm:$0x3] }
 0x683   : > { %v9129_v36 = vperm.slane %v5107_v31, 0  ;;  %v9139_v8 = vperm.slane %v5107_v31, 1 }
 0x684   : > { %v4951_v18 = vadd.f32 %v9081_v4, %v4939_v34 }
 0x686   : > { %v4959_v49 = vmax.f32 %v4951_v18, 0.0 }
 0x687   : > { %v4915_v63 = vpop.f32.mrf.mxu0 }
 0x688   : > { %v4928_v16 = vadd.f32 %v4915_v63, %v4826_v2 }
 0x68a   : > { %v4940_v22 = vmul.f32 %v9072_v23, %v4928_v16 }
 0x68c   : > { %v4952_v12 = vadd.f32 %v9081_v4, %v4940_v22 }
 0x68e   : > { %v4960_v11 = vmax.f32 %v4952_v12, 0.0 }
 0x68f   : > { %v4918_v37 = vpop.f32.mrf.mxu0 }
 0x690   : > { %v4965_v52 = vpack.c.bf16 %v4960_v11, %v4959_v49  ;;  %v4929_v1 = vadd.f32 %v4918_v37, %v4827_v41  ;;  %v9630_v49 = vmax.f32 %v8477_v20, 0.0  ;;  %v9631_v37 = vmax.f32 %v8513_v38, 0.0 }
 0x692   : > { %6348 = vmatmul.msk.bf16.gmra.mxu1 %vm9625_vm13, %v4965_v52  ;;  %6352 = vmatmul.msk.bf16.gmra.mxu2 %vm9626_vm9, %v4965_v52  ;;  %v4941_v28 = vmul.f32 %v9072_v23, %v4929_v1 }
 0x694   : > { %v4953_v45 = vadd.f32 %v9081_v4, %v4941_v28 }
 0x696   : > { %v4961_v54 = vmax.f32 %v4953_v45, 0.0 }
 0x697   : > { %v4920_v60 = vpop.f32.mrf.mxu0 }
 0x698   : > { %v4930_v35 = vadd.f32 %v4920_v60, %v4828_v50  ;;  %v9632_v50 = vmax.f32 %v8523_v19, 0.0 }
 0x69a   : > { %v4942_v6 = vmul.f32 %v9072_v23, %v4930_v35  ;;  %v5085_v23 = vld [vmem:[%s9259_s26] sm:$0x3] }
 0x69b   : > { %v9122_v26 = vperm.slane %v5085_v23, 0  ;;  %v9132_v5 = vperm.slane %v5085_v23, 1  ;;  %v9637_v23 = vmax.f32 %v8568_v44, 0.0 }
 0x69c   : > { %v4954_v56 = vadd.f32 %v9081_v4, %v4942_v6  ;;  %v9633_v6 = vmax.f32 %v8491_v3, 0.0 }
 0x69e   : > { %v4962_v17 = vmax.f32 %v4954_v56, 0.0 }
 0x6a0   : > { %v4966_v40 = vpack.c.bf16 %v4962_v17, %v4961_v54 }
 0x6a2   : > { %6349 = vmatmul.msk.bf16.gmra.mxu1 %vm9627_vm2, %v4966_v40  ;;  %6353 = vmatmul.msk.bf16.gmra.mxu2 %vm9628_vm10, %v4966_v40  ;;  %v9634_v40 = vmax.f32 %v8558_v62, 0.0 }
 0x6ef   : > { %v5036_v51 = vpop.f32.mrf.mxu1 }
 0x6f0   : > { %v5091_v25 = vmul.f32 %v9122_v26, %v5036_v51 }
 0x6f2   : > { %v5113_v63 = vadd.f32 %v9129_v36, %v5091_v25 }
 0x6f4   : > { %v5129_v11 = vadd.f32 %v5113_v63, %v9630_v49 }
 0x6f5   : > { %v5065_v29 = vpop.f32.mrf.mxu2 }
 0x6f6   : > { %v5092_v22 = vmul.f32 %v9132_v5, %v5065_v29  ;;  %v5145_v45 = vmax.f32 %v5129_v11, 0.0 }
 0x6f7   : > { %v5038_v57 = vpop.f32.mrf.mxu1 }
 0x6f8   : > { %v5093_v13 = vmul.f32 %v9122_v26, %v5038_v57  ;;  %v5114_v24 = vadd.f32 %v9139_v8, %v5092_v22  ;;  %v9635_v57 = vmax.f32 %v8481_v58, 0.0 }
 0x6fa   : > { %v5115_v59 = vadd.f32 %v9129_v36, %v5093_v13  ;;  %v9638_v13 = vmax.f32 %v8527_v47, 0.0 }
 0x6fc   : > { %v5131_v10 = vadd.f32 %v5115_v59, %v9629_v27  ;;  %v9639_v59 = vmax.f32 %v8594_v21, 0.0  ;;  %v9641_v21 = vld [vmem:[#allocation15_spill] sm:$0xff] }
 0x6fd   : > { %v5067_v55 = vpop.f32.mrf.mxu2 }
 0x6fe   : > { %v5094_v16 = vmul.f32 %v9132_v5, %v5067_v55  ;;  %v5147_v1 = vmax.f32 %v5131_v10, 0.0  ;;  %v5130_v55 = vadd.f32 %v5114_v24, %v9635_v57  ;;  %v9645_v24 = vld [vmem:[#allocation25_spill] sm:$0xff] }
 0x6ff   : > { %v5041_v9 = vpop.f32.mrf.mxu1 }
 0x700   : > { %v5095_v43 = vmul.f32 %v9122_v26, %v5041_v9  ;;  %v5116_v14 = vadd.f32 %v9139_v8, %v5094_v16  ;;  %v5161_v9 = vadd.f32 %v5147_v1, %v5145_v45 }
 0x702   : > { %v5117_v46 = vadd.f32 %v9129_v36, %v5095_v43  ;;  %v5132_v56 = vadd.f32 %v5116_v14, %v9633_v6 }
 0x704   : > { %v5133_v61 = vadd.f32 %v5117_v46, %v9631_v37  ;;  %v5148_v31 = vmax.f32 %v5132_v56, 0.0  ;;  %v9640_v46 = vmax.f32 %v8562_v0, 0.0 }
 0x705   : > { %v5070_v33 = vpop.f32.mrf.mxu2 }
 0x706   : > { %v5096_v39 = vmul.f32 %v9132_v5, %v5070_v33  ;;  %v5149_v54 = vmax.f32 %v5133_v61, 0.0  ;;  %v9636_v33 = vmax.f32 %v8517_v15, 0.0 }
 0x707   : > { %v5043_v48 = vpop.f32.mrf.mxu1 }
 0x708   : > { %v5097_v2 = vmul.f32 %v9122_v26, %v5043_v48  ;;  %v5118_v7 = vadd.f32 %v9139_v8, %v5096_v39  ;;  %v5163_v62 = vadd.f32 %v5161_v9, %v5149_v54 }
 0x70a   : > { %v5119_v12 = vadd.f32 %v9129_v36, %v5097_v2  ;;  %v5134_v48 = vadd.f32 %v5118_v7, %v9636_v33 }
 0x70c   : > { %v5135_v28 = vadd.f32 %v5119_v12, %v9632_v50  ;;  %v5150_v63 = vmax.f32 %v5134_v48, 0.0 }
 0x70d   : > { %v5072_v32 = vpop.f32.mrf.mxu2 }
 0x70e   : > { %v5098_v41 = vmul.f32 %v9132_v5, %v5072_v32  ;;  %v5151_v32 = vmax.f32 %v5135_v28, 0.0 }
 0x70f   : > { %v5046_v4 = vpop.f32.mrf.mxu1 }
 0x710   : > { %v5099_v18 = vmul.f32 %v9122_v26, %v5046_v4  ;;  %v5120_v17 = vadd.f32 %v9139_v8, %v5098_v41  ;;  %v5165_v16 = vadd.f32 %v5163_v62, %v5151_v32  ;;  %v9643_v41 = vld [vmem:[#allocation13_spill] sm:$0xff] }
 0x712   : > { %v5121_v42 = vadd.f32 %v9129_v36, %v5099_v18  ;;  %v5136_v25 = vadd.f32 %v5120_v17, %v9638_v13  ;;  %v9647_v17 = vld [vmem:[#allocation24_spill] sm:$0xff] }
 0x714   : > { %v5137_v51 = vadd.f32 %v5121_v42, %v9634_v40  ;;  %v5152_v39 = vmax.f32 %v5136_v25, 0.0  ;;  %v9648_v40 = vmax.f32 %v9647_v17, 0.0 }
 0x715   : > { %v5075_v30 = vpop.f32.mrf.mxu2 }
 0x716   : > { %v5100_v60 = vmul.f32 %v9132_v5, %v5075_v30  ;;  %v5153_v30 = vmax.f32 %v5137_v51, 0.0 }
 0x717   : > { %v5048_v34 = vpop.f32.mrf.mxu1 }
 0x718   : > { %v5101_v53 = vmul.f32 %v9122_v26, %v5048_v34  ;;  %v5122_v3 = vadd.f32 %v9139_v8, %v5100_v60  ;;  %v5146_v34 = vmax.f32 %v5130_v55, 0.0  ;;  %v5167_v12 = vadd.f32 %v5165_v16, %v5153_v30 }
 0x71a   : > { %v5123_v35 = vadd.f32 %v9129_v36, %v5101_v53  ;;  %v5138_v18 = vadd.f32 %v5122_v3, %v9640_v46  ;;  %v5162_v10 = vadd.f32 %v5148_v31, %v5146_v34  ;;  %v9642_v53 = vmax.f32 %v9641_v21, 0.0 }
 0x71c   : > { %v5139_v4 = vadd.f32 %v5123_v35, %v9637_v23  ;;  %v5164_v37 = vadd.f32 %v5162_v10, %v5150_v63  ;;  %v5154_v0 = vmax.f32 %v5138_v18, 0.0 }
 0x71d   : > { %v5077_v52 = vpop.f32.mrf.mxu2 }
 0x71e   : > { %v5102_v19 = vmul.f32 %v9132_v5, %v5077_v52  ;;  %v5155_v22 = vmax.f32 %v5139_v4, 0.0  ;;  %v9644_v52 = vmax.f32 %v9643_v41, 0.0  ;;  %v5166_v7 = vadd.f32 %v5164_v37, %v5152_v39 }
 0x71f   : > { %v5051_v20 = vpop.f32.mrf.mxu1 }
 0x720   : > { %v5103_v38 = vmul.f32 %v9122_v26, %v5051_v20  ;;  %v5124_v58 = vadd.f32 %v9139_v8, %v5102_v19  ;;  %v5169_v61 = vadd.f32 %v5167_v12, %v5155_v22 }
 0x722   : > { %v5125_v29 = vadd.f32 %v9129_v36, %v5103_v38  ;;  %v5140_v49 = vadd.f32 %v5124_v58, %v9642_v53 }
 0x724   : > { %v5141_v2 = vadd.f32 %v5125_v29, %v9639_v59  ;;  %v5156_v28 = vmax.f32 %v5140_v49, 0.0 }
 0x725   : > { %v5080_v43 = vpop.f32.mrf.mxu2 }
 0x726   : > { %v5104_v15 = vmul.f32 %v9132_v5, %v5080_v43  ;;  %v5157_v11 = vmax.f32 %v5141_v2, 0.0 }
 0x727   : > { %v5053_v44 = vpop.f32.mrf.mxu1 }
 0x728   : > { %v5126_v47 = vadd.f32 %v9139_v8, %v5104_v15  ;;  %v5105_v27 = vmul.f32 %v9122_v26, %v5053_v44  ;;  %v9646_v26 = vmax.f32 %v9645_v24, 0.0  ;;  %v5171_v20 = vadd.f32 %v5169_v61, %v5157_v11 }
 0x72a   : > { %v5127_v14 = vadd.f32 %v9129_v36, %v5105_v27  ;;  %v5142_v42 = vadd.f32 %v5126_v47, %v9644_v52  ;;  %v5168_v36 = vadd.f32 %v5166_v7, %v5154_v0 }
 0x72c   : > { %v5143_v1 = vadd.f32 %v5127_v14, %v9646_v26  ;;  %v5158_v38 = vmax.f32 %v5142_v42, 0.0  ;;  %v5170_v56 = vadd.f32 %v5168_v36, %v5156_v28 }
 0x72d   : > { %v5082_v50 = vpop.f32.mrf.mxu2 }
 0x72e   : > { %v5159_v60 = vmax.f32 %v5143_v1, 0.0  ;;  %v5106_v35 = vmul.f32 %v9132_v5, %v5082_v50  ;;  %v5172_v19 = vadd.f32 %v5170_v56, %v5158_v38 }
 0x730   : > { %v5173_v45 = vadd.f32 %v5171_v20, %v5159_v60  ;;  %v5128_v6 = vadd.f32 %v9139_v8, %v5106_v35 }
 0x732   : > { %v5175_v54 = vmul.f32 0.125, %v5173_v45  ;;  %v5144_v51 = vadd.f32 %v5128_v6, %v9648_v40 }
 0x734   : > { %v5160_v5 = vmax.f32 %v5144_v51, 0.0  ;;  %5177 = vst [vmem:[%s839_s4] sm:$0xff] %v5175_v54 }
 0x736   : > { %v5174_v29 = vadd.f32 %v5172_v19, %v5160_v5 }
 0x738   : > { %v5176_v57 = vmul.f32 0.125, %v5174_v29 }
 0x73a   : > { %5178 = vst [vmem:[%s839_s4 + $0x8] sm:$0xff] %v5176_v57 }
 0x73b   : > { %6631 = shalt.err (!%p6628_p3)
}
 0x73c   : > { %6552 = dma.vmem_to_hbm [thread:$0]  (%p6852_p5), %s5194_s3, 256, %s5196_s2, %s5180_s0  }
 0x73d PF: > { %s9650_s9 = sld [smem:[#allocation8_spill]] }
 0x73e   : > { %s9651_s4 = sld [smem:[#allocation6_spill]] }
 0x743   : > { %p6558_p4 = scmp.ge.s32.totalorder %s9650_s9, 2 }
 0x744   : > { %s5207_s14 = sand.u32 1, %s9651_s4  }
 0x745   : > { %p6555_p7 = pnand %p6558_p4, %p6856_p6  ;;  %s5208_s10 = scalar_lea.sflag [#allocation4], %s5207_s14 }
 0x747   : > { %p6556_p8 = pneg %p6555_p7 }
 0x749   : > { %6649 = dma.done.wait (%p6556_p8), %s5208_s10, 256  }
 0x74a   : > { %6651 = vsyncadd (%p6556_p8), %s5208_s10, 4294967040  ;;  %s9653_s30 = sld [smem:[#allocation9_spill]]  ;;  %s9656_s8 = smov %s6658_s5 }
 0x74b   : > { %s9654_s7 = sld [smem:[#allocation7_spill]] }
 0x74c   : > { %s9655_s9 = sld [smem:[#allocation10_spill]] }
 0x750   : > { %p38_p9 = scmp.ge.s32.totalorder %s9653_s30, 4  }
 0x751   : > { %s9657_s5 = smov %s9654_s7 }
 0x752   :  { %40 = sbr.rel (!%p38_p9) target bundleno = 19 (0x13), region = 191 }
 0x757   :  { %5214 = vsyncpa [#allocation4], 1 }
 0x758   :  { %5216 = vsyncpa [#allocation4 + $0x1], 1 }

</bundles_post_ra>
